<compile_context>
chip_gen: v7x
topology: tpu7x:2x2x1
jax: 0.10.0
libtpu: 0.0.40
codegen_flags: <defaults>
</compile_context>

<pallas_src>
import functools
import math

import jax
import jax.numpy as jnp
from jax import lax
from jax.experimental import pallas as pl
from jax.experimental.pallas import tpu as pltpu


def _silu(x):
    return x * jax.nn.sigmoid(x)


# ----------------------------------------------------------------------------
# Fused HGBlock kernel (whole block, batch folded into the lane axis)
# ----------------------------------------------------------------------------
def _hgblock_kernel(x_ref, wm_ref, bm_ref, wscx_ref, wscm_ref, bsc_ref,
                    wec_ref, bec_ref, o_ref, patch_ref, *, H, W, n, add):
    """Fused HGBlock forward.

    x_ref     : (C1, N)          f32, N = B*H*W, lane = b*H*W + y*W + x
    wm_ref    : (n, CM, 9*Cpad)  bf16 folded 3x3 weights (Cin zero-padded)
    bm_ref    : (n, CM, 1)       f32 folded 3x3 biases
    wscx_ref  : (Chalf, C1)      bf16 squeeze weight, x-channel block
    wscm_ref  : (n, Chalf, CM)   bf16 squeeze weight, per-layer blocks
    bsc_ref   : (Chalf, 1)       f32
    wec_ref   : (C2, Chalf)      bf16 excite weight
    bec_ref   : (C2, 1)          f32
    o_ref     : (C2, N)          f32 lane-dense output
    patch_ref : (9*Cpad, N)      bf16 persistent im2col scratch (conv-dot RHS)
    """
    C1, N = x_ref.shape
    CM = wm_ref.shape[1]
    Cpad = wm_ref.shape[2] // 9
    HW = H * W

    x_f32 = x_ref[...]                                        # (C1, N)

    # Hoisted tap-validity masks: 'same' zero padding AND per-image isolation
    # (every roll that crosses a row / image / batch boundary lands on a
    # masked lane, so the batch fold into the lane axis stays exact).
    lane = lax.broadcasted_iota(jnp.int32, (1, N), 1)
    pix = lane % HW
    col = lane % W
    not_top = pix >= W
    not_bot = pix < (HW - W)
    not_left = col != 0
    not_right = col != (W - 1)
    tap_masks = []
    for kh in range(3):
        for kw in range(3):
            conds = []
            if kh == 0:
                conds.append(not_top)
            if kh == 2:
                conds.append(not_bot)
            if kw == 0:
                conds.append(not_left)
            if kw == 2:
                conds.append(not_right)
            if not conds:                     # center tap: no mask needed
                tap_masks.append(None)
                continue
            m = conds[0]
            for c in conds[1:]:
                m = jnp.logical_and(m, c)
            tap_masks.append(jnp.broadcast_to(m, (Cpad, N)).astype(jnp.float32))

    def pad_rows(a):
        c = a.shape[0]
        if c < Cpad:
            # Padded rows are zero and the matching weight columns are zero.
            a = jnp.concatenate([a, jnp.zeros((Cpad - c, N), jnp.float32)],
                                axis=0)
        return a

    act = pad_rows(x_f32)                                     # (Cpad, N) f32

    # Incremental squeeze accumulation (replaces the channel concat buffer).
    s_acc = jnp.dot(wscx_ref[...], x_f32.astype(jnp.bfloat16),
                    preferred_element_type=jnp.float32)       # (Chalf, N)

    for i in range(n):
        # im2col via XLU lane rotations, written straight into the bf16 scratch.
        for kh in range(3):
            for kw in range(3):
                t = kh * 3 + kw
                d = (kh - 1) * W + (kw - 1)                   # tap offset
                tap = act if d == 0 else pltpu.roll(act, shift=(-d) % N, axis=1)
                if tap_masks[t] is not None:
                    tap = tap * tap_masks[t]
                patch_ref[t * Cpad:(t + 1) * Cpad, :] = tap.astype(jnp.bfloat16)

        # One MXU dot per 3x3 conv: (CM, 9*Cpad) @ (9*Cpad, N), f32 accumulate.
        z = jnp.dot(wm_ref[i], patch_ref[...],
                    preferred_element_type=jnp.float32) + bm_ref[i]
        z = _silu(z)                                          # (CM, N) f32
        s_acc = s_acc + jnp.dot(wscm_ref[i], z.astype(jnp.bfloat16),
                                preferred_element_type=jnp.float32)
        act = pad_rows(z)

    s = _silu(s_acc + bsc_ref[...])                           # (Chalf, N)
    e = jnp.dot(wec_ref[...], s.astype(jnp.bfloat16),
                preferred_element_type=jnp.float32) + bec_ref[...]
    e = _silu(e)                                              # (C2, N)
    if add:                                                   # shortcut, c1==c2
        e = e + x_f32
    o_ref[...] = e.astype(o_ref.dtype)                        # lane-dense store


# ----------------------------------------------------------------------------
# Wrapper: parameter re-layout + pallas_call glue
# ----------------------------------------------------------------------------
def _prep_conv3(w_hwio, cin_pad):
    """(3,3,Cin,Cout) folded HWIO weight -> (Cout, 9*cin_pad) channel-major."""
    _, _, cin, cout = w_hwio.shape
    wm = jnp.transpose(w_hwio, (3, 0, 1, 2))                  # (Cout,3,3,Cin)
    if cin < cin_pad:
        wm = jnp.pad(wm, ((0, 0), (0, 0), (0, 0), (0, cin_pad - cin)))
    return wm.reshape(cout, 9 * cin_pad)


def hgblock_forward(x, m_params, sc_params, ec_params, add):
    """HGBlock.forward — NCHW in, NCHW out, single fused pallas_call."""
    B, C1, H, W = x.shape
    HW = H * W
    N = B * HW
    n = len(m_params)
    CM = m_params[0][0].shape[-1]
    Chalf = sc_params[0].shape[-1]
    C2 = ec_params[0].shape[-1]
    Ccat = C1 + n * CM
    Cpad = max(C1, CM)

    # bf16 MXU operands (kernel accumulates in f32).
    wm_all = jnp.stack([_prep_conv3(w, Cpad) for (w, _) in m_params]
                       ).astype(jnp.bfloat16)                       # (n,CM,9*Cpad)
    bm_all = jnp.stack([b.reshape(CM, 1) for (_, b) in m_params])   # (n,CM,1) f32
    wsc_t = sc_params[0].T                                          # (Chalf,Ccat)
    wsc_x = wsc_t[:, :C1].astype(jnp.bfloat16)                      # (Chalf,C1)
    wsc_m = jnp.stack([wsc_t[:, C1 + i * CM: C1 + (i + 1) * CM]
                       for i in range(n)]).astype(jnp.bfloat16)     # (n,Chalf,CM)
    bsc = sc_params[1].reshape(Chalf, 1)
    wec = ec_params[0].T.astype(jnp.bfloat16)                       # (C2,Chalf)
    bec = ec_params[1].reshape(C2, 1)

    # Channel-major, batch folded into the lane axis.
    x_cm = jnp.transpose(x, (1, 0, 2, 3)).reshape(C1, N)

    flops = 2 * N * (n * CM * 9 * Cpad + Chalf * Ccat + C2 * Chalf)
    transcendentals = N * (n * CM + Chalf + C2)
    bytes_accessed = (4 * (x_cm.size + bm_all.size + bsc.size + bec.size + C2 * N)
                      + 2 * (wm_all.size + wsc_x.size + wsc_m.size + wec.size))

    kernel = functools.partial(_hgblock_kernel, H=H, W=W, n=n,
                               add=bool(add and C1 == C2))
    out_cm = pl.pallas_call(
        kernel,
        out_shape=jax.ShapeDtypeStruct((C2, N), jnp.float32),
        scratch_shapes=[pltpu.VMEM((9 * Cpad, N), jnp.bfloat16)],
        compiler_params=pltpu.CompilerParams(
            vmem_limit_bytes=32 * 1024 * 1024),
        cost_estimate=pl.CostEstimate(flops=flops,
                                      transcendentals=transcendentals,
                                      bytes_accessed=bytes_accessed),
    )(x_cm, wm_all, bm_all, wsc_x, wsc_m, bsc, wec, bec)
    return jnp.transpose(out_cm.reshape(C2, B, H, W), (1, 0, 2, 3))


# ----------------------------------------------------------------------------
# Parameter construction: Conv2d(bias=False) + BatchNorm2d (eval) folded
# ----------------------------------------------------------------------------
def init_conv_bn(key, cin, cout, k):
    kw_, kg, kb, km, kv = jax.random.split(key, 5)
    fan_in = cin * k * k
    bound = 1.0 / math.sqrt(fan_in)
    w = jax.random.uniform(kw_, (k, k, cin, cout), jnp.float32, -bound, bound)
    gamma = jax.random.uniform(kg, (cout,), jnp.float32, 0.5, 1.5)
    beta = 0.1 * jax.random.normal(kb, (cout,), jnp.float32)
    mean = 0.1 * jax.random.normal(km, (cout,), jnp.float32)
    var = jax.random.uniform(kv, (cout,), jnp.float32, 0.5, 1.5)
    eps = 1e-5  # nn.BatchNorm2d default
    scale = gamma / jnp.sqrt(var + eps)
    w_folded = w * scale                      # broadcast over Cout (last dim)
    b_folded = beta - mean * scale
    if k == 1:
        w_folded = w_folded.reshape(cin, cout)
    return w_folded, b_folded


def init_hgblock(key, c1, cm, c2, n):
    keys = jax.random.split(key, n + 2)
    m_params = []
    for i in range(n):
        cin = c1 if i == 0 else cm
        m_params.append(init_conv_bn(keys[i], cin, cm, 3))
    sc_params = init_conv_bn(keys[n], c1 + n * cm, c2 // 2, 1)
    ec_params = init_conv_bn(keys[n + 1], c2 // 2, c2, 1)
    return m_params, sc_params, ec_params


# ----------------------------------------------------------------------------
# Pure-JAX reference (NCHW, for correctness check)
# ----------------------------------------------------------------------------
def _conv_ref_nchw(x, w, b, k):
    if k == 3:
        out = lax.conv_general_dilated(
            x, w, window_strides=(1, 1), padding=((1, 1), (1, 1)),
            dimension_numbers=("NCHW", "HWIO", "NCHW"))
    else:
        out = jnp.einsum("bchw,cd->bdhw", x, w)
    return _silu(out + b.reshape(1, -1, 1, 1))


def hgblock_ref(x, m_params, sc_params, ec_params, add):
    y = [x]
    for (w, b) in m_params:
        y.append(_conv_ref_nchw(y[-1], w, b, 3))
    cat = jnp.concatenate(y, axis=1)
    out = _conv_ref_nchw(cat, sc_params[0], sc_params[1], 1)
    out = _conv_ref_nchw(out, ec_params[0], ec_params[1], 1)
    return out + x if add else out


if __name__ == "__main__":
    # HGBlock(c1=8, cm=16, c2=32, k=3, n=6, lightconv=False, shortcut=False, act=True)
    B, C1, CM, C2, N_LAYERS = 2, 8, 16, 32, 6
    H = W = 16
    key = jax.random.PRNGKey(0)
    kx, kp = jax.random.split(key)

    x = jax.random.normal(kx, (B, C1, H, W), jnp.float32)   # NCHW, like PyTorch
    m_params, sc_params, ec_params = init_hgblock(kp, C1, CM, C2, N_LAYERS)
    add = False  # shortcut=False (and c1 != c2)

    out = hgblock_forward(x, m_params, sc_params, ec_params, add)
    out = jax.block_until_ready(out)

    ref = hgblock_ref(x, m_params, sc_params, ec_params, add)
    assert out.shape == (B, C2, H, W)
    # Tolerance accounts for bf16 MXU operands in the kernel vs the f32 ref.
    assert jnp.allclose(out, ref, atol=3e-2, rtol=3e-2), \
        "Pallas output mismatch vs reference"

    print("KERNEL_OK")
</pallas_src>

<mosaic_0001>
module attributes {stable_mosaic.version = 11 : i64} {
  func.func @_hgblock_kernel(%arg0: memref<8x512xf32, #tpu.memory_space<vmem>>, %arg1: memref<6x16x144xbf16, #tpu.memory_space<vmem>>, %arg2: memref<6x16x1xf32, #tpu.memory_space<vmem>>, %arg3: memref<16x8xbf16, #tpu.memory_space<vmem>>, %arg4: memref<6x16x16xbf16, #tpu.memory_space<vmem>>, %arg5: memref<16x1xf32, #tpu.memory_space<vmem>>, %arg6: memref<32x16xbf16, #tpu.memory_space<vmem>>, %arg7: memref<32x1xf32, #tpu.memory_space<vmem>>, %arg8: memref<32x512xf32, #tpu.memory_space<vmem>>, %arg9: memref<144x512xbf16, #tpu.memory_space<vmem>>) attributes {dimension_semantics = [], scalar_prefetch = 0 : i64, scratch_operands = 1 : i64, tpu.core_type = #tpu.core_type<tc>} {
    %c0 = arith.constant 0 : index
    %c0_0 = arith.constant 0 : index
    %0 = vector.load %arg0[%c0, %c0_0] : memref<8x512xf32, #tpu.memory_space<vmem>>, vector<8x512xf32>
    %1 = tpu.iota {dimensions = array<i32: 1>} : vector<1x512xi32>
    %c256_i32 = arith.constant 256 : i32
    %c0_i32 = arith.constant 0 : i32
    %2 = arith.cmpi eq, %c256_i32, %c0_i32 : i32
    %c1_i32 = arith.constant 1 : i32
    %3 = arith.select %2, %c1_i32, %c256_i32 : i32
    %4 = vector.broadcast %3 : i32 to vector<1x512xi32>
    %5 = arith.remsi %1, %4 : vector<1x512xi32>
    %c0_i32_1 = arith.constant 0 : i32
    %6 = vector.broadcast %c0_i32_1 : i32 to vector<1x512xi32>
    %7 = arith.cmpi ne, %5, %6 : vector<1x512xi32>
    %c0_i32_2 = arith.constant 0 : i32
    %8 = vector.broadcast %c0_i32_2 : i32 to vector<1x512xi32>
    %9 = arith.cmpi slt, %5, %8 : vector<1x512xi32>
    %c0_i32_3 = arith.constant 0 : i32
    %10 = arith.cmpi slt, %3, %c0_i32_3 : i32
    %11 = vector.broadcast %10 : i1 to vector<1x512xi1>
    %12 = vector.broadcast %11 : vector<1x512xi1> to vector<1x512xi1>
    %13 = arith.xori %9, %12 : vector<1x512xi1>
    %14 = arith.andi %13, %7 : vector<1x512xi1>
    %15 = vector.broadcast %3 : i32 to vector<1x512xi32>
    %16 = arith.addi %5, %15 : vector<1x512xi32>
    %17 = arith.select %14, %16, %5 : vector<1x512xi1>, vector<1x512xi32>
    %c16_i32 = arith.constant 16 : i32
    %c0_i32_4 = arith.constant 0 : i32
    %18 = arith.cmpi eq, %c16_i32, %c0_i32_4 : i32
    %c1_i32_5 = arith.constant 1 : i32
    %19 = arith.select %18, %c1_i32_5, %c16_i32 : i32
    %20 = vector.broadcast %19 : i32 to vector<1x512xi32>
    %21 = arith.remsi %1, %20 : vector<1x512xi32>
    %c0_i32_6 = arith.constant 0 : i32
    %22 = vector.broadcast %c0_i32_6 : i32 to vector<1x512xi32>
    %23 = arith.cmpi ne, %21, %22 : vector<1x512xi32>
    %c0_i32_7 = arith.constant 0 : i32
    %24 = vector.broadcast %c0_i32_7 : i32 to vector<1x512xi32>
    %25 = arith.cmpi slt, %21, %24 : vector<1x512xi32>
    %c0_i32_8 = arith.constant 0 : i32
    %26 = arith.cmpi slt, %19, %c0_i32_8 : i32
    %27 = vector.broadcast %26 : i1 to vector<1x512xi1>
    %28 = vector.broadcast %27 : vector<1x512xi1> to vector<1x512xi1>
    %29 = arith.xori %25, %28 : vector<1x512xi1>
    %30 = arith.andi %29, %23 : vector<1x512xi1>
    %31 = vector.broadcast %19 : i32 to vector<1x512xi32>
    %32 = arith.addi %21, %31 : vector<1x512xi32>
    %33 = arith.select %30, %32, %21 : vector<1x512xi1>, vector<1x512xi32>
    %c16_i32_9 = arith.constant 16 : i32
    %34 = vector.broadcast %c16_i32_9 : i32 to vector<1x512xi32>
    %35 = arith.cmpi sge, %17, %34 : vector<1x512xi32>
    %c240_i32 = arith.constant 240 : i32
    %36 = vector.broadcast %c240_i32 : i32 to vector<1x512xi32>
    %37 = arith.cmpi slt, %17, %36 : vector<1x512xi32>
    %c0_i32_10 = arith.constant 0 : i32
    %38 = vector.broadcast %c0_i32_10 : i32 to vector<1x512xi32>
    %39 = arith.cmpi ne, %33, %38 : vector<1x512xi32>
    %c15_i32 = arith.constant 15 : i32
    %40 = vector.broadcast %c15_i32 : i32 to vector<1x512xi32>
    %41 = arith.cmpi ne, %33, %40 : vector<1x512xi32>
    %42 = arith.andi %35, %39 : vector<1x512xi1>
    %43 = vector.shape_cast %42 : vector<1x512xi1> to vector<1x512xi1>
    %44 = vector.broadcast %43 : vector<1x512xi1> to vector<16x512xi1>
    %45 = arith.extui %44 : vector<16x512xi1> to vector<16x512xi32>
    %46 = arith.sitofp %45 : vector<16x512xi32> to vector<16x512xf32>
    %47 = vector.shape_cast %35 : vector<1x512xi1> to vector<1x512xi1>
    %48 = vector.broadcast %47 : vector<1x512xi1> to vector<16x512xi1>
    %49 = arith.extui %48 : vector<16x512xi1> to vector<16x512xi32>
    %50 = arith.sitofp %49 : vector<16x512xi32> to vector<16x512xf32>
    %51 = arith.andi %35, %41 : vector<1x512xi1>
    %52 = vector.shape_cast %51 : vector<1x512xi1> to vector<1x512xi1>
    %53 = vector.broadcast %52 : vector<1x512xi1> to vector<16x512xi1>
    %54 = arith.extui %53 : vector<16x512xi1> to vector<16x512xi32>
    %55 = arith.sitofp %54 : vector<16x512xi32> to vector<16x512xf32>
    %56 = vector.shape_cast %39 : vector<1x512xi1> to vector<1x512xi1>
    %57 = vector.broadcast %56 : vector<1x512xi1> to vector<16x512xi1>
    %58 = arith.extui %57 : vector<16x512xi1> to vector<16x512xi32>
    %59 = arith.sitofp %58 : vector<16x512xi32> to vector<16x512xf32>
    %60 = vector.shape_cast %41 : vector<1x512xi1> to vector<1x512xi1>
    %61 = vector.broadcast %60 : vector<1x512xi1> to vector<16x512xi1>
    %62 = arith.extui %61 : vector<16x512xi1> to vector<16x512xi32>
    %63 = arith.sitofp %62 : vector<16x512xi32> to vector<16x512xf32>
    %64 = arith.andi %37, %39 : vector<1x512xi1>
    %65 = vector.shape_cast %64 : vector<1x512xi1> to vector<1x512xi1>
    %66 = vector.broadcast %65 : vector<1x512xi1> to vector<16x512xi1>
    %67 = arith.extui %66 : vector<16x512xi1> to vector<16x512xi32>
    %68 = arith.sitofp %67 : vector<16x512xi32> to vector<16x512xf32>
    %69 = vector.shape_cast %37 : vector<1x512xi1> to vector<1x512xi1>
    %70 = vector.broadcast %69 : vector<1x512xi1> to vector<16x512xi1>
    %71 = arith.extui %70 : vector<16x512xi1> to vector<16x512xi32>
    %72 = arith.sitofp %71 : vector<16x512xi32> to vector<16x512xf32>
    %73 = arith.andi %37, %41 : vector<1x512xi1>
    %74 = vector.shape_cast %73 : vector<1x512xi1> to vector<1x512xi1>
    %75 = vector.broadcast %74 : vector<1x512xi1> to vector<16x512xi1>
    %76 = arith.extui %75 : vector<16x512xi1> to vector<16x512xi32>
    %77 = arith.sitofp %76 : vector<16x512xi32> to vector<16x512xf32>
    %cst = arith.constant 0.000000e+00 : f32
    %78 = vector.broadcast %cst : f32 to vector<8x512xf32>
    %79 = tpu.concatenate %0, %78 in 0 : vector<8x512xf32>, vector<8x512xf32> -> vector<16x512xf32>
    %c0_11 = arith.constant 0 : index
    %c0_12 = arith.constant 0 : index
    %80 = vector.load %arg3[%c0_11, %c0_12] : memref<16x8xbf16, #tpu.memory_space<vmem>>, vector<16x8xbf16>
    %81 = arith.truncf %0 : vector<8x512xf32> to vector<8x512xbf16>
    %cst_13 = arith.constant dense<0.000000e+00> : vector<16x512xf32>
    %82 = tpu.matmul %80, %81, %cst_13 {dimension_numbers = #tpu.dot_dimension_numbers<[1], [0], [0], [1], [0, 0, 1, 1], [], []>} : vector<16x8xbf16>, vector<8x512xbf16>, vector<16x512xf32> -> vector<16x512xf32>
    %c17_i32 = arith.constant 17 : i32
    %83 = tpu.dynamic_rotate %79 by %c17_i32 dim 1 : vector<16x512xf32>, i32 -> vector<16x512xf32>
    %84 = arith.mulf %83, %46 : vector<16x512xf32>
    %85 = arith.truncf %84 : vector<16x512xf32> to vector<16x512xbf16>
    %c0_14 = arith.constant 0 : index
    %c0_15 = arith.constant 0 : index
    %86 = vector.load %arg9[%c0_14, %c0_15] : memref<144x512xbf16, #tpu.memory_space<vmem>>, vector<16x512xbf16>
    tpu.vector_store %arg9[%c0_14, %c0_15], %85 {strides = array<i32>} : memref<144x512xbf16, #tpu.memory_space<vmem>>, vector<16x512xbf16>,
    %c16_i32_16 = arith.constant 16 : i32
    %87 = tpu.dynamic_rotate %79 by %c16_i32_16 dim 1 : vector<16x512xf32>, i32 -> vector<16x512xf32>
    %88 = arith.mulf %87, %50 : vector<16x512xf32>
    %89 = arith.truncf %88 : vector<16x512xf32> to vector<16x512xbf16>
    %c16 = arith.constant 16 : index
    %c0_17 = arith.constant 0 : index
    %90 = vector.load %arg9[%c16, %c0_17] : memref<144x512xbf16, #tpu.memory_space<vmem>>, vector<16x512xbf16>
    tpu.vector_store %arg9[%c16, %c0_17], %89 {strides = array<i32>} : memref<144x512xbf16, #tpu.memory_space<vmem>>, vector<16x512xbf16>,
    %c15_i32_18 = arith.constant 15 : i32
    %91 = tpu.dynamic_rotate %79 by %c15_i32_18 dim 1 : vector<16x512xf32>, i32 -> vector<16x512xf32>
    %92 = arith.mulf %91, %55 : vector<16x512xf32>
    %93 = arith.truncf %92 : vector<16x512xf32> to vector<16x512xbf16>
    %c32 = arith.constant 32 : index
    %c0_19 = arith.constant 0 : index
    %94 = vector.load %arg9[%c32, %c0_19] : memref<144x512xbf16, #tpu.memory_space<vmem>>, vector<16x512xbf16>
    tpu.vector_store %arg9[%c32, %c0_19], %93 {strides = array<i32>} : memref<144x512xbf16, #tpu.memory_space<vmem>>, vector<16x512xbf16>,
    %c1_i32_20 = arith.constant 1 : i32
    %95 = tpu.dynamic_rotate %79 by %c1_i32_20 dim 1 : vector<16x512xf32>, i32 -> vector<16x512xf32>
    %96 = arith.mulf %95, %59 : vector<16x512xf32>
    %97 = arith.truncf %96 : vector<16x512xf32> to vector<16x512xbf16>
    %c48 = arith.constant 48 : index
    %c0_21 = arith.constant 0 : index
    %98 = vector.load %arg9[%c48, %c0_21] : memref<144x512xbf16, #tpu.memory_space<vmem>>, vector<16x512xbf16>
    tpu.vector_store %arg9[%c48, %c0_21], %97 {strides = array<i32>} : memref<144x512xbf16, #tpu.memory_space<vmem>>, vector<16x512xbf16>,
    %99 = arith.truncf %79 : vector<16x512xf32> to vector<16x512xbf16>
    %c64 = arith.constant 64 : index
    %c0_22 = arith.constant 0 : index
    %100 = vector.load %arg9[%c64, %c0_22] : memref<144x512xbf16, #tpu.memory_space<vmem>>, vector<16x512xbf16>
    tpu.vector_store %arg9[%c64, %c0_22], %99 {strides = array<i32>} : memref<144x512xbf16, #tpu.memory_space<vmem>>, vector<16x512xbf16>,
    %c511_i32 = arith.constant 511 : i32
    %101 = tpu.dynamic_rotate %79 by %c511_i32 dim 1 : vector<16x512xf32>, i32 -> vector<16x512xf32>
    %102 = arith.mulf %101, %63 : vector<16x512xf32>
    %103 = arith.truncf %102 : vector<16x512xf32> to vector<16x512xbf16>
    %c80 = arith.constant 80 : index
    %c0_23 = arith.constant 0 : index
    %104 = vector.load %arg9[%c80, %c0_23] : memref<144x512xbf16, #tpu.memory_space<vmem>>, vector<16x512xbf16>
    tpu.vector_store %arg9[%c80, %c0_23], %103 {strides = array<i32>} : memref<144x512xbf16, #tpu.memory_space<vmem>>, vector<16x512xbf16>,
    %c497_i32 = arith.constant 497 : i32
    %105 = tpu.dynamic_rotate %79 by %c497_i32 dim 1 : vector<16x512xf32>, i32 -> vector<16x512xf32>
    %106 = arith.mulf %105, %68 : vector<16x512xf32>
    %107 = arith.truncf %106 : vector<16x512xf32> to vector<16x512xbf16>
    %c96 = arith.constant 96 : index
    %c0_24 = arith.constant 0 : index
    %108 = vector.load %arg9[%c96, %c0_24] : memref<144x512xbf16, #tpu.memory_space<vmem>>, vector<16x512xbf16>
    tpu.vector_store %arg9[%c96, %c0_24], %107 {strides = array<i32>} : memref<144x512xbf16, #tpu.memory_space<vmem>>, vector<16x512xbf16>,
    %c496_i32 = arith.constant 496 : i32
    %109 = tpu.dynamic_rotate %79 by %c496_i32 dim 1 : vector<16x512xf32>, i32 -> vector<16x512xf32>
    %110 = arith.mulf %109, %72 : vector<16x512xf32>
    %111 = arith.truncf %110 : vector<16x512xf32> to vector<16x512xbf16>
    %c112 = arith.constant 112 : index
    %c0_25 = arith.constant 0 : index
    %112 = vector.load %arg9[%c112, %c0_25] : memref<144x512xbf16, #tpu.memory_space<vmem>>, vector<16x512xbf16>
    tpu.vector_store %arg9[%c112, %c0_25], %111 {strides = array<i32>} : memref<144x512xbf16, #tpu.memory_space<vmem>>, vector<16x512xbf16>,
    %c495_i32 = arith.constant 495 : i32
    %113 = tpu.dynamic_rotate %79 by %c495_i32 dim 1 : vector<16x512xf32>, i32 -> vector<16x512xf32>
    %114 = arith.mulf %113, %77 : vector<16x512xf32>
    %115 = arith.truncf %114 : vector<16x512xf32> to vector<16x512xbf16>
    %c128 = arith.constant 128 : index
    %c0_26 = arith.constant 0 : index
    %116 = vector.load %arg9[%c128, %c0_26] : memref<144x512xbf16, #tpu.memory_space<vmem>>, vector<16x512xbf16>
    tpu.vector_store %arg9[%c128, %c0_26], %115 {strides = array<i32>} : memref<144x512xbf16, #tpu.memory_space<vmem>>, vector<16x512xbf16>,
    %c0_27 = arith.constant 0 : index
    %c0_28 = arith.constant 0 : index
    %c0_29 = arith.constant 0 : index
    %117 = vector.load %arg1[%c0_27, %c0_28, %c0_29] : memref<6x16x144xbf16, #tpu.memory_space<vmem>>, vector<1x16x144xbf16>
    %118 = vector.shape_cast %117 : vector<1x16x144xbf16> to vector<16x144xbf16>
    %c0_30 = arith.constant 0 : index
    %c0_31 = arith.constant 0 : index
    %119 = vector.load %arg9[%c0_30, %c0_31] : memref<144x512xbf16, #tpu.memory_space<vmem>>, vector<144x512xbf16>
    %cst_32 = arith.constant dense<0.000000e+00> : vector<16x512xf32>
    %120 = tpu.matmul %118, %119, %cst_32 {dimension_numbers = #tpu.dot_dimension_numbers<[1], [0], [0], [1], [0, 0, 1, 1], [], []>} : vector<16x144xbf16>, vector<144x512xbf16>, vector<16x512xf32> -> vector<16x512xf32>
    %c0_33 = arith.constant 0 : index
    %c0_34 = arith.constant 0 : index
    %c0_35 = arith.constant 0 : index
    %121 = vector.load %arg2[%c0_33, %c0_34, %c0_35] : memref<6x16x1xf32, #tpu.memory_space<vmem>>, vector<1x16x1xf32>
    %122 = vector.shape_cast %121 : vector<1x16x1xf32> to vector<16x1xf32>
    %123 = vector.broadcast %122 : vector<16x1xf32> to vector<16x512xf32>
    %124 = arith.addf %120, %123 : vector<16x512xf32>
    %125 = arith.negf %124 : vector<16x512xf32>
    %126 = math.exp %125 : vector<16x512xf32>
    %cst_36 = arith.constant 1.000000e+00 : f32
    %127 = vector.broadcast %cst_36 : f32 to vector<16x512xf32>
    %128 = arith.addf %127, %126 : vector<16x512xf32>
    %129 = arith.divf %127, %128 : vector<16x512xf32>
    %130 = arith.mulf %124, %129 : vector<16x512xf32>
    %c0_37 = arith.constant 0 : index
    %c0_38 = arith.constant 0 : index
    %c0_39 = arith.constant 0 : index
    %131 = vector.load %arg4[%c0_37, %c0_38, %c0_39] : memref<6x16x16xbf16, #tpu.memory_space<vmem>>, vector<1x16x16xbf16>
    %132 = vector.shape_cast %131 : vector<1x16x16xbf16> to vector<16x16xbf16>
    %133 = arith.truncf %130 : vector<16x512xf32> to vector<16x512xbf16>
    %cst_40 = arith.constant dense<0.000000e+00> : vector<16x512xf32>
    %134 = tpu.matmul %132, %133, %cst_40 {dimension_numbers = #tpu.dot_dimension_numbers<[1], [0], [0], [1], [0, 0, 1, 1], [], []>} : vector<16x16xbf16>, vector<16x512xbf16>, vector<16x512xf32> -> vector<16x512xf32>
    %135 = arith.addf %82, %134 : vector<16x512xf32>
    %c17_i32_41 = arith.constant 17 : i32
    %136 = tpu.dynamic_rotate %130 by %c17_i32_41 dim 1 : vector<16x512xf32>, i32 -> vector<16x512xf32>
    %137 = arith.mulf %136, %46 : vector<16x512xf32>
    %138 = arith.truncf %137 : vector<16x512xf32> to vector<16x512xbf16>
    %c0_42 = arith.constant 0 : index
    %c0_43 = arith.constant 0 : index
    %139 = vector.load %arg9[%c0_42, %c0_43] : memref<144x512xbf16, #tpu.memory_space<vmem>>, vector<16x512xbf16>
    tpu.vector_store %arg9[%c0_42, %c0_43], %138 {strides = array<i32>} : memref<144x512xbf16, #tpu.memory_space<vmem>>, vector<16x512xbf16>,
    %c16_i32_44 = arith.constant 16 : i32
    %140 = tpu.dynamic_rotate %130 by %c16_i32_44 dim 1 : vector<16x512xf32>, i32 -> vector<16x512xf32>
    %141 = arith.mulf %140, %50 : vector<16x512xf32>
    %142 = arith.truncf %141 : vector<16x512xf32> to vector<16x512xbf16>
    %c16_45 = arith.constant 16 : index
    %c0_46 = arith.constant 0 : index
    %143 = vector.load %arg9[%c16_45, %c0_46] : memref<144x512xbf16, #tpu.memory_space<vmem>>, vector<16x512xbf16>
    tpu.vector_store %arg9[%c16_45, %c0_46], %142 {strides = array<i32>} : memref<144x512xbf16, #tpu.memory_space<vmem>>, vector<16x512xbf16>,
    %c15_i32_47 = arith.constant 15 : i32
    %144 = tpu.dynamic_rotate %130 by %c15_i32_47 dim 1 : vector<16x512xf32>, i32 -> vector<16x512xf32>
    %145 = arith.mulf %144, %55 : vector<16x512xf32>
    %146 = arith.truncf %145 : vector<16x512xf32> to vector<16x512xbf16>
    %c32_48 = arith.constant 32 : index
    %c0_49 = arith.constant 0 : index
    %147 = vector.load %arg9[%c32_48, %c0_49] : memref<144x512xbf16, #tpu.memory_space<vmem>>, vector<16x512xbf16>
    tpu.vector_store %arg9[%c32_48, %c0_49], %146 {strides = array<i32>} : memref<144x512xbf16, #tpu.memory_space<vmem>>, vector<16x512xbf16>,
    %c1_i32_50 = arith.constant 1 : i32
    %148 = tpu.dynamic_rotate %130 by %c1_i32_50 dim 1 : vector<16x512xf32>, i32 -> vector<16x512xf32>
    %149 = arith.mulf %148, %59 : vector<16x512xf32>
    %150 = arith.truncf %149 : vector<16x512xf32> to vector<16x512xbf16>
    %c48_51 = arith.constant 48 : index
    %c0_52 = arith.constant 0 : index
    %151 = vector.load %arg9[%c48_51, %c0_52] : memref<144x512xbf16, #tpu.memory_space<vmem>>, vector<16x512xbf16>
    tpu.vector_store %arg9[%c48_51, %c0_52], %150 {strides = array<i32>} : memref<144x512xbf16, #tpu.memory_space<vmem>>, vector<16x512xbf16>,
    %152 = arith.truncf %130 : vector<16x512xf32> to vector<16x512xbf16>
    %c64_53 = arith.constant 64 : index
    %c0_54 = arith.constant 0 : index
    %153 = vector.load %arg9[%c64_53, %c0_54] : memref<144x512xbf16, #tpu.memory_space<vmem>>, vector<16x512xbf16>
    tpu.vector_store %arg9[%c64_53, %c0_54], %152 {strides = array<i32>} : memref<144x512xbf16, #tpu.memory_space<vmem>>, vector<16x512xbf16>,
    %c511_i32_55 = arith.constant 511 : i32
    %154 = tpu.dynamic_rotate %130 by %c511_i32_55 dim 1 : vector<16x512xf32>, i32 -> vector<16x512xf32>
    %155 = arith.mulf %154, %63 : vector<16x512xf32>
    %156 = arith.truncf %155 : vector<16x512xf32> to vector<16x512xbf16>
    %c80_56 = arith.constant 80 : index
    %c0_57 = arith.constant 0 : index
    %157 = vector.load %arg9[%c80_56, %c0_57] : memref<144x512xbf16, #tpu.memory_space<vmem>>, vector<16x512xbf16>
    tpu.vector_store %arg9[%c80_56, %c0_57], %156 {strides = array<i32>} : memref<144x512xbf16, #tpu.memory_space<vmem>>, vector<16x512xbf16>,
    %c497_i32_58 = arith.constant 497 : i32
    %158 = tpu.dynamic_rotate %130 by %c497_i32_58 dim 1 : vector<16x512xf32>, i32 -> vector<16x512xf32>
    %159 = arith.mulf %158, %68 : vector<16x512xf32>
    %160 = arith.truncf %159 : vector<16x512xf32> to vector<16x512xbf16>
    %c96_59 = arith.constant 96 : index
    %c0_60 = arith.constant 0 : index
    %161 = vector.load %arg9[%c96_59, %c0_60] : memref<144x512xbf16, #tpu.memory_space<vmem>>, vector<16x512xbf16>
    tpu.vector_store %arg9[%c96_59, %c0_60], %160 {strides = array<i32>} : memref<144x512xbf16, #tpu.memory_space<vmem>>, vector<16x512xbf16>,
    %c496_i32_61 = arith.constant 496 : i32
    %162 = tpu.dynamic_rotate %130 by %c496_i32_61 dim 1 : vector<16x512xf32>, i32 -> vector<16x512xf32>
    %163 = arith.mulf %162, %72 : vector<16x512xf32>
    %164 = arith.truncf %163 : vector<16x512xf32> to vector<16x512xbf16>
    %c112_62 = arith.constant 112 : index
    %c0_63 = arith.constant 0 : index
    %165 = vector.load %arg9[%c112_62, %c0_63] : memref<144x512xbf16, #tpu.memory_space<vmem>>, vector<16x512xbf16>
    tpu.vector_store %arg9[%c112_62, %c0_63], %164 {strides = array<i32>} : memref<144x512xbf16, #tpu.memory_space<vmem>>, vector<16x512xbf16>,
    %c495_i32_64 = arith.constant 495 : i32
    %166 = tpu.dynamic_rotate %130 by %c495_i32_64 dim 1 : vector<16x512xf32>, i32 -> vector<16x512xf32>
    %167 = arith.mulf %166, %77 : vector<16x512xf32>
    %168 = arith.truncf %167 : vector<16x512xf32> to vector<16x512xbf16>
    %c128_65 = arith.constant 128 : index
    %c0_66 = arith.constant 0 : index
    %169 = vector.load %arg9[%c128_65, %c0_66] : memref<144x512xbf16, #tpu.memory_space<vmem>>, vector<16x512xbf16>
    tpu.vector_store %arg9[%c128_65, %c0_66], %168 {strides = array<i32>} : memref<144x512xbf16, #tpu.memory_space<vmem>>, vector<16x512xbf16>,
    %c1 = arith.constant 1 : index
    %c0_67 = arith.constant 0 : index
    %c0_68 = arith.constant 0 : index
    %170 = vector.load %arg1[%c1, %c0_67, %c0_68] : memref<6x16x144xbf16, #tpu.memory_space<vmem>>, vector<1x16x144xbf16>
    %171 = vector.shape_cast %170 : vector<1x16x144xbf16> to vector<16x144xbf16>
    %c0_69 = arith.constant 0 : index
    %c0_70 = arith.constant 0 : index
    %172 = vector.load %arg9[%c0_69, %c0_70] : memref<144x512xbf16, #tpu.memory_space<vmem>>, vector<144x512xbf16>
    %cst_71 = arith.constant dense<0.000000e+00> : vector<16x512xf32>
    %173 = tpu.matmul %171, %172, %cst_71 {dimension_numbers = #tpu.dot_dimension_numbers<[1], [0], [0], [1], [0, 0, 1, 1], [], []>} : vector<16x144xbf16>, vector<144x512xbf16>, vector<16x512xf32> -> vector<16x512xf32>
    %c1_72 = arith.constant 1 : index
    %c0_73 = arith.constant 0 : index
    %c0_74 = arith.constant 0 : index
    %174 = vector.load %arg2[%c1_72, %c0_73, %c0_74] : memref<6x16x1xf32, #tpu.memory_space<vmem>>, vector<1x16x1xf32>
    %175 = vector.shape_cast %174 : vector<1x16x1xf32> to vector<16x1xf32>
    %176 = vector.broadcast %175 : vector<16x1xf32> to vector<16x512xf32>
    %177 = arith.addf %173, %176 : vector<16x512xf32>
    %178 = arith.negf %177 : vector<16x512xf32>
    %179 = math.exp %178 : vector<16x512xf32>
    %cst_75 = arith.constant 1.000000e+00 : f32
    %180 = vector.broadcast %cst_75 : f32 to vector<16x512xf32>
    %181 = arith.addf %180, %179 : vector<16x512xf32>
    %182 = arith.divf %180, %181 : vector<16x512xf32>
    %183 = arith.mulf %177, %182 : vector<16x512xf32>
    %c1_76 = arith.constant 1 : index
    %c0_77 = arith.constant 0 : index
    %c0_78 = arith.constant 0 : index
    %184 = vector.load %arg4[%c1_76, %c0_77, %c0_78] : memref<6x16x16xbf16, #tpu.memory_space<vmem>>, vector<1x16x16xbf16>
    %185 = vector.shape_cast %184 : vector<1x16x16xbf16> to vector<16x16xbf16>
    %186 = arith.truncf %183 : vector<16x512xf32> to vector<16x512xbf16>
    %cst_79 = arith.constant dense<0.000000e+00> : vector<16x512xf32>
    %187 = tpu.matmul %185, %186, %cst_79 {dimension_numbers = #tpu.dot_dimension_numbers<[1], [0], [0], [1], [0, 0, 1, 1], [], []>} : vector<16x16xbf16>, vector<16x512xbf16>, vector<16x512xf32> -> vector<16x512xf32>
    %188 = arith.addf %135, %187 : vector<16x512xf32>
    %c17_i32_80 = arith.constant 17 : i32
    %189 = tpu.dynamic_rotate %183 by %c17_i32_80 dim 1 : vector<16x512xf32>, i32 -> vector<16x512xf32>
    %190 = arith.mulf %189, %46 : vector<16x512xf32>
    %191 = arith.truncf %190 : vector<16x512xf32> to vector<16x512xbf16>
    %c0_81 = arith.constant 0 : index
    %c0_82 = arith.constant 0 : index
    %192 = vector.load %arg9[%c0_81, %c0_82] : memref<144x512xbf16, #tpu.memory_space<vmem>>, vector<16x512xbf16>
    tpu.vector_store %arg9[%c0_81, %c0_82], %191 {strides = array<i32>} : memref<144x512xbf16, #tpu.memory_space<vmem>>, vector<16x512xbf16>,
    %c16_i32_83 = arith.constant 16 : i32
    %193 = tpu.dynamic_rotate %183 by %c16_i32_83 dim 1 : vector<16x512xf32>, i32 -> vector<16x512xf32>
    %194 = arith.mulf %193, %50 : vector<16x512xf32>
    %195 = arith.truncf %194 : vector<16x512xf32> to vector<16x512xbf16>
    %c16_84 = arith.constant 16 : index
    %c0_85 = arith.constant 0 : index
    %196 = vector.load %arg9[%c16_84, %c0_85] : memref<144x512xbf16, #tpu.memory_space<vmem>>, vector<16x512xbf16>
    tpu.vector_store %arg9[%c16_84, %c0_85], %195 {strides = array<i32>} : memref<144x512xbf16, #tpu.memory_space<vmem>>, vector<16x512xbf16>,
    %c15_i32_86 = arith.constant 15 : i32
    %197 = tpu.dynamic_rotate %183 by %c15_i32_86 dim 1 : vector<16x512xf32>, i32 -> vector<16x512xf32>
    %198 = arith.mulf %197, %55 : vector<16x512xf32>
    %199 = arith.truncf %198 : vector<16x512xf32> to vector<16x512xbf16>
    %c32_87 = arith.constant 32 : index
    %c0_88 = arith.constant 0 : index
    %200 = vector.load %arg9[%c32_87, %c0_88] : memref<144x512xbf16, #tpu.memory_space<vmem>>, vector<16x512xbf16>
    tpu.vector_store %arg9[%c32_87, %c0_88], %199 {strides = array<i32>} : memref<144x512xbf16, #tpu.memory_space<vmem>>, vector<16x512xbf16>,
    %c1_i32_89 = arith.constant 1 : i32
    %201 = tpu.dynamic_rotate %183 by %c1_i32_89 dim 1 : vector<16x512xf32>, i32 -> vector<16x512xf32>
    %202 = arith.mulf %201, %59 : vector<16x512xf32>
    %203 = arith.truncf %202 : vector<16x512xf32> to vector<16x512xbf16>
    %c48_90 = arith.constant 48 : index
    %c0_91 = arith.constant 0 : index
    %204 = vector.load %arg9[%c48_90, %c0_91] : memref<144x512xbf16, #tpu.memory_space<vmem>>, vector<16x512xbf16>
    tpu.vector_store %arg9[%c48_90, %c0_91], %203 {strides = array<i32>} : memref<144x512xbf16, #tpu.memory_space<vmem>>, vector<16x512xbf16>,
    %205 = arith.truncf %183 : vector<16x512xf32> to vector<16x512xbf16>
    %c64_92 = arith.constant 64 : index
    %c0_93 = arith.constant 0 : index
    %206 = vector.load %arg9[%c64_92, %c0_93] : memref<144x512xbf16, #tpu.memory_space<vmem>>, vector<16x512xbf16>
    tpu.vector_store %arg9[%c64_92, %c0_93], %205 {strides = array<i32>} : memref<144x512xbf16, #tpu.memory_space<vmem>>, vector<16x512xbf16>,
    %c511_i32_94 = arith.constant 511 : i32
    %207 = tpu.dynamic_rotate %183 by %c511_i32_94 dim 1 : vector<16x512xf32>, i32 -> vector<16x512xf32>
    %208 = arith.mulf %207, %63 : vector<16x512xf32>
    %209 = arith.truncf %208 : vector<16x512xf32> to vector<16x512xbf16>
    %c80_95 = arith.constant 80 : index
    %c0_96 = arith.constant 0 : index
    %210 = vector.load %arg9[%c80_95, %c0_96] : memref<144x512xbf16, #tpu.memory_space<vmem>>, vector<16x512xbf16>
    tpu.vector_store %arg9[%c80_95, %c0_96], %209 {strides = array<i32>} : memref<144x512xbf16, #tpu.memory_space<vmem>>, vector<16x512xbf16>,
    %c497_i32_97 = arith.constant 497 : i32
    %211 = tpu.dynamic_rotate %183 by %c497_i32_97 dim 1 : vector<16x512xf32>, i32 -> vector<16x512xf32>
    %212 = arith.mulf %211, %68 : vector<16x512xf32>
    %213 = arith.truncf %212 : vector<16x512xf32> to vector<16x512xbf16>
    %c96_98 = arith.constant 96 : index
    %c0_99 = arith.constant 0 : index
    %214 = vector.load %arg9[%c96_98, %c0_99] : memref<144x512xbf16, #tpu.memory_space<vmem>>, vector<16x512xbf16>
    tpu.vector_store %arg9[%c96_98, %c0_99], %213 {strides = array<i32>} : memref<144x512xbf16, #tpu.memory_space<vmem>>, vector<16x512xbf16>,
    %c496_i32_100 = arith.constant 496 : i32
    %215 = tpu.dynamic_rotate %183 by %c496_i32_100 dim 1 : vector<16x512xf32>, i32 -> vector<16x512xf32>
    %216 = arith.mulf %215, %72 : vector<16x512xf32>
    %217 = arith.truncf %216 : vector<16x512xf32> to vector<16x512xbf16>
    %c112_101 = arith.constant 112 : index
    %c0_102 = arith.constant 0 : index
    %218 = vector.load %arg9[%c112_101, %c0_102] : memref<144x512xbf16, #tpu.memory_space<vmem>>, vector<16x512xbf16>
    tpu.vector_store %arg9[%c112_101, %c0_102], %217 {strides = array<i32>} : memref<144x512xbf16, #tpu.memory_space<vmem>>, vector<16x512xbf16>,
    %c495_i32_103 = arith.constant 495 : i32
    %219 = tpu.dynamic_rotate %183 by %c495_i32_103 dim 1 : vector<16x512xf32>, i32 -> vector<16x512xf32>
    %220 = arith.mulf %219, %77 : vector<16x512xf32>
    %221 = arith.truncf %220 : vector<16x512xf32> to vector<16x512xbf16>
    %c128_104 = arith.constant 128 : index
    %c0_105 = arith.constant 0 : index
    %222 = vector.load %arg9[%c128_104, %c0_105] : memref<144x512xbf16, #tpu.memory_space<vmem>>, vector<16x512xbf16>
    tpu.vector_store %arg9[%c128_104, %c0_105], %221 {strides = array<i32>} : memref<144x512xbf16, #tpu.memory_space<vmem>>, vector<16x512xbf16>,
    %c2 = arith.constant 2 : index
    %c0_106 = arith.constant 0 : index
    %c0_107 = arith.constant 0 : index
    %223 = vector.load %arg1[%c2, %c0_106, %c0_107] : memref<6x16x144xbf16, #tpu.memory_space<vmem>>, vector<1x16x144xbf16>
    %224 = vector.shape_cast %223 : vector<1x16x144xbf16> to vector<16x144xbf16>
    %c0_108 = arith.constant 0 : index
    %c0_109 = arith.constant 0 : index
    %225 = vector.load %arg9[%c0_108, %c0_109] : memref<144x512xbf16, #tpu.memory_space<vmem>>, vector<144x512xbf16>
    %cst_110 = arith.constant dense<0.000000e+00> : vector<16x512xf32>
    %226 = tpu.matmul %224, %225, %cst_110 {dimension_numbers = #tpu.dot_dimension_numbers<[1], [0], [0], [1], [0, 0, 1, 1], [], []>} : vector<16x144xbf16>, vector<144x512xbf16>, vector<16x512xf32> -> vector<16x512xf32>
    %c2_111 = arith.constant 2 : index
    %c0_112 = arith.constant 0 : index
    %c0_113 = arith.constant 0 : index
    %227 = vector.load %arg2[%c2_111, %c0_112, %c0_113] : memref<6x16x1xf32, #tpu.memory_space<vmem>>, vector<1x16x1xf32>
    %228 = vector.shape_cast %227 : vector<1x16x1xf32> to vector<16x1xf32>
    %229 = vector.broadcast %228 : vector<16x1xf32> to vector<16x512xf32>
    %230 = arith.addf %226, %229 : vector<16x512xf32>
    %231 = arith.negf %230 : vector<16x512xf32>
    %232 = math.exp %231 : vector<16x512xf32>
    %cst_114 = arith.constant 1.000000e+00 : f32
    %233 = vector.broadcast %cst_114 : f32 to vector<16x512xf32>
    %234 = arith.addf %233, %232 : vector<16x512xf32>
    %235 = arith.divf %233, %234 : vector<16x512xf32>
    %236 = arith.mulf %230, %235 : vector<16x512xf32>
    %c2_115 = arith.constant 2 : index
    %c0_116 = arith.constant 0 : index
    %c0_117 = arith.constant 0 : index
    %237 = vector.load %arg4[%c2_115, %c0_116, %c0_117] : memref<6x16x16xbf16, #tpu.memory_space<vmem>>, vector<1x16x16xbf16>
    %238 = vector.shape_cast %237 : vector<1x16x16xbf16> to vector<16x16xbf16>
    %239 = arith.truncf %236 : vector<16x512xf32> to vector<16x512xbf16>
    %cst_118 = arith.constant dense<0.000000e+00> : vector<16x512xf32>
    %240 = tpu.matmul %238, %239, %cst_118 {dimension_numbers = #tpu.dot_dimension_numbers<[1], [0], [0], [1], [0, 0, 1, 1], [], []>} : vector<16x16xbf16>, vector<16x512xbf16>, vector<16x512xf32> -> vector<16x512xf32>
    %241 = arith.addf %188, %240 : vector<16x512xf32>
    %c17_i32_119 = arith.constant 17 : i32
    %242 = tpu.dynamic_rotate %236 by %c17_i32_119 dim 1 : vector<16x512xf32>, i32 -> vector<16x512xf32>
    %243 = arith.mulf %242, %46 : vector<16x512xf32>
    %244 = arith.truncf %243 : vector<16x512xf32> to vector<16x512xbf16>
    %c0_120 = arith.constant 0 : index
    %c0_121 = arith.constant 0 : index
    %245 = vector.load %arg9[%c0_120, %c0_121] : memref<144x512xbf16, #tpu.memory_space<vmem>>, vector<16x512xbf16>
    tpu.vector_store %arg9[%c0_120, %c0_121], %244 {strides = array<i32>} : memref<144x512xbf16, #tpu.memory_space<vmem>>, vector<16x512xbf16>,
    %c16_i32_122 = arith.constant 16 : i32
    %246 = tpu.dynamic_rotate %236 by %c16_i32_122 dim 1 : vector<16x512xf32>, i32 -> vector<16x512xf32>
    %247 = arith.mulf %246, %50 : vector<16x512xf32>
    %248 = arith.truncf %247 : vector<16x512xf32> to vector<16x512xbf16>
    %c16_123 = arith.constant 16 : index
    %c0_124 = arith.constant 0 : index
    %249 = vector.load %arg9[%c16_123, %c0_124] : memref<144x512xbf16, #tpu.memory_space<vmem>>, vector<16x512xbf16>
    tpu.vector_store %arg9[%c16_123, %c0_124], %248 {strides = array<i32>} : memref<144x512xbf16, #tpu.memory_space<vmem>>, vector<16x512xbf16>,
    %c15_i32_125 = arith.constant 15 : i32
    %250 = tpu.dynamic_rotate %236 by %c15_i32_125 dim 1 : vector<16x512xf32>, i32 -> vector<16x512xf32>
    %251 = arith.mulf %250, %55 : vector<16x512xf32>
    %252 = arith.truncf %251 : vector<16x512xf32> to vector<16x512xbf16>
    %c32_126 = arith.constant 32 : index
    %c0_127 = arith.constant 0 : index
    %253 = vector.load %arg9[%c32_126, %c0_127] : memref<144x512xbf16, #tpu.memory_space<vmem>>, vector<16x512xbf16>
    tpu.vector_store %arg9[%c32_126, %c0_127], %252 {strides = array<i32>} : memref<144x512xbf16, #tpu.memory_space<vmem>>, vector<16x512xbf16>,
    %c1_i32_128 = arith.constant 1 : i32
    %254 = tpu.dynamic_rotate %236 by %c1_i32_128 dim 1 : vector<16x512xf32>, i32 -> vector<16x512xf32>
    %255 = arith.mulf %254, %59 : vector<16x512xf32>
    %256 = arith.truncf %255 : vector<16x512xf32> to vector<16x512xbf16>
    %c48_129 = arith.constant 48 : index
    %c0_130 = arith.constant 0 : index
    %257 = vector.load %arg9[%c48_129, %c0_130] : memref<144x512xbf16, #tpu.memory_space<vmem>>, vector<16x512xbf16>
    tpu.vector_store %arg9[%c48_129, %c0_130], %256 {strides = array<i32>} : memref<144x512xbf16, #tpu.memory_space<vmem>>, vector<16x512xbf16>,
    %258 = arith.truncf %236 : vector<16x512xf32> to vector<16x512xbf16>
    %c64_131 = arith.constant 64 : index
    %c0_132 = arith.constant 0 : index
    %259 = vector.load %arg9[%c64_131, %c0_132] : memref<144x512xbf16, #tpu.memory_space<vmem>>, vector<16x512xbf16>
    tpu.vector_store %arg9[%c64_131, %c0_132], %258 {strides = array<i32>} : memref<144x512xbf16, #tpu.memory_space<vmem>>, vector<16x512xbf16>,
    %c511_i32_133 = arith.constant 511 : i32
    %260 = tpu.dynamic_rotate %236 by %c511_i32_133 dim 1 : vector<16x512xf32>, i32 -> vector<16x512xf32>
    %261 = arith.mulf %260, %63 : vector<16x512xf32>
    %262 = arith.truncf %261 : vector<16x512xf32> to vector<16x512xbf16>
    %c80_134 = arith.constant 80 : index
    %c0_135 = arith.constant 0 : index
    %263 = vector.load %arg9[%c80_134, %c0_135] : memref<144x512xbf16, #tpu.memory_space<vmem>>, vector<16x512xbf16>
    tpu.vector_store %arg9[%c80_134, %c0_135], %262 {strides = array<i32>} : memref<144x512xbf16, #tpu.memory_space<vmem>>, vector<16x512xbf16>,
    %c497_i32_136 = arith.constant 497 : i32
    %264 = tpu.dynamic_rotate %236 by %c497_i32_136 dim 1 : vector<16x512xf32>, i32 -> vector<16x512xf32>
    %265 = arith.mulf %264, %68 : vector<16x512xf32>
    %266 = arith.truncf %265 : vector<16x512xf32> to vector<16x512xbf16>
    %c96_137 = arith.constant 96 : index
    %c0_138 = arith.constant 0 : index
    %267 = vector.load %arg9[%c96_137, %c0_138] : memref<144x512xbf16, #tpu.memory_space<vmem>>, vector<16x512xbf16>
    tpu.vector_store %arg9[%c96_137, %c0_138], %266 {strides = array<i32>} : memref<144x512xbf16, #tpu.memory_space<vmem>>, vector<16x512xbf16>,
    %c496_i32_139 = arith.constant 496 : i32
    %268 = tpu.dynamic_rotate %236 by %c496_i32_139 dim 1 : vector<16x512xf32>, i32 -> vector<16x512xf32>
    %269 = arith.mulf %268, %72 : vector<16x512xf32>
    %270 = arith.truncf %269 : vector<16x512xf32> to vector<16x512xbf16>
    %c112_140 = arith.constant 112 : index
    %c0_141 = arith.constant 0 : index
    %271 = vector.load %arg9[%c112_140, %c0_141] : memref<144x512xbf16, #tpu.memory_space<vmem>>, vector<16x512xbf16>
    tpu.vector_store %arg9[%c112_140, %c0_141], %270 {strides = array<i32>} : memref<144x512xbf16, #tpu.memory_space<vmem>>, vector<16x512xbf16>,
    %c495_i32_142 = arith.constant 495 : i32
    %272 = tpu.dynamic_rotate %236 by %c495_i32_142 dim 1 : vector<16x512xf32>, i32 -> vector<16x512xf32>
    %273 = arith.mulf %272, %77 : vector<16x512xf32>
    %274 = arith.truncf %273 : vector<16x512xf32> to vector<16x512xbf16>
    %c128_143 = arith.constant 128 : index
    %c0_144 = arith.constant 0 : index
    %275 = vector.load %arg9[%c128_143, %c0_144] : memref<144x512xbf16, #tpu.memory_space<vmem>>, vector<16x512xbf16>
    tpu.vector_store %arg9[%c128_143, %c0_144], %274 {strides = array<i32>} : memref<144x512xbf16, #tpu.memory_space<vmem>>, vector<16x512xbf16>,
    %c3 = arith.constant 3 : index
    %c0_145 = arith.constant 0 : index
    %c0_146 = arith.constant 0 : index
    %276 = vector.load %arg1[%c3, %c0_145, %c0_146] : memref<6x16x144xbf16, #tpu.memory_space<vmem>>, vector<1x16x144xbf16>
    %277 = vector.shape_cast %276 : vector<1x16x144xbf16> to vector<16x144xbf16>
    %c0_147 = arith.constant 0 : index
    %c0_148 = arith.constant 0 : index
    %278 = vector.load %arg9[%c0_147, %c0_148] : memref<144x512xbf16, #tpu.memory_space<vmem>>, vector<144x512xbf16>
    %cst_149 = arith.constant dense<0.000000e+00> : vector<16x512xf32>
    %279 = tpu.matmul %277, %278, %cst_149 {dimension_numbers = #tpu.dot_dimension_numbers<[1], [0], [0], [1], [0, 0, 1, 1], [], []>} : vector<16x144xbf16>, vector<144x512xbf16>, vector<16x512xf32> -> vector<16x512xf32>
    %c3_150 = arith.constant 3 : index
    %c0_151 = arith.constant 0 : index
    %c0_152 = arith.constant 0 : index
    %280 = vector.load %arg2[%c3_150, %c0_151, %c0_152] : memref<6x16x1xf32, #tpu.memory_space<vmem>>, vector<1x16x1xf32>
    %281 = vector.shape_cast %280 : vector<1x16x1xf32> to vector<16x1xf32>
    %282 = vector.broadcast %281 : vector<16x1xf32> to vector<16x512xf32>
    %283 = arith.addf %279, %282 : vector<16x512xf32>
    %284 = arith.negf %283 : vector<16x512xf32>
    %285 = math.exp %284 : vector<16x512xf32>
    %cst_153 = arith.constant 1.000000e+00 : f32
    %286 = vector.broadcast %cst_153 : f32 to vector<16x512xf32>
    %287 = arith.addf %286, %285 : vector<16x512xf32>
    %288 = arith.divf %286, %287 : vector<16x512xf32>
    %289 = arith.mulf %283, %288 : vector<16x512xf32>
    %c3_154 = arith.constant 3 : index
    %c0_155 = arith.constant 0 : index
    %c0_156 = arith.constant 0 : index
    %290 = vector.load %arg4[%c3_154, %c0_155, %c0_156] : memref<6x16x16xbf16, #tpu.memory_space<vmem>>, vector<1x16x16xbf16>
    %291 = vector.shape_cast %290 : vector<1x16x16xbf16> to vector<16x16xbf16>
    %292 = arith.truncf %289 : vector<16x512xf32> to vector<16x512xbf16>
    %cst_157 = arith.constant dense<0.000000e+00> : vector<16x512xf32>
    %293 = tpu.matmul %291, %292, %cst_157 {dimension_numbers = #tpu.dot_dimension_numbers<[1], [0], [0], [1], [0, 0, 1, 1], [], []>} : vector<16x16xbf16>, vector<16x512xbf16>, vector<16x512xf32> -> vector<16x512xf32>
    %294 = arith.addf %241, %293 : vector<16x512xf32>
    %c17_i32_158 = arith.constant 17 : i32
    %295 = tpu.dynamic_rotate %289 by %c17_i32_158 dim 1 : vector<16x512xf32>, i32 -> vector<16x512xf32>
    %296 = arith.mulf %295, %46 : vector<16x512xf32>
    %297 = arith.truncf %296 : vector<16x512xf32> to vector<16x512xbf16>
    %c0_159 = arith.constant 0 : index
    %c0_160 = arith.constant 0 : index
    %298 = vector.load %arg9[%c0_159, %c0_160] : memref<144x512xbf16, #tpu.memory_space<vmem>>, vector<16x512xbf16>
    tpu.vector_store %arg9[%c0_159, %c0_160], %297 {strides = array<i32>} : memref<144x512xbf16, #tpu.memory_space<vmem>>, vector<16x512xbf16>,
    %c16_i32_161 = arith.constant 16 : i32
    %299 = tpu.dynamic_rotate %289 by %c16_i32_161 dim 1 : vector<16x512xf32>, i32 -> vector<16x512xf32>
    %300 = arith.mulf %299, %50 : vector<16x512xf32>
    %301 = arith.truncf %300 : vector<16x512xf32> to vector<16x512xbf16>
    %c16_162 = arith.constant 16 : index
    %c0_163 = arith.constant 0 : index
    %302 = vector.load %arg9[%c16_162, %c0_163] : memref<144x512xbf16, #tpu.memory_space<vmem>>, vector<16x512xbf16>
    tpu.vector_store %arg9[%c16_162, %c0_163], %301 {strides = array<i32>} : memref<144x512xbf16, #tpu.memory_space<vmem>>, vector<16x512xbf16>,
    %c15_i32_164 = arith.constant 15 : i32
    %303 = tpu.dynamic_rotate %289 by %c15_i32_164 dim 1 : vector<16x512xf32>, i32 -> vector<16x512xf32>
    %304 = arith.mulf %303, %55 : vector<16x512xf32>
    %305 = arith.truncf %304 : vector<16x512xf32> to vector<16x512xbf16>
    %c32_165 = arith.constant 32 : index
    %c0_166 = arith.constant 0 : index
    %306 = vector.load %arg9[%c32_165, %c0_166] : memref<144x512xbf16, #tpu.memory_space<vmem>>, vector<16x512xbf16>
    tpu.vector_store %arg9[%c32_165, %c0_166], %305 {strides = array<i32>} : memref<144x512xbf16, #tpu.memory_space<vmem>>, vector<16x512xbf16>,
    %c1_i32_167 = arith.constant 1 : i32
    %307 = tpu.dynamic_rotate %289 by %c1_i32_167 dim 1 : vector<16x512xf32>, i32 -> vector<16x512xf32>
    %308 = arith.mulf %307, %59 : vector<16x512xf32>
    %309 = arith.truncf %308 : vector<16x512xf32> to vector<16x512xbf16>
    %c48_168 = arith.constant 48 : index
    %c0_169 = arith.constant 0 : index
    %310 = vector.load %arg9[%c48_168, %c0_169] : memref<144x512xbf16, #tpu.memory_space<vmem>>, vector<16x512xbf16>
    tpu.vector_store %arg9[%c48_168, %c0_169], %309 {strides = array<i32>} : memref<144x512xbf16, #tpu.memory_space<vmem>>, vector<16x512xbf16>,
    %311 = arith.truncf %289 : vector<16x512xf32> to vector<16x512xbf16>
    %c64_170 = arith.constant 64 : index
    %c0_171 = arith.constant 0 : index
    %312 = vector.load %arg9[%c64_170, %c0_171] : memref<144x512xbf16, #tpu.memory_space<vmem>>, vector<16x512xbf16>
    tpu.vector_store %arg9[%c64_170, %c0_171], %311 {strides = array<i32>} : memref<144x512xbf16, #tpu.memory_space<vmem>>, vector<16x512xbf16>,
    %c511_i32_172 = arith.constant 511 : i32
    %313 = tpu.dynamic_rotate %289 by %c511_i32_172 dim 1 : vector<16x512xf32>, i32 -> vector<16x512xf32>
    %314 = arith.mulf %313, %63 : vector<16x512xf32>
    %315 = arith.truncf %314 : vector<16x512xf32> to vector<16x512xbf16>
    %c80_173 = arith.constant 80 : index
    %c0_174 = arith.constant 0 : index
    %316 = vector.load %arg9[%c80_173, %c0_174] : memref<144x512xbf16, #tpu.memory_space<vmem>>, vector<16x512xbf16>
    tpu.vector_store %arg9[%c80_173, %c0_174], %315 {strides = array<i32>} : memref<144x512xbf16, #tpu.memory_space<vmem>>, vector<16x512xbf16>,
    %c497_i32_175 = arith.constant 497 : i32
    %317 = tpu.dynamic_rotate %289 by %c497_i32_175 dim 1 : vector<16x512xf32>, i32 -> vector<16x512xf32>
    %318 = arith.mulf %317, %68 : vector<16x512xf32>
    %319 = arith.truncf %318 : vector<16x512xf32> to vector<16x512xbf16>
    %c96_176 = arith.constant 96 : index
    %c0_177 = arith.constant 0 : index
    %320 = vector.load %arg9[%c96_176, %c0_177] : memref<144x512xbf16, #tpu.memory_space<vmem>>, vector<16x512xbf16>
    tpu.vector_store %arg9[%c96_176, %c0_177], %319 {strides = array<i32>} : memref<144x512xbf16, #tpu.memory_space<vmem>>, vector<16x512xbf16>,
    %c496_i32_178 = arith.constant 496 : i32
    %321 = tpu.dynamic_rotate %289 by %c496_i32_178 dim 1 : vector<16x512xf32>, i32 -> vector<16x512xf32>
    %322 = arith.mulf %321, %72 : vector<16x512xf32>
    %323 = arith.truncf %322 : vector<16x512xf32> to vector<16x512xbf16>
    %c112_179 = arith.constant 112 : index
    %c0_180 = arith.constant 0 : index
    %324 = vector.load %arg9[%c112_179, %c0_180] : memref<144x512xbf16, #tpu.memory_space<vmem>>, vector<16x512xbf16>
    tpu.vector_store %arg9[%c112_179, %c0_180], %323 {strides = array<i32>} : memref<144x512xbf16, #tpu.memory_space<vmem>>, vector<16x512xbf16>,
    %c495_i32_181 = arith.constant 495 : i32
    %325 = tpu.dynamic_rotate %289 by %c495_i32_181 dim 1 : vector<16x512xf32>, i32 -> vector<16x512xf32>
    %326 = arith.mulf %325, %77 : vector<16x512xf32>
    %327 = arith.truncf %326 : vector<16x512xf32> to vector<16x512xbf16>
    %c128_182 = arith.constant 128 : index
    %c0_183 = arith.constant 0 : index
    %328 = vector.load %arg9[%c128_182, %c0_183] : memref<144x512xbf16, #tpu.memory_space<vmem>>, vector<16x512xbf16>
    tpu.vector_store %arg9[%c128_182, %c0_183], %327 {strides = array<i32>} : memref<144x512xbf16, #tpu.memory_space<vmem>>, vector<16x512xbf16>,
    %c4 = arith.constant 4 : index
    %c0_184 = arith.constant 0 : index
    %c0_185 = arith.constant 0 : index
    %329 = vector.load %arg1[%c4, %c0_184, %c0_185] : memref<6x16x144xbf16, #tpu.memory_space<vmem>>, vector<1x16x144xbf16>
    %330 = vector.shape_cast %329 : vector<1x16x144xbf16> to vector<16x144xbf16>
    %c0_186 = arith.constant 0 : index
    %c0_187 = arith.constant 0 : index
    %331 = vector.load %arg9[%c0_186, %c0_187] : memref<144x512xbf16, #tpu.memory_space<vmem>>, vector<144x512xbf16>
    %cst_188 = arith.constant dense<0.000000e+00> : vector<16x512xf32>
    %332 = tpu.matmul %330, %331, %cst_188 {dimension_numbers = #tpu.dot_dimension_numbers<[1], [0], [0], [1], [0, 0, 1, 1], [], []>} : vector<16x144xbf16>, vector<144x512xbf16>, vector<16x512xf32> -> vector<16x512xf32>
    %c4_189 = arith.constant 4 : index
    %c0_190 = arith.constant 0 : index
    %c0_191 = arith.constant 0 : index
    %333 = vector.load %arg2[%c4_189, %c0_190, %c0_191] : memref<6x16x1xf32, #tpu.memory_space<vmem>>, vector<1x16x1xf32>
    %334 = vector.shape_cast %333 : vector<1x16x1xf32> to vector<16x1xf32>
    %335 = vector.broadcast %334 : vector<16x1xf32> to vector<16x512xf32>
    %336 = arith.addf %332, %335 : vector<16x512xf32>
    %337 = arith.negf %336 : vector<16x512xf32>
    %338 = math.exp %337 : vector<16x512xf32>
    %cst_192 = arith.constant 1.000000e+00 : f32
    %339 = vector.broadcast %cst_192 : f32 to vector<16x512xf32>
    %340 = arith.addf %339, %338 : vector<16x512xf32>
    %341 = arith.divf %339, %340 : vector<16x512xf32>
    %342 = arith.mulf %336, %341 : vector<16x512xf32>
    %c4_193 = arith.constant 4 : index
    %c0_194 = arith.constant 0 : index
    %c0_195 = arith.constant 0 : index
    %343 = vector.load %arg4[%c4_193, %c0_194, %c0_195] : memref<6x16x16xbf16, #tpu.memory_space<vmem>>, vector<1x16x16xbf16>
    %344 = vector.shape_cast %343 : vector<1x16x16xbf16> to vector<16x16xbf16>
    %345 = arith.truncf %342 : vector<16x512xf32> to vector<16x512xbf16>
    %cst_196 = arith.constant dense<0.000000e+00> : vector<16x512xf32>
    %346 = tpu.matmul %344, %345, %cst_196 {dimension_numbers = #tpu.dot_dimension_numbers<[1], [0], [0], [1], [0, 0, 1, 1], [], []>} : vector<16x16xbf16>, vector<16x512xbf16>, vector<16x512xf32> -> vector<16x512xf32>
    %347 = arith.addf %294, %346 : vector<16x512xf32>
    %c17_i32_197 = arith.constant 17 : i32
    %348 = tpu.dynamic_rotate %342 by %c17_i32_197 dim 1 : vector<16x512xf32>, i32 -> vector<16x512xf32>
    %349 = arith.mulf %348, %46 : vector<16x512xf32>
    %350 = arith.truncf %349 : vector<16x512xf32> to vector<16x512xbf16>
    %c0_198 = arith.constant 0 : index
    %c0_199 = arith.constant 0 : index
    %351 = vector.load %arg9[%c0_198, %c0_199] : memref<144x512xbf16, #tpu.memory_space<vmem>>, vector<16x512xbf16>
    tpu.vector_store %arg9[%c0_198, %c0_199], %350 {strides = array<i32>} : memref<144x512xbf16, #tpu.memory_space<vmem>>, vector<16x512xbf16>,
    %c16_i32_200 = arith.constant 16 : i32
    %352 = tpu.dynamic_rotate %342 by %c16_i32_200 dim 1 : vector<16x512xf32>, i32 -> vector<16x512xf32>
    %353 = arith.mulf %352, %50 : vector<16x512xf32>
    %354 = arith.truncf %353 : vector<16x512xf32> to vector<16x512xbf16>
    %c16_201 = arith.constant 16 : index
    %c0_202 = arith.constant 0 : index
    %355 = vector.load %arg9[%c16_201, %c0_202] : memref<144x512xbf16, #tpu.memory_space<vmem>>, vector<16x512xbf16>
    tpu.vector_store %arg9[%c16_201, %c0_202], %354 {strides = array<i32>} : memref<144x512xbf16, #tpu.memory_space<vmem>>, vector<16x512xbf16>,
    %c15_i32_203 = arith.constant 15 : i32
    %356 = tpu.dynamic_rotate %342 by %c15_i32_203 dim 1 : vector<16x512xf32>, i32 -> vector<16x512xf32>
    %357 = arith.mulf %356, %55 : vector<16x512xf32>
    %358 = arith.truncf %357 : vector<16x512xf32> to vector<16x512xbf16>
    %c32_204 = arith.constant 32 : index
    %c0_205 = arith.constant 0 : index
    %359 = vector.load %arg9[%c32_204, %c0_205] : memref<144x512xbf16, #tpu.memory_space<vmem>>, vector<16x512xbf16>
    tpu.vector_store %arg9[%c32_204, %c0_205], %358 {strides = array<i32>} : memref<144x512xbf16, #tpu.memory_space<vmem>>, vector<16x512xbf16>,
    %c1_i32_206 = arith.constant 1 : i32
    %360 = tpu.dynamic_rotate %342 by %c1_i32_206 dim 1 : vector<16x512xf32>, i32 -> vector<16x512xf32>
    %361 = arith.mulf %360, %59 : vector<16x512xf32>
    %362 = arith.truncf %361 : vector<16x512xf32> to vector<16x512xbf16>
    %c48_207 = arith.constant 48 : index
    %c0_208 = arith.constant 0 : index
    %363 = vector.load %arg9[%c48_207, %c0_208] : memref<144x512xbf16, #tpu.memory_space<vmem>>, vector<16x512xbf16>
    tpu.vector_store %arg9[%c48_207, %c0_208], %362 {strides = array<i32>} : memref<144x512xbf16, #tpu.memory_space<vmem>>, vector<16x512xbf16>,
    %364 = arith.truncf %342 : vector<16x512xf32> to vector<16x512xbf16>
    %c64_209 = arith.constant 64 : index
    %c0_210 = arith.constant 0 : index
    %365 = vector.load %arg9[%c64_209, %c0_210] : memref<144x512xbf16, #tpu.memory_space<vmem>>, vector<16x512xbf16>
    tpu.vector_store %arg9[%c64_209, %c0_210], %364 {strides = array<i32>} : memref<144x512xbf16, #tpu.memory_space<vmem>>, vector<16x512xbf16>,
    %c511_i32_211 = arith.constant 511 : i32
    %366 = tpu.dynamic_rotate %342 by %c511_i32_211 dim 1 : vector<16x512xf32>, i32 -> vector<16x512xf32>
    %367 = arith.mulf %366, %63 : vector<16x512xf32>
    %368 = arith.truncf %367 : vector<16x512xf32> to vector<16x512xbf16>
    %c80_212 = arith.constant 80 : index
    %c0_213 = arith.constant 0 : index
    %369 = vector.load %arg9[%c80_212, %c0_213] : memref<144x512xbf16, #tpu.memory_space<vmem>>, vector<16x512xbf16>
    tpu.vector_store %arg9[%c80_212, %c0_213], %368 {strides = array<i32>} : memref<144x512xbf16, #tpu.memory_space<vmem>>, vector<16x512xbf16>,
    %c497_i32_214 = arith.constant 497 : i32
    %370 = tpu.dynamic_rotate %342 by %c497_i32_214 dim 1 : vector<16x512xf32>, i32 -> vector<16x512xf32>
    %371 = arith.mulf %370, %68 : vector<16x512xf32>
    %372 = arith.truncf %371 : vector<16x512xf32> to vector<16x512xbf16>
    %c96_215 = arith.constant 96 : index
    %c0_216 = arith.constant 0 : index
    %373 = vector.load %arg9[%c96_215, %c0_216] : memref<144x512xbf16, #tpu.memory_space<vmem>>, vector<16x512xbf16>
    tpu.vector_store %arg9[%c96_215, %c0_216], %372 {strides = array<i32>} : memref<144x512xbf16, #tpu.memory_space<vmem>>, vector<16x512xbf16>,
    %c496_i32_217 = arith.constant 496 : i32
    %374 = tpu.dynamic_rotate %342 by %c496_i32_217 dim 1 : vector<16x512xf32>, i32 -> vector<16x512xf32>
    %375 = arith.mulf %374, %72 : vector<16x512xf32>
    %376 = arith.truncf %375 : vector<16x512xf32> to vector<16x512xbf16>
    %c112_218 = arith.constant 112 : index
    %c0_219 = arith.constant 0 : index
    %377 = vector.load %arg9[%c112_218, %c0_219] : memref<144x512xbf16, #tpu.memory_space<vmem>>, vector<16x512xbf16>
    tpu.vector_store %arg9[%c112_218, %c0_219], %376 {strides = array<i32>} : memref<144x512xbf16, #tpu.memory_space<vmem>>, vector<16x512xbf16>,
    %c495_i32_220 = arith.constant 495 : i32
    %378 = tpu.dynamic_rotate %342 by %c495_i32_220 dim 1 : vector<16x512xf32>, i32 -> vector<16x512xf32>
    %379 = arith.mulf %378, %77 : vector<16x512xf32>
    %380 = arith.truncf %379 : vector<16x512xf32> to vector<16x512xbf16>
    %c128_221 = arith.constant 128 : index
    %c0_222 = arith.constant 0 : index
    %381 = vector.load %arg9[%c128_221, %c0_222] : memref<144x512xbf16, #tpu.memory_space<vmem>>, vector<16x512xbf16>
    tpu.vector_store %arg9[%c128_221, %c0_222], %380 {strides = array<i32>} : memref<144x512xbf16, #tpu.memory_space<vmem>>, vector<16x512xbf16>,
    %c5 = arith.constant 5 : index
    %c0_223 = arith.constant 0 : index
    %c0_224 = arith.constant 0 : index
    %382 = vector.load %arg1[%c5, %c0_223, %c0_224] : memref<6x16x144xbf16, #tpu.memory_space<vmem>>, vector<1x16x144xbf16>
    %383 = vector.shape_cast %382 : vector<1x16x144xbf16> to vector<16x144xbf16>
    %c0_225 = arith.constant 0 : index
    %c0_226 = arith.constant 0 : index
    %384 = vector.load %arg9[%c0_225, %c0_226] : memref<144x512xbf16, #tpu.memory_space<vmem>>, vector<144x512xbf16>
    %cst_227 = arith.constant dense<0.000000e+00> : vector<16x512xf32>
    %385 = tpu.matmul %383, %384, %cst_227 {dimension_numbers = #tpu.dot_dimension_numbers<[1], [0], [0], [1], [0, 0, 1, 1], [], []>} : vector<16x144xbf16>, vector<144x512xbf16>, vector<16x512xf32> -> vector<16x512xf32>
    %c5_228 = arith.constant 5 : index
    %c0_229 = arith.constant 0 : index
    %c0_230 = arith.constant 0 : index
    %386 = vector.load %arg2[%c5_228, %c0_229, %c0_230] : memref<6x16x1xf32, #tpu.memory_space<vmem>>, vector<1x16x1xf32>
    %387 = vector.shape_cast %386 : vector<1x16x1xf32> to vector<16x1xf32>
    %388 = vector.broadcast %387 : vector<16x1xf32> to vector<16x512xf32>
    %389 = arith.addf %385, %388 : vector<16x512xf32>
    %390 = arith.negf %389 : vector<16x512xf32>
    %391 = math.exp %390 : vector<16x512xf32>
    %cst_231 = arith.constant 1.000000e+00 : f32
    %392 = vector.broadcast %cst_231 : f32 to vector<16x512xf32>
    %393 = arith.addf %392, %391 : vector<16x512xf32>
    %394 = arith.divf %392, %393 : vector<16x512xf32>
    %395 = arith.mulf %389, %394 : vector<16x512xf32>
    %c5_232 = arith.constant 5 : index
    %c0_233 = arith.constant 0 : index
    %c0_234 = arith.constant 0 : index
    %396 = vector.load %arg4[%c5_232, %c0_233, %c0_234] : memref<6x16x16xbf16, #tpu.memory_space<vmem>>, vector<1x16x16xbf16>
    %397 = vector.shape_cast %396 : vector<1x16x16xbf16> to vector<16x16xbf16>
    %398 = arith.truncf %395 : vector<16x512xf32> to vector<16x512xbf16>
    %cst_235 = arith.constant dense<0.000000e+00> : vector<16x512xf32>
    %399 = tpu.matmul %397, %398, %cst_235 {dimension_numbers = #tpu.dot_dimension_numbers<[1], [0], [0], [1], [0, 0, 1, 1], [], []>} : vector<16x16xbf16>, vector<16x512xbf16>, vector<16x512xf32> -> vector<16x512xf32>
    %400 = arith.addf %347, %399 : vector<16x512xf32>
    %c0_236 = arith.constant 0 : index
    %c0_237 = arith.constant 0 : index
    %401 = vector.load %arg5[%c0_236, %c0_237] : memref<16x1xf32, #tpu.memory_space<vmem>>, vector<16x1xf32>
    %402 = vector.broadcast %401 : vector<16x1xf32> to vector<16x512xf32>
    %403 = arith.addf %400, %402 : vector<16x512xf32>
    %404 = arith.negf %403 : vector<16x512xf32>
    %405 = math.exp %404 : vector<16x512xf32>
    %cst_238 = arith.constant 1.000000e+00 : f32
    %406 = vector.broadcast %cst_238 : f32 to vector<16x512xf32>
    %407 = arith.addf %406, %405 : vector<16x512xf32>
    %408 = arith.divf %406, %407 : vector<16x512xf32>
    %409 = arith.mulf %403, %408 : vector<16x512xf32>
    %c0_239 = arith.constant 0 : index
    %c0_240 = arith.constant 0 : index
    %410 = vector.load %arg6[%c0_239, %c0_240] : memref<32x16xbf16, #tpu.memory_space<vmem>>, vector<32x16xbf16>
    %411 = arith.truncf %409 : vector<16x512xf32> to vector<16x512xbf16>
    %cst_241 = arith.constant dense<0.000000e+00> : vector<32x512xf32>
    %412 = tpu.matmul %410, %411, %cst_241 {dimension_numbers = #tpu.dot_dimension_numbers<[1], [0], [0], [1], [0, 0, 1, 1], [], []>} : vector<32x16xbf16>, vector<16x512xbf16>, vector<32x512xf32> -> vector<32x512xf32>
    %c0_242 = arith.constant 0 : index
    %c0_243 = arith.constant 0 : index
    %413 = vector.load %arg7[%c0_242, %c0_243] : memref<32x1xf32, #tpu.memory_space<vmem>>, vector<32x1xf32>
    %414 = vector.broadcast %413 : vector<32x1xf32> to vector<32x512xf32>
    %415 = arith.addf %412, %414 : vector<32x512xf32>
    %416 = arith.negf %415 : vector<32x512xf32>
    %417 = math.exp %416 : vector<32x512xf32>
    %cst_244 = arith.constant 1.000000e+00 : f32
    %418 = vector.broadcast %cst_244 : f32 to vector<32x512xf32>
    %419 = arith.addf %418, %417 : vector<32x512xf32>
    %420 = arith.divf %418, %419 : vector<32x512xf32>
    %421 = arith.mulf %415, %420 : vector<32x512xf32>
    %c0_245 = arith.constant 0 : index
    %c0_246 = arith.constant 0 : index
    %422 = vector.load %arg8[%c0_245, %c0_246] : memref<32x512xf32, #tpu.memory_space<vmem>>, vector<32x512xf32>
    tpu.vector_store %arg8[%c0_245, %c0_246], %421 {strides = array<i32>} : memref<32x512xf32, #tpu.memory_space<vmem>>, vector<32x512xf32>,
    return
  }
}

</mosaic_0001>

<bundles_post_ra>
// kernel: tpu_custom_call.1
= control target key start
LH: loop header
LB: loop body
LE: loop exit
PB: predicated region body
PF: predicated region fallthrough
CT: control target
= control target key end

     0   :  { %s5125_s9 = smov 17   ;;  %s5126_s14 = smov 16   ;;  %v5127_v4 = vmov 0.0   ;;  %s7983_s0 = inlined_call_operand.vmem [shape: f32[8,512], index: 0, kind: input, shape index: {}]   ;;  %s7984_s1 = inlined_call_operand.vmem [shape: bf16[6,16,144], index: 1, kind: input, shape index: {}]   ;;  %s7985_s2 = inlined_call_operand.vmem [shape: f32[6,16,1], index: 2, kind: input, shape index: {}]   ;;  %s7986_s3 = inlined_call_operand.vmem [shape: bf16[16,8], index: 3, kind: input, shape index: {}]   ;;  %s7987_s4 = inlined_call_operand.vmem [shape: bf16[6,16,16], index: 4, kind: input, shape index: {}]   ;;  %s7988_s5 = inlined_call_operand.vmem [shape: f32[16,1], index: 5, kind: input, shape index: {}]   ;;  %s7989_s6 = inlined_call_operand.vmem [shape: bf16[32,16], index: 6, kind: input, shape index: {}]   ;;  %s7990_s7 = inlined_call_operand.vmem [shape: f32[32,1], index: 7, kind: input, shape index: {}]   ;;  %s7991_s8 = inlined_call_operand.hbm [shape: f32[32,512], index: 8, kind: output, shape index: {}]  }
   0x1   :  { %v5186_v0 = vld [vmem:[%s7983_s0 + $0x10] sm:$0xff]  ;;  %v5191_v1 = vld [vmem:[%s7983_s0] sm:$0xff]  ;;  %v5200_v2 = vld [vmem:[%s7983_s0 + $0x18] sm:$0xff] }
   0x2   :  { %308 = vrot.lane.b32.xlu1 %v5186_v0, %s5125_s9  ;;  %302 = vrot.lane.b32.xlu0 %v5191_v1, %s5125_s9  ;;  %v5205_v3 = vld [vmem:[%s7983_s0 + $0x8] sm:$0xff] }
   0x6   :  { %310 = vrot.lane.b32.xlu1 %v5200_v2, %s5125_s9  ;;  %306 = vrot.lane.b32.xlu0 %v5205_v3, %s5125_s9 }
   0xa   :  { %333 = vrot.lane.b32.xlu1 %v5191_v1, %s5126_s14  ;;  %304 = vrot.lane.b32.xlu0 %v5127_v4, %s5125_s9 }
   0xe   :  { %339 = vrot.lane.b32.xlu1 %v5186_v0, %s5126_s14  ;;  %337 = vrot.lane.b32.xlu0 %v5205_v3, %s5126_s14 }
  0x12   :  { %335 = vrot.lane.b32.xlu1 %v5127_v4, %s5126_s14  ;;  %341 = vrot.lane.b32.xlu0 %v5200_v2, %s5126_s14 }
  0x13   :  { %13 = vsyncpa [#allocation4], 0  ;;  %s5128_s0 = smov 15   ;;  %s5129_s15 = smov 1   ;;  %v4788_v5 = vld [vmem:[%s7984_s1 + $0x4] ss:$8 sps:$4 sm:$0xff]   ;;  %v35_v9 = vlaneseq }
  0x14   :  { %s5130_s16 = smov 127   ;;  %s5131_s17 = smov 113   ;;  %vm617_vm0 = vcmask 130048   ;;  %v7992_v6 = vmov 0   ;;  %v596_v7 = vld [vmem:[%s7985_s2] sm:$0xff]  ;;  %v597_v8 = vld [vmem:[%s7985_s2 + $0x8] sm:$0xff] }
  0x15   :  { %s5132_s18 = smov 112   ;;  %s5133_s19 = smov 111   ;;  %4570 = vmatprep.mubr.msk.bf16.mxu0 %vm617_vm0, %v4788_v5  ;;  %4571 = vmatprep.mubr.msk.bf16.mxu1 %vm617_vm0, %v4788_v5  ;;  %v5296_v10 = vand.u32 127, %v35_v9 }
  0x16   :  { %368 = vrot.lane.b32.xlu1 %v5205_v3, %s5128_s0  ;;  %364 = vrot.lane.b32.xlu0 %v5191_v1, %s5128_s0 }
  0x17   :  { %4784 = vset.pattern.permute.xlu0 %v7992_v6  ;;  %4785 = vset.pattern.permute.xlu1 %v7992_v6  ;;  %v5299_v11 = vadd.s32 256, %v5296_v10  ;;  %v5302_v12 = vadd.s32 128, %v5296_v10  ;;  %v5305_v13 = vadd.s32 384, %v5296_v10  ;;  %v44_v14 = vand.u32 255, %v5296_v10 }
  0x18   :  { %v92_v15 = vand.u32 15, %v5296_v10  ;;  %vm312_vm9 = vcmp.lt.s32.totalorder %v5296_v10, 17  ;;  %vm343_vm10 = vcmp.lt.s32.totalorder %v5296_v10, 16 }
  0x19   :  { %v58_v16 = vand.u32 255, %v5299_v11  ;;  %v106_v17 = vand.u32 15, %v5299_v11  ;;  %v99_v18 = vand.u32 15, %v5302_v12  ;;  %v113_v19 = vand.u32 15, %v5305_v13 }
  0x1a   :  { %372 = vrot.lane.b32.xlu1 %v5200_v2, %s5128_s0  ;;  %370 = vrot.lane.b32.xlu0 %v5186_v0, %s5128_s0  ;;  %vm5313_vm1 = vcmp.ge.s32.totalorder %v44_v14, 16  ;;  %vm5317_vm2 = vcmp.ne.s32.totalorder %v92_v15, 0  ;;  %vm5398_vm11 = vcmp.ne.s32.totalorder %v92_v15, 15 }
  0x1b   :  { %vm5321_vm3 = vcmp.ge.s32.totalorder %v58_v16, 16  ;;  %vm5325_vm4 = vcmp.ne.s32.totalorder %v106_v17, 0  ;;  %vm152_vm5 = vmand %vm5313_vm1, %vm5317_vm2  ;;  %vm5335_vm6 = vcmp.ne.s32.totalorder %v99_v18, 0  ;;  %vm5341_vm7 = vcmp.ne.s32.totalorder %v113_v19, 0 }
  0x1c   :  { %vm154_vm8 = vmand %vm5321_vm3, %vm5325_vm4  ;;  %v5353_v30 = vsel %vm5335_vm6, 1.0, %v5127_v4  ;;  %v5358_v31 = vsel %vm5341_vm7, 1.0, %v5127_v4  ;;  %v5361_v32 = vsel %vm152_vm5, 1.0, %v5127_v4  ;;  %v5386_v54 = vsel %vm5321_vm3, 1.0, %v5127_v4 }
  0x1d   :  { %v5364_v33 = vsel %vm154_vm8, 1.0, %v5127_v4  ;;  %v5393_v56 = vsel %vm5313_vm1, 1.0, %v5127_v4  ;;  %vm5409_vm12 = vcmp.ne.s32.totalorder %v106_v17, 15  ;;  %vm188_vm13 = vmand %vm5313_vm1, %vm5398_vm11  ;;  %vm5419_vm14 = vcmp.ne.s32.totalorder %v99_v18, 15 }
  0x1e   :  { %395 = vrot.lane.b32.xlu1 %v5191_v1, %s5129_s15  ;;  %366 = vrot.lane.b32.xlu0 %v5127_v4, %s5128_s0  ;;  %vm5425_vm15 = vcmp.ne.s32.totalorder %v113_v19, 15  ;;  %vm190_vm5 = vmand %vm5321_vm3, %vm5409_vm12  ;;  %vm374_vm1 = vcmp.lt.s32.totalorder %v5296_v10, 15  ;;  %v5437_v18 = vsel %vm5419_vm14, 1.0, %v5127_v4  ;;  %v5440_v20 = vsel %vm188_vm13, 1.0, %v5127_v4 }
  0x1f   :  { %v5448_v22 = vsel %vm5425_vm15, 1.0, %v5127_v4  ;;  %vm405_vm3 = vcmp.lt.s32.totalorder %v5296_v10, 1 }
  0x22   :  { %401 = vrot.lane.b32.xlu1 %v5186_v0, %s5129_s15  ;;  %399 = vrot.lane.b32.xlu0 %v5205_v3, %s5129_s15 }
  0x26   :  { %397 = vrot.lane.b32.xlu1 %v5127_v4, %s5129_s15  ;;  %403 = vrot.lane.b32.xlu0 %v5200_v2, %s5129_s15 }
  0x2a   :  { %438 = vrot.lane.b32.xlu1 %v5205_v3, %s5130_s16  ;;  %434 = vrot.lane.b32.xlu0 %v5191_v1, %s5130_s16 }
  0x2e   :  { %442 = vrot.lane.b32.xlu1 %v5200_v2, %s5130_s16  ;;  %440 = vrot.lane.b32.xlu0 %v5186_v0, %s5130_s16 }
  0x32   :  { %465 = vrot.lane.b32.xlu1 %v5191_v1, %s5131_s17  ;;  %436 = vrot.lane.b32.xlu0 %v5127_v4, %s5130_s16 }
  0x36   :  { %471 = vrot.lane.b32.xlu1 %v5186_v0, %s5131_s17  ;;  %469 = vrot.lane.b32.xlu0 %v5205_v3, %s5131_s17 }
  0x3a   :  { %467 = vrot.lane.b32.xlu1 %v5127_v4, %s5131_s17  ;;  %473 = vrot.lane.b32.xlu0 %v5200_v2, %s5131_s17 }
  0x3e   :  { %500 = vrot.lane.b32.xlu1 %v5205_v3, %s5132_s18  ;;  %496 = vrot.lane.b32.xlu0 %v5191_v1, %s5132_s18 }
  0x42   :  { %504 = vrot.lane.b32.xlu1 %v5200_v2, %s5132_s18  ;;  %502 = vrot.lane.b32.xlu0 %v5186_v0, %s5132_s18 }
  0x46   :  { %527 = vrot.lane.b32.xlu1 %v5191_v1, %s5133_s19  ;;  %498 = vrot.lane.b32.xlu0 %v5127_v4, %s5132_s18 }
  0x4a   :  { %533 = vrot.lane.b32.xlu1 %v5186_v0, %s5133_s19  ;;  %531 = vrot.lane.b32.xlu0 %v5205_v3, %s5133_s19 }
  0x4e   :  { %529 = vrot.lane.b32.xlu1 %v5127_v4, %s5133_s19  ;;  %535 = vrot.lane.b32.xlu0 %v5200_v2, %s5133_s19 }
  0x52   :  { %600 = vperm.xlu0 %4784, %v596_v7   ;;  %605 = vperm.xlu1 %4785, %v597_v8  }
  0x74   :  { %v309_v24 = vpop.permute.xlu1 %308  ;;  %v303_v25 = vpop.permute.xlu0 %302 }
  0x78   :  { %v311_v28 = vpop.permute.xlu1 %310  ;;  %v307_v29 = vpop.permute.xlu0 %306 }
  0x79   :  { %v316_v34 = vsel %vm312_vm9, %v311_v28, %v303_v25  ;;  %v314_v35 = vsel %vm312_vm9, %v307_v29, %v309_v24  ;;  %v315_v36 = vsel %vm312_vm9, %v303_v25, %v307_v29  ;;  %v313_v37 = vsel %vm312_vm9, %v309_v24, %v311_v28 }
  0x7a   :  { %v318_v40 = vmul.f32 %v5353_v30, %v315_v36  ;;  %v320_v41 = vmul.f32 %v5358_v31, %v313_v37  ;;  %v317_v42 = vmul.f32 %v5361_v32, %v316_v34  ;;  %v319_v43 = vmul.f32 %v5364_v33, %v314_v35 }
  0x7b   :  { %v5443_v29 = vsel %vm190_vm5, 1.0, %v5127_v4 }
  0x7c   :  { %v334_v38 = vpop.permute.xlu1 %333  ;;  %v305_v39 = vpop.permute.xlu0 %304 }
  0x7d   :  { %v322_v44 = vmul.f32 %v5353_v30, %v305_v39  ;;  %v324_v45 = vmul.f32 %v5358_v31, %v305_v39  ;;  %v321_v46 = vmul.f32 %v5361_v32, %v305_v39  ;;  %v323_v47 = vmul.f32 %v5364_v33, %v305_v39 }
  0x7f   :  { %v326_v48 = vpack.c.bf16 %v322_v44, %v318_v40  ;;  %v328_v49 = vpack.c.bf16 %v324_v45, %v320_v41  ;;  %v325_v50 = vpack.c.bf16 %v321_v46, %v317_v42  ;;  %v327_v51 = vpack.c.bf16 %v323_v47, %v319_v43 }
  0x80   :  { %v340_v52 = vpop.permute.xlu1 %339  ;;  %v338_v53 = vpop.permute.xlu0 %337 }
  0x81   :  { %v345_v55 = vsel %vm343_vm10, %v338_v53, %v340_v52  ;;  %621 = vmatprep.subr.bf16.mxu0 %v326_v48  ;;  %664 = vmatprep.subr.bf16.mxu1 %v328_v49  ;;  %v346_v57 = vsel %vm343_vm10, %v334_v38, %v338_v53 }
  0x82   :  { %622 = vmatpush1.bf16.msra.mxu0 %v325_v50  ;;  %665 = vmatpush1.bf16.msra.mxu1 %v327_v51  ;;  %v350_v58 = vmul.f32 %v5386_v54, %v345_v55 }
  0x84   :  { %v336_v59 = vpop.permute.xlu1 %335  ;;  %v342_v60 = vpop.permute.xlu0 %341 }
  0x85   :  { %v344_v62 = vsel %vm343_vm10, %v340_v52, %v342_v60  ;;  %v347_v63 = vsel %vm343_vm10, %v342_v60, %v334_v38  ;;  %v357_v5 = vpack.c.bf16 %v336_v59, %v346_v57  ;;  %v354_v7 = vmul.f32 %v5386_v54, %v336_v59 }
  0x86   :  { %v348_v8 = vmul.f32 %v5393_v56, %v347_v63  ;;  %v359_v9 = vpack.c.bf16 %v336_v59, %v344_v62  ;;  %v352_v11 = vmul.f32 %v5393_v56, %v336_v59  ;;  %v5477_v59 = vsel %vm5325_vm4, 1.0, %v5127_v4 }
  0x87   :  { %623 = vmatprep.subr.bf16.mxu0 %v357_v5  ;;  %v358_v15 = vpack.c.bf16 %v354_v7, %v350_v58  ;;  %v5472_v58 = vsel %vm5317_vm2, 1.0, %v5127_v4  ;;  %vm444_vm2 = vcmp.lt.s32.totalorder %v5296_v10, 127 }
  0x88   :  { %v369_v16 = vpop.permute.xlu1 %368  ;;  %666 = vmatprep.subr.bf16.mxu1 %v359_v9  ;;  %v365_v24 = vpop.permute.xlu0 %364  ;;  %v356_v25 = vpack.c.bf16 %v352_v11, %v348_v8 }
  0x89   :  { %667 = vmatpush1.bf16.msra.mxu1 %v358_v15  ;;  %v377_v35 = vsel %vm374_vm1, %v365_v24, %v369_v16 }
  0x8a   :  { %624 = vmatpush1.bf16.msra.mxu0 %v356_v25  ;;  %v380_v39 = vmul.f32 %v5437_v18, %v377_v35 }
  0x8c   :  { %v373_v19 = vpop.permute.xlu1 %372  ;;  %v371_v34 = vpop.permute.xlu0 %370 }
  0x8d   :  { %v378_v36 = vsel %vm374_vm1, %v373_v19, %v365_v24  ;;  %v375_v37 = vsel %vm374_vm1, %v371_v34, %v373_v19  ;;  %v376_v38 = vsel %vm374_vm1, %v369_v16, %v371_v34  ;;  %v427_v19 = vpack.c.bf16 %v5127_v4, %v5205_v3 }
  0x8e   :  { %v379_v40 = vmul.f32 %v5440_v20, %v378_v36  ;;  %v381_v41 = vmul.f32 %v5443_v29, %v376_v38  ;;  %v382_v42 = vmul.f32 %v5448_v22, %v375_v37  ;;  %v429_v38 = vpack.c.bf16 %v5127_v4, %v5200_v2 }
  0x90   :  { %v396_v43 = vpop.permute.xlu1 %395  ;;  %v367_v44 = vpop.permute.xlu0 %366 }
  0x91   :  { %v384_v45 = vmul.f32 %v5437_v18, %v367_v44  ;;  %v386_v46 = vmul.f32 %v5448_v22, %v367_v44  ;;  %v383_v47 = vmul.f32 %v5440_v20, %v367_v44  ;;  %v385_v48 = vmul.f32 %v5443_v29, %v367_v44 }
  0x92   :  { %v5507_v44 = vsel %vm5398_vm11, 1.0, %v5127_v4  ;;  %vm475_vm11 = vcmp.lt.s32.totalorder %v5296_v10, 113 }
  0x93   :  { %v388_v49 = vpack.c.bf16 %v384_v45, %v380_v39  ;;  %v390_v50 = vpack.c.bf16 %v386_v46, %v382_v42  ;;  %v387_v51 = vpack.c.bf16 %v383_v47, %v379_v40  ;;  %v389_v52 = vpack.c.bf16 %v385_v48, %v381_v41 }
  0x94   :  { %v402_v53 = vpop.permute.xlu1 %401  ;;  %v400_v55 = vpop.permute.xlu0 %399  ;;  %v426_v40 = vpack.c.bf16 %v5127_v4, %v5191_v1  ;;  %v428_v41 = vpack.c.bf16 %v5127_v4, %v5186_v0  ;;  %v51_v42 = vand.u32 255, %v5302_v12  ;;  %v5512_v45 = vsel %vm5409_vm12, 1.0, %v5127_v4 }
  0x95   :  { %v408_v57 = vsel %vm405_vm3, %v396_v43, %v400_v55  ;;  %625 = vmatprep.subr.bf16.mxu0 %v388_v49  ;;  %668 = vmatprep.subr.bf16.mxu1 %v390_v50  ;;  %v407_v60 = vsel %vm405_vm3, %v400_v55, %v402_v53 }
  0x96   :  { %626 = vmatpush1.bf16.msra.mxu0 %v387_v51  ;;  %669 = vmatpush1.bf16.msra.mxu1 %v389_v52  ;;  %v411_v62 = vmul.f32 %v5353_v30, %v408_v57  ;;  %v412_v24 = vmul.f32 %v5477_v59, %v407_v60  ;;  %vm5522_vm4 = vcmp.lt.s32.totalorder %v51_v42, 240 }
  0x97   :  { %vm241_vm12 = vmand %vm5522_vm4, %vm5335_vm6  ;;  %vm506_vm6 = vcmp.lt.s32.totalorder %v5296_v10, 112 }
  0x98   :  { %v398_v63 = vpop.permute.xlu1 %397  ;;  %v404_v5 = vpop.permute.xlu0 %403  ;;  %vm277_vm5 = vmand %vm5522_vm4, %vm5419_vm14  ;;  %vm872_vm14 = vcmask 1043456  }
  0x99   :  { %v406_v7 = vsel %vm405_vm3, %v402_v53, %v404_v5  ;;  %v409_v21 = vsel %vm405_vm3, %v404_v5, %v396_v43  ;;  %v415_v8 = vmul.f32 %v5353_v30, %v398_v63  ;;  %v414_v9 = vmul.f32 %v5472_v58, %v398_v63 }
  0x9a   :  { %v410_v23 = vmul.f32 %v5472_v58, %v409_v21  ;;  %v413_v11 = vmul.f32 %v5358_v31, %v406_v7  ;;  %v417_v15 = vmul.f32 %v5358_v31, %v398_v63  ;;  %v416_v16 = vmul.f32 %v5477_v59, %v398_v63 }
  0x9b   :  { %v419_v25 = vpack.c.bf16 %v415_v8, %v411_v62  ;;  %v65_v43 = vand.u32 255, %v5305_v13  ;;  %v5602_v28 = vsel %vm277_vm5, 1.0, %v5127_v4 }
  0x9c   :  { %v439_v34 = vpop.permute.xlu1 %438  ;;  %v435_v35 = vpop.permute.xlu0 %434  ;;  %v418_v36 = vpack.c.bf16 %v414_v9, %v410_v23  ;;  %v421_v37 = vpack.c.bf16 %v417_v15, %v413_v11  ;;  %v420_v39 = vpack.c.bf16 %v416_v16, %v412_v24  ;;  %v5548_v15 = vsel %vm241_vm12, 1.0, %v5127_v4  ;;  %8069 = vst [vmem:[#allocation7_spill] sm:$0xff] %v5602_v28 }
  0x9d   :  { %627 = vmatprep.subr.bf16.mxu0 %v419_v25  ;;  %v447_v48 = vsel %vm444_vm2, %v435_v35, %v439_v34  ;;  %vm5526_vm8 = vcmp.lt.s32.totalorder %v65_v43, 240 }
  0x9e   :  { %628 = vmatpush1.bf16.msra.mxu0 %v418_v36  ;;  %670 = vmatprep.subr.bf16.mxu1 %v421_v37  ;;  %v449_v50 = vmul.f32 %v5507_v44, %v447_v48  ;;  %vm243_vm13 = vmand %vm5526_vm8, %vm5341_vm7  ;;  %vm537_vm7 = vcmp.lt.s32.totalorder %v5296_v10, 111  ;;  %v8146_v10 = vmov 0  }
  0x9f   :  { %671 = vmatpush1.bf16.msra.mxu1 %v420_v39  ;;  %629 = vmatprep.subr.bf16.mxu0 %v427_v19  ;;  %v5555_v24 = vsel %vm243_vm13, 1.0, %v5127_v4  ;;  %vm279_vm12 = vmand %vm5526_vm8, %vm5425_vm15  ;;  %vm868_vm15 = vcmask 64512  }
  0xa0   :  { %v443_v46 = vpop.permute.xlu1 %442  ;;  %v441_v47 = vpop.permute.xlu0 %440  ;;  %672 = vmatprep.subr.bf16.mxu1 %v429_v38 }
  0xa1   :  { %v448_v12 = vsel %vm444_vm2, %v443_v46, %v435_v35  ;;  %v445_v13 = vsel %vm444_vm2, %v441_v47, %v443_v46  ;;  %v446_v61 = vsel %vm444_vm2, %v439_v34, %v441_v47 }
  0xa2   :  { %630 = vmatpush1.bf16.msra.mxu0 %v426_v40  ;;  %v452_v51 = vmul.f32 %v5448_v22, %v448_v12  ;;  %v450_v52 = vmul.f32 %v5437_v18, %v446_v61  ;;  %v451_v53 = vmul.f32 %v5512_v45, %v445_v13 }
  0xa3   :  { %673 = vmatpush1.bf16.msra.mxu1 %v428_v41 }
  0xa4   :  { %v466_v55 = vpop.permute.xlu1 %465  ;;  %v437_v57 = vpop.permute.xlu0 %436 }
  0xa5   :  { %v454_v60 = vmul.f32 %v5437_v18, %v437_v57  ;;  %v456_v62 = vmul.f32 %v5448_v22, %v437_v57  ;;  %v453_v63 = vmul.f32 %v5507_v44, %v437_v57  ;;  %v455_v5 = vmul.f32 %v5512_v45, %v437_v57 }
  0xa7   :  { %v458_v7 = vpack.c.bf16 %v454_v60, %v450_v52  ;;  %v460_v21 = vpack.c.bf16 %v456_v62, %v452_v51  ;;  %v457_v8 = vpack.c.bf16 %v453_v63, %v449_v50  ;;  %v459_v9 = vpack.c.bf16 %v455_v5, %v451_v53 }
  0xa8   :  { %v472_v23 = vpop.permute.xlu1 %471  ;;  %v470_v11 = vpop.permute.xlu0 %469  ;;  %v5573_v51 = vsel %vm5526_vm8, 1.0, %v5127_v4  ;;  %v5580_v53 = vsel %vm5522_vm4, 1.0, %v5127_v4 }
  0xa9   :  { %v477_v26 = vsel %vm475_vm11, %v470_v11, %v472_v23  ;;  %v478_v16 = vsel %vm475_vm11, %v466_v55, %v470_v11  ;;  %631 = vmatprep.subr.bf16.mxu0 %v458_v7  ;;  %674 = vmatprep.subr.bf16.mxu1 %v460_v21  ;;  %8068 = vst [vmem:[#allocation6_spill] sm:$0xff] %v5573_v51 }
  0xaa   :  { %632 = vmatpush1.bf16.msra.mxu0 %v457_v8  ;;  %675 = vmatpush1.bf16.msra.mxu1 %v459_v9  ;;  %v480_v27 = vmul.f32 %v5472_v58, %v478_v16  ;;  %v481_v25 = vmul.f32 %v5548_v15, %v477_v26 }
  0xac   :  { %v468_v19 = vpop.permute.xlu1 %467  ;;  %v474_v34 = vpop.permute.xlu0 %473 }
  0xad   :  { %v476_v35 = vsel %vm475_vm11, %v472_v23, %v474_v34  ;;  %v479_v36 = vsel %vm475_vm11, %v474_v34, %v466_v55  ;;  %v485_v37 = vmul.f32 %v5548_v15, %v468_v19  ;;  %v484_v38 = vmul.f32 %v5472_v58, %v468_v19 }
  0xae   :  { %v482_v39 = vmul.f32 %v5477_v59, %v476_v35  ;;  %v483_v40 = vmul.f32 %v5555_v24, %v479_v36  ;;  %v487_v41 = vmul.f32 %v5555_v24, %v468_v19  ;;  %v486_v42 = vmul.f32 %v5477_v59, %v468_v19 }
  0xaf   :  { %v489_v43 = vpack.c.bf16 %v485_v37, %v481_v25  ;;  %v488_v46 = vpack.c.bf16 %v484_v38, %v480_v27  ;;  %v5609_v19 = vsel %vm279_vm12, 1.0, %v5127_v4 }
  0xb0   :  { %v501_v47 = vpop.permute.xlu1 %500  ;;  %v497_v48 = vpop.permute.xlu0 %496  ;;  %v491_v12 = vpack.c.bf16 %v487_v41, %v483_v40  ;;  %v490_v13 = vpack.c.bf16 %v486_v42, %v482_v39  ;;  %8070 = vst [vmem:[#allocation8_spill] sm:$0xff] %v5609_v19 }
  0xb1   :  { %633 = vmatprep.subr.bf16.mxu0 %v489_v43  ;;  %v509_v21 = vsel %vm506_vm6, %v497_v48, %v501_v47 }
  0xb2   :  { %634 = vmatpush1.bf16.msra.mxu0 %v488_v46  ;;  %676 = vmatprep.subr.bf16.mxu1 %v491_v12  ;;  %v4786_v12 = vld [vmem:[%s7984_s1] ss:$8 sps:$4 sm:$0xff]  }
  0xb3   :  { %677 = vmatpush1.bf16.msra.mxu1 %v490_v13 }
  0xb4   :  { %v505_v61 = vpop.permute.xlu1 %504  ;;  %v503_v50 = vpop.permute.xlu0 %502 }
  0xb5   :  { %v510_v52 = vsel %vm506_vm6, %v505_v61, %v497_v48  ;;  %v508_v55 = vsel %vm506_vm6, %v501_v47, %v503_v50  ;;  %v507_v8 = vsel %vm506_vm6, %v503_v50, %v505_v61 }
  0xb6   :  { %v514_v62 = vmul.f32 %v5573_v51, %v510_v52  ;;  %v512_v63 = vmul.f32 %v5580_v53, %v508_v55 }
  0xb8   :  { %v528_v57 = vpop.permute.xlu1 %527  ;;  %v499_v60 = vpop.permute.xlu0 %498 }
  0xb9   :  { %v516_v5 = vmul.f32 %v5580_v53, %v499_v60  ;;  %v518_v7 = vmul.f32 %v5573_v51, %v499_v60  ;;  %v519_v16 = vpack.c.bf16 %v499_v60, %v509_v21  ;;  %v521_v27 = vpack.c.bf16 %v499_v60, %v507_v8 }
  0xbb   :  { %v520_v9 = vpack.c.bf16 %v516_v5, %v512_v63  ;;  %v522_v23 = vpack.c.bf16 %v518_v7, %v514_v62 }
  0xbc   :  { %v534_v11 = vpop.permute.xlu1 %533  ;;  %v532_v26 = vpop.permute.xlu0 %531 }
  0xbd   :  { %v539_v14 = vsel %vm537_vm7, %v532_v26, %v534_v11  ;;  %v540_v25 = vsel %vm537_vm7, %v528_v57, %v532_v26  ;;  %635 = vmatprep.subr.bf16.mxu0 %v520_v9  ;;  %678 = vmatprep.subr.bf16.mxu1 %v522_v23 }
  0xbe   :  { %636 = vmatpush1.bf16.msra.mxu0 %v519_v16  ;;  %679 = vmatpush1.bf16.msra.mxu1 %v521_v27  ;;  %v542_v17 = vmul.f32 %v5507_v44, %v540_v25  ;;  %v543_v49 = vmul.f32 %v5602_v28, %v539_v14 }
  0xc0   :  { %v530_v34 = vpop.permute.xlu1 %529  ;;  %v536_v35 = vpop.permute.xlu0 %535 }
  0xc1   :  { %v538_v36 = vsel %vm537_vm7, %v534_v11, %v536_v35  ;;  %v541_v37 = vsel %vm537_vm7, %v536_v35, %v528_v57  ;;  %v547_v38 = vmul.f32 %v5602_v28, %v530_v34  ;;  %v546_v39 = vmul.f32 %v5507_v44, %v530_v34 }
  0xc2   :  { %v544_v40 = vmul.f32 %v5512_v45, %v538_v36  ;;  %v545_v4 = vmul.f32 %v5609_v19, %v541_v37  ;;  %v549_v41 = vmul.f32 %v5609_v19, %v530_v34  ;;  %v548_v42 = vmul.f32 %v5512_v45, %v530_v34 }
  0xc3   :  { %v551_v43 = vpack.c.bf16 %v547_v38, %v543_v49  ;;  %v550_v46 = vpack.c.bf16 %v546_v39, %v542_v17 }
  0xc4   :  { %v553_v47 = vpack.c.bf16 %v549_v41, %v545_v4  ;;  %v552_v48 = vpack.c.bf16 %v548_v42, %v544_v40 }
  0xc5   :  { %637 = vmatprep.subr.bf16.mxu0 %v551_v43 }
  0xc6   :  { %638 = vmatpush1.bf16.msra.mxu0 %v550_v46  ;;  %680 = vmatprep.subr.bf16.mxu1 %v553_v47 }
  0xc7   :  { %681 = vmatpush1.bf16.msra.mxu1 %v552_v48 }
  0xc9   :  { %654 = vmatmul.mubr.bf16.vlgmr.msra.gmra.mrb[0].mxu0 %v4786_v12 }
  0xca   :  { %697 = vmatmul.mubr.bf16.vlgmr.msra.gmra.mrb[0].mxu1 %v4786_v12  ;;  %809 = vmatprep.mubr.bf16.mxu0 %v7992_v6 }
  0xcb   :  { %852 = vmatprep.mubr.bf16.mxu1 %v7992_v6 }
  0xd1   :  { %v601_v13 = vpop.permute.xlu0 %600  ;;  %v606_v50 = vpop.permute.xlu1 %605 }
 0x19c   :  { %v655_v61 = vpop.f32.mrb[0].mxu0 }
 0x19d   :  { %v656_v52 = vadd.f32 %v655_v61, %v601_v13  ;;  %v657_v55 = vpop.f32.mrb[1].mxu0  ;;  %v698_v57 = vpop.f32.mrb[0].mxu1 }
 0x19e   :  { %v5628_v60 = vadd.f32 %v657_v55, %v601_v13  ;;  %v699_v62 = vadd.f32 %v698_v57, %v601_v13  ;;  %v659_v63 = vpop.f32.mrb[2].mxu0  ;;  %v700_v5 = vpop.f32.mrb[1].mxu1 }
 0x19f   :  { %v4572_v7 = vmul.f32 -1.442695, %v656_v52  ;;  %v660_v21 = vadd.f32 %v659_v63, %v606_v50  ;;  %v5630_v8 = vadd.f32 %v700_v5, %v601_v13  ;;  %v661_v9 = vpop.f32.mrb[3].mxu0  ;;  %v702_v23 = vpop.f32.mrb[2].mxu1 }
 0x1a0   :  { %v4573_v11 = vmul.f32 -1.442695, %v5628_v60  ;;  %v4574_v26 = vmul.f32 -1.442695, %v699_v62  ;;  %v662_v16 = vadd.f32 %v661_v9, %v606_v50  ;;  %v703_v27 = vadd.f32 %v702_v23, %v606_v50  ;;  %v704_v14 = vpop.f32.mrb[3].mxu1 }
 0x1a1   :  { %4813 = vpow2.f32 %v4572_v7  ;;  %v4576_v25 = vmul.f32 -1.442695, %v660_v21  ;;  %v4575_v17 = vmul.f32 -1.442695, %v5630_v8  ;;  %v705_v49 = vadd.f32 %v704_v14, %v606_v50 }
 0x1a2   :  { %4815 = vpow2.f32 %v4573_v11  ;;  %v4577_v34 = vmul.f32 -1.442695, %v662_v16  ;;  %v4578_v35 = vmul.f32 -1.442695, %v703_v27 }
 0x1a3   :  { %4817 = vpow2.f32 %v4574_v26  ;;  %v4579_v36 = vmul.f32 -1.442695, %v705_v49 }
 0x1a4   :  { %4819 = vpow2.f32 %v4576_v25 }
 0x1a5   :  { %4821 = vpow2.f32 %v4575_v17 }
 0x1a6   :  { %4823 = vpow2.f32 %v4577_v34 }
 0x1a7   :  { %4825 = vpow2.f32 %v4578_v35 }
 0x1a8   :  { %4827 = vpow2.f32 %v4579_v36 }
 0x1ab   :  { %v4814_v37 = vpop.eup %4813 }
 0x1ac   :  { %v4816_v38 = vpop.eup %4815  ;;  %v731_v39 = vadd.f32 1.0, %v4814_v37 }
 0x1ad   :  { %v4818_v40 = vpop.eup %4817  ;;  %v732_v4 = vadd.f32 1.0, %v4816_v38 }
 0x1ae   :  { %v4820_v41 = vpop.eup %4819  ;;  %4829 = vrcp.f32 %v731_v39  ;;  %v733_v42 = vadd.f32 1.0, %v4818_v40  ;;  %v301_v39 = vpack.c.bf16 %v5200_v2, %v5200_v2  ;;  %v300_v40 = vpack.c.bf16 %v5186_v0, %v5186_v0 }
 0x1af   :  { %v4822_v43 = vpop.eup %4821  ;;  %4831 = vrcp.f32 %v732_v4  ;;  %v735_v46 = vadd.f32 1.0, %v4820_v41 }
 0x1b0   :  { %v4824_v47 = vpop.eup %4823  ;;  %4833 = vrcp.f32 %v733_v42  ;;  %v734_v48 = vadd.f32 1.0, %v4822_v43  ;;  %v880_v4 = vsel %vm872_vm14, %v300_v40, 0 }
 0x1b1   :  { %v4826_v12 = vpop.eup %4825  ;;  %4835 = vrcp.f32 %v735_v46  ;;  %v736_v13 = vadd.f32 1.0, %v4824_v47  ;;  %v4590_v47 = vld [vmem:[%s7985_s2 + $0x10] sm:$0xff] }
 0x1b2   :  { %v4828_v61 = vpop.eup %4827  ;;  %4837 = vrcp.f32 %v734_v48  ;;  %v737_v50 = vadd.f32 1.0, %v4826_v12  ;;  %v4591_v12 = vld [vmem:[%s7985_s2 + $0x18] sm:$0xff] }
 0x1b3   :  { %4839 = vrcp.f32 %v736_v13  ;;  %v738_v55 = vadd.f32 1.0, %v4828_v61 }
 0x1b4   :  { %4841 = vrcp.f32 %v737_v50 }
 0x1b5   :  { %4843 = vrcp.f32 %v738_v55 }
 0x1b8   :  { %v4830_v57 = vpop.eup %4829 }
 0x1b9   :  { %v4832_v63 = vpop.eup %4831  ;;  %v755_v5 = vmul.f32 %v4830_v57, %v656_v52 }
 0x1ba   :  { %v4834_v7 = vpop.eup %4833  ;;  %v5636_v17 = vmul.f32 %v4832_v63, %v5628_v60 }
 0x1bb   :  { %v4836_v9 = vpop.eup %4835  ;;  %971 = vrot.lane.b32.xlu1 %v755_v5, %s5125_s9  ;;  %v757_v14 = vmul.f32 %v4834_v7, %v699_v62 }
 0x1bc   :  { %v4838_v23 = vpop.eup %4837  ;;  %v759_v11 = vmul.f32 %v4836_v9, %v660_v21 }
 0x1bd   :  { %v4840_v26 = vpop.eup %4839  ;;  %v5645_v37 = vmul.f32 %v4838_v23, %v5630_v8  ;;  %v4789_v8 = vld [vmem:[%s7987_s4] sm:$0xff]  }
 0x1be   :  { %v4842_v25 = vpop.eup %4841  ;;  %v5638_v34 = vmul.f32 %v4840_v26, %v662_v16  ;;  %973 = vrot.lane.b32.xlu0 %v759_v11, %s5125_s9  ;;  %v5641_v35 = vpack.c.bf16 %v759_v11, %v755_v5 }
 0x1bf   :  { %v4844_v36 = vpop.eup %4843  ;;  %v761_v52 = vmul.f32 %v4842_v25, %v703_v27  ;;  %979 = vrot.lane.b32.xlu1 %v757_v14, %s5125_s9  ;;  %v299_v27 = vpack.c.bf16 %v5205_v3, %v5205_v3  ;;  %v4791_v3 = vld [vmem:[%s7984_s1 + $0x14] ss:$8 sps:$4 sm:$0xff]  }
 0x1c0   :  { %v5647_v21 = vmul.f32 %v4844_v36, %v705_v49  ;;  %v5651_v62 = vpack.c.bf16 %v5638_v34, %v5636_v17  ;;  %v298_v49 = vpack.c.bf16 %v5191_v1, %v5191_v1  ;;  %v4790_v1 = vld [vmem:[%s7986_s3] sm:$0xff]  }
 0x1c1   :  { %v5653_v60 = vpack.c.bf16 %v761_v52, %v757_v14 }
 0x1c2   :  { %777 = vmatprep.subr.bf16.mxu0 %v5651_v62  ;;  %v5658_v16 = vpack.c.bf16 %v5647_v21, %v5645_v37  ;;  %981 = vrot.lane.b32.xlu0 %v761_v52, %s5125_s9  ;;  %v874_v38 = vsel %vm872_vm14, %v298_v49, 0 }
 0x1c3   :  { %778 = vmatpush1.bf16.msra.mxu0 %v5641_v35  ;;  %1011 = vrot.lane.b32.xlu1 %v755_v5, %s5126_s14 }
 0x1c4   :  { %820 = vmatprep.subr.bf16.mxu1 %v5658_v16  ;;  %4584 = vmatprep.subr.msk.bf16.mxu0 %vm872_vm14, %v299_v27 }
 0x1c5   :  { %821 = vmatpush1.bf16.msra.mxu1 %v5653_v60 }
 0x1c6   :  { %1013 = vrot.lane.b32.xlu0 %v759_v11, %s5126_s14  ;;  %4581 = vmatmul.mubr.msk.bf16.vlgmr.msra.gmra.mrb[4].mxu0 %vm617_vm0, %v4789_v8 }
 0x1c7   :  { %1019 = vrot.lane.b32.xlu1 %v757_v14, %s5126_s14  ;;  %917 = vmatprep.mubr.bf16.mxu0 %v7992_v6 }
 0x1c8   :  { %4582 = vmatmul.mubr.msk.bf16.vlgmr.msra.gmra.mrb[4].mxu1 %vm617_vm0, %v4789_v8  ;;  %886 = vmatpush1.bf16.msra.mxu0 %v874_v38 }
 0x1c9   :  { %960 = vmatprep.mubr.bf16.mxu1 %v7992_v6  ;;  %4586 = vmatprep.subr.msk.bf16.mxu1 %vm872_vm14, %v301_v39 }
 0x1ca   :  { %1021 = vrot.lane.b32.xlu0 %v761_v52, %s5126_s14  ;;  %929 = vmatpush1.bf16.msra.mxu1 %v880_v4 }
 0x1cb   :  { %1051 = vrot.lane.b32.xlu1 %v755_v5, %s5128_s0 }
 0x1ce   :  { %1053 = vrot.lane.b32.xlu0 %v759_v11, %s5128_s0 }
 0x1cf   :  { %1059 = vrot.lane.b32.xlu1 %v757_v14, %s5128_s0 }
 0x1d2   :  { %1061 = vrot.lane.b32.xlu0 %v761_v52, %s5128_s0  ;;  %4585 = vmatmul.mubr.msk.bf16.vlgmr.msra.gmra.mrb[4].mxu0 %vm868_vm15, %v4790_v1 }
 0x1d3   :  { %1091 = vrot.lane.b32.xlu1 %v755_v5, %s5129_s15  ;;  %4594 = vmatprep.mubr.msk.bf16.mxu0 %vm617_vm0, %v4791_v3 }
 0x1d4   :  { %4587 = vmatmul.mubr.msk.bf16.vlgmr.msra.gmra.mrb[4].mxu1 %vm868_vm15, %v4790_v1 }
 0x1d5   :  { %4595 = vmatprep.mubr.msk.bf16.mxu1 %vm617_vm0, %v4791_v3 }
 0x1d6   :  { %1093 = vrot.lane.b32.xlu0 %v759_v11, %s5129_s15 }
 0x1d7   :  { %1099 = vrot.lane.b32.xlu1 %v757_v14, %s5129_s15 }
 0x1da   :  { %1101 = vrot.lane.b32.xlu0 %v761_v52, %s5129_s15 }
 0x1db   :  { %1135 = vrot.lane.b32.xlu1 %v755_v5, %s5130_s16 }
 0x1de   :  { %1137 = vrot.lane.b32.xlu0 %v759_v11, %s5130_s16 }
 0x1df   :  { %1143 = vrot.lane.b32.xlu1 %v757_v14, %s5130_s16 }
 0x1e2   :  { %1145 = vrot.lane.b32.xlu0 %v761_v52, %s5130_s16 }
 0x1e3   :  { %1175 = vrot.lane.b32.xlu1 %v755_v5, %s5131_s17 }
 0x1e6   :  { %1177 = vrot.lane.b32.xlu0 %v759_v11, %s5131_s17 }
 0x1e7   :  { %1183 = vrot.lane.b32.xlu1 %v757_v14, %s5131_s17 }
 0x1ea   :  { %1185 = vrot.lane.b32.xlu0 %v761_v52, %s5131_s17 }
 0x1eb   :  { %1215 = vrot.lane.b32.xlu1 %v755_v5, %s5132_s18 }
 0x1ee   :  { %1217 = vrot.lane.b32.xlu0 %v759_v11, %s5132_s18 }
 0x1ef   :  { %1223 = vrot.lane.b32.xlu1 %v757_v14, %s5132_s18 }
 0x1f2   :  { %1225 = vrot.lane.b32.xlu0 %v761_v52, %s5132_s18 }
 0x1f3   :  { %1255 = vrot.lane.b32.xlu1 %v755_v5, %s5133_s19 }
 0x1f6   :  { %1257 = vrot.lane.b32.xlu0 %v759_v11, %s5133_s19 }
 0x1f7   :  { %1263 = vrot.lane.b32.xlu1 %v757_v14, %s5133_s19 }
 0x1fa   :  { %1265 = vrot.lane.b32.xlu0 %v761_v52, %s5133_s19 }
 0x1fb   :  { %975 = vrot.lane.b32.xlu1 %v5636_v17, %s5125_s9 }
 0x1fe   :  { %977 = vrot.lane.b32.xlu0 %v5638_v34, %s5125_s9 }
 0x1ff   :  { %983 = vrot.lane.b32.xlu1 %v5645_v37, %s5125_s9 }
 0x202   :  { %985 = vrot.lane.b32.xlu0 %v5647_v21, %s5125_s9 }
 0x203   :  { %1015 = vrot.lane.b32.xlu1 %v5636_v17, %s5126_s14 }
 0x206   :  { %1017 = vrot.lane.b32.xlu0 %v5638_v34, %s5126_s14 }
 0x207   :  { %1023 = vrot.lane.b32.xlu1 %v5645_v37, %s5126_s14 }
 0x20a   :  { %1025 = vrot.lane.b32.xlu0 %v5647_v21, %s5126_s14 }
 0x20b   :  { %1055 = vrot.lane.b32.xlu1 %v5636_v17, %s5128_s0 }
 0x20e   :  { %1057 = vrot.lane.b32.xlu0 %v5638_v34, %s5128_s0 }
 0x20f   :  { %1063 = vrot.lane.b32.xlu1 %v5645_v37, %s5128_s0 }
 0x212   :  { %1065 = vrot.lane.b32.xlu0 %v5647_v21, %s5128_s0 }
 0x213   :  { %1095 = vrot.lane.b32.xlu1 %v5636_v17, %s5129_s15 }
 0x216   :  { %1097 = vrot.lane.b32.xlu0 %v5638_v34, %s5129_s15 }
 0x217   :  { %1103 = vrot.lane.b32.xlu1 %v5645_v37, %s5129_s15 }
 0x21a   :  { %1105 = vrot.lane.b32.xlu0 %v5647_v21, %s5129_s15 }
 0x21b   :  { %1139 = vrot.lane.b32.xlu1 %v5636_v17, %s5130_s16 }
 0x21e   :  { %1141 = vrot.lane.b32.xlu0 %v5638_v34, %s5130_s16 }
 0x21f   :  { %1147 = vrot.lane.b32.xlu1 %v5645_v37, %s5130_s16 }
 0x222   :  { %1149 = vrot.lane.b32.xlu0 %v5647_v21, %s5130_s16 }
 0x223   :  { %1179 = vrot.lane.b32.xlu1 %v5636_v17, %s5131_s17 }
 0x226   :  { %1181 = vrot.lane.b32.xlu0 %v5638_v34, %s5131_s17 }
 0x227   :  { %1187 = vrot.lane.b32.xlu1 %v5645_v37, %s5131_s17 }
 0x22a   :  { %1189 = vrot.lane.b32.xlu0 %v5647_v21, %s5131_s17 }
 0x22b   :  { %1219 = vrot.lane.b32.xlu1 %v5636_v17, %s5132_s18 }
 0x22d   :  { %v972_v0 = vpop.permute.xlu1 %971 }
 0x22e   :  { %1221 = vrot.lane.b32.xlu0 %v5638_v34, %s5132_s18 }
 0x22f   :  { %1227 = vrot.lane.b32.xlu1 %v5645_v37, %s5132_s18 }
 0x230   :  { %v974_v2 = vpop.permute.xlu0 %973 }
 0x231   :  { %v980_v41 = vpop.permute.xlu1 %979 }
 0x232   :  { %1229 = vrot.lane.b32.xlu0 %v5647_v21, %s5132_s18 }
 0x233   :  { %1259 = vrot.lane.b32.xlu1 %v5636_v17, %s5133_s19 }
 0x234   :  { %v982_v42 = vpop.permute.xlu0 %981 }
 0x235   :  { %v5773_v43 = vpop.permute.xlu1 %1011 }
 0x236   :  { %1261 = vrot.lane.b32.xlu0 %v5638_v34, %s5133_s19 }
 0x237   :  { %1267 = vrot.lane.b32.xlu1 %v5645_v37, %s5133_s19 }
 0x238   :  { %v5779_v46 = vpop.permute.xlu0 %1013 }
 0x239   :  { %v5784_v48 = vpop.permute.xlu1 %1019 }
 0x23a   :  { %1269 = vrot.lane.b32.xlu0 %v5647_v21, %s5133_s19 }
 0x23b   :  { %1339 = vperm.xlu1 %4785, %v4590_v47  }
 0x23c   :  { %v5791_v13 = vpop.permute.xlu0 %1021 }
 0x23d   :  { %v5793_v61 = vpop.permute.xlu1 %1051 }
 0x23e   :  { %1344 = vperm.xlu0 %4784, %v4591_v12  }
 0x240   :  { %v5795_v50 = vpop.permute.xlu0 %1053 }
 0x241   :  { %v5797_v55 = vpop.permute.xlu1 %1059 }
 0x244   :  { %v5799_v57 = vpop.permute.xlu0 %1061 }
 0x245   :  { %v5801_v63 = vpop.permute.xlu1 %1091 }
 0x248   :  { %v5803_v5 = vpop.permute.xlu0 %1093 }
 0x249   :  { %v5805_v7 = vpop.permute.xlu1 %1099 }
 0x24c   :  { %v5807_v9 = vpop.permute.xlu0 %1101 }
 0x24d   :  { %v5809_v23 = vpop.permute.xlu1 %1135 }
 0x250   :  { %v5811_v11 = vpop.permute.xlu0 %1137 }
 0x251   :  { %v5813_v26 = vpop.permute.xlu1 %1143 }
 0x254   :  { %v5815_v14 = vpop.permute.xlu0 %1145 }
 0x255   :  { %v5817_v25 = vpop.permute.xlu1 %1175 }
 0x258   :  { %v5819_v17 = vpop.permute.xlu0 %1177 }
 0x259   :  { %v5821_v34 = vpop.permute.xlu1 %1183 }
 0x25c   :  { %v5823_v36 = vpop.permute.xlu0 %1185 }
 0x25d   :  { %v5825_v52 = vpop.permute.xlu1 %1215 }
 0x25e   :  { %8071 = vst [vmem:[#allocation9_spill] sm:$0xff] %v5825_v52 }
 0x260   :  { %v5827_v37 = vpop.permute.xlu0 %1217 }
 0x261   :  { %8072 = vst [vmem:[#allocation10_spill] sm:$0xff] %v5827_v37  ;;  %v5829_v21 = vpop.permute.xlu1 %1223 }
 0x264   :  { %v5831_v8 = vpop.permute.xlu0 %1225 }
 0x265   :  { %v5833_v27 = vpop.permute.xlu1 %1255 }
 0x266   :  { %8073 = vst [vmem:[#allocation11_spill] sm:$0xff] %v5833_v27 }
 0x268   :  { %v5835_v49 = vpop.permute.xlu0 %1257 }
 0x269   :  { %8074 = vst [vmem:[#allocation12_spill] sm:$0xff] %v5835_v49  ;;  %v5837_v38 = vpop.permute.xlu1 %1263 }
 0x26a   :  { %8075 = vst [vmem:[#allocation13_spill] sm:$0xff] %v5837_v38 }
 0x26c   :  { %v5839_v39 = vpop.permute.xlu0 %1265 }
 0x26d   :  { %8076 = vst [vmem:[#allocation14_spill] sm:$0xff] %v5839_v39  ;;  %v976_v40 = vpop.permute.xlu1 %975 }
 0x26e   :  { %v991_v4 = vsel %vm312_vm9, %v972_v0, %v976_v40  ;;  %v989_v39 = vsel %vm312_vm9, %v976_v40, %v980_v41 }
 0x26f   :  { %v996_v12 = vmul.f32 %v5353_v30, %v991_v4 }
 0x270   :  { %v978_v1 = vpop.permute.xlu0 %977 }
 0x271   :  { %v992_v3 = vsel %vm312_vm9, %v974_v2, %v978_v1  ;;  %v984_v47 = vpop.permute.xlu1 %983  ;;  %v990_v6 = vsel %vm312_vm9, %v978_v1, %v982_v42 }
 0x272   :  { %v1000_v19 = vmul.f32 %v5353_v30, %v992_v3  ;;  %v987_v28 = vsel %vm312_vm9, %v980_v41, %v984_v47  ;;  %v993_v49 = vsel %vm312_vm9, %v984_v47, %v972_v0  ;;  %v1001_v51 = vmul.f32 %v5364_v33, %v990_v6 }
 0x273   :  { %v995_v52 = vmul.f32 %v5361_v32, %v993_v49  ;;  %v998_v37 = vmul.f32 %v5358_v31, %v987_v28 }
 0x274   :  { %v986_v27 = vpop.permute.xlu0 %985  ;;  %v1004_v38 = vpack.c.bf16 %v1000_v19, %v996_v12  ;;  %v997_v19 = vmul.f32 %v5364_v33, %v989_v39 }
 0x275   :  { %v988_v4 = vsel %vm312_vm9, %v982_v42, %v986_v27  ;;  %v994_v1 = vsel %vm312_vm9, %v986_v27, %v974_v2  ;;  %v1016_v3 = vpop.permute.xlu1 %1015 }
 0x276   :  { %v999_v0 = vmul.f32 %v5361_v32, %v994_v1  ;;  %v1002_v47 = vmul.f32 %v5358_v31, %v988_v4  ;;  %1359 = vmatprep.subr.bf16.mxu0 %v1004_v38  ;;  %v1005_v12 = vpack.c.bf16 %v1001_v51, %v997_v19  ;;  %v1029_v27 = vsel %vm343_vm10, %v1016_v3, %v5784_v48 }
 0x277   :  { %v1037_v39 = vmul.f32 %v5386_v54, %v1029_v27 }
 0x278   :  { %v1003_v41 = vpack.c.bf16 %v999_v0, %v995_v52  ;;  %v1018_v6 = vpop.permute.xlu0 %1017  ;;  %v1006_v40 = vpack.c.bf16 %v1002_v47, %v998_v37  ;;  %v1031_v52 = vsel %vm343_vm10, %v5773_v43, %v1016_v3 }
 0x279   :  { %v1030_v2 = vsel %vm343_vm10, %v1018_v6, %v5791_v13  ;;  %v1032_v42 = vsel %vm343_vm10, %v5779_v46, %v1018_v6  ;;  %v1024_v28 = vpop.permute.xlu1 %1023 }
 0x27a   :  { %1402 = vmatprep.subr.bf16.mxu1 %v1006_v40  ;;  %1360 = vmatpush1.bf16.msra.mxu0 %v1003_v41  ;;  %v1041_v51 = vmul.f32 %v5386_v54, %v1030_v2  ;;  %v1033_v37 = vsel %vm343_vm10, %v1024_v28, %v5773_v43  ;;  %v1044_v49 = vpack.c.bf16 %v1032_v42, %v1031_v52 }
 0x27b   :  { %1403 = vmatpush1.bf16.msra.mxu1 %v1005_v12  ;;  %v1027_v4 = vsel %vm343_vm10, %v5784_v48, %v1024_v28  ;;  %v1035_v43 = vmul.f32 %v5393_v56, %v1033_v37 }
 0x27c   :  { %v1026_v38 = vpop.permute.xlu0 %1025  ;;  %1361 = vmatprep.subr.bf16.mxu0 %v1044_v49  ;;  %v1045_v41 = vpack.c.bf16 %v1041_v51, %v1037_v39 }
 0x27d   :  { %v1028_v1 = vsel %vm343_vm10, %v5791_v13, %v1026_v38  ;;  %v1034_v3 = vsel %vm343_vm10, %v1026_v38, %v5779_v46  ;;  %v1056_v0 = vpop.permute.xlu1 %1055 }
 0x27e   :  { %v1039_v47 = vmul.f32 %v5393_v56, %v1034_v3  ;;  %v1046_v19 = vpack.c.bf16 %v1028_v1, %v1027_v4  ;;  %v1071_v48 = vsel %vm374_vm1, %v5793_v61, %v1056_v0  ;;  %v1069_v52 = vsel %vm374_vm1, %v1056_v0, %v5797_v55 }
 0x27f   :  { %v1076_v12 = vmul.f32 %v5437_v18, %v1071_v48  ;;  %v1077_v0 = vmul.f32 %v5443_v29, %v1069_v52 }
 0x280   :  { %v1043_v6 = vpack.c.bf16 %v1039_v47, %v1035_v43  ;;  %v1058_v40 = vpop.permute.xlu0 %1057  ;;  %1404 = vmatprep.subr.bf16.mxu1 %v1046_v19 }
 0x281   :  { %v1072_v13 = vsel %vm374_vm1, %v5795_v50, %v1058_v40  ;;  %1405 = vmatpush1.bf16.msra.mxu1 %v1045_v41  ;;  %v1064_v46 = vpop.permute.xlu1 %1063  ;;  %v1070_v2 = vsel %vm374_vm1, %v1058_v40, %v5799_v57 }
 0x282   :  { %v1080_v42 = vmul.f32 %v5437_v18, %v1072_v13  ;;  %1362 = vmatpush1.bf16.msra.mxu0 %v1043_v6  ;;  %v1067_v28 = vsel %vm374_vm1, %v5797_v55, %v1064_v46  ;;  %v1073_v27 = vsel %vm374_vm1, %v1064_v46, %v5793_v61  ;;  %v1081_v49 = vmul.f32 %v5443_v29, %v1070_v2 }
 0x283   :  { %v1075_v1 = vmul.f32 %v5440_v20, %v1073_v27  ;;  %v1078_v61 = vmul.f32 %v5448_v22, %v1067_v28 }
 0x284   :  { %v1066_v51 = vpop.permute.xlu0 %1065  ;;  %v1084_v37 = vpack.c.bf16 %v1080_v42, %v1076_v12 }
 0x285   :  { %v1068_v38 = vsel %vm374_vm1, %v5799_v57, %v1066_v51  ;;  %v1074_v39 = vsel %vm374_vm1, %v1066_v51, %v5795_v50  ;;  %v1096_v4 = vpop.permute.xlu1 %1095  ;;  %v1085_v50 = vpack.c.bf16 %v1081_v49, %v1077_v0 }
 0x286   :  { %v1079_v3 = vmul.f32 %v5440_v20, %v1074_v39  ;;  %v1082_v55 = vmul.f32 %v5448_v22, %v1068_v38  ;;  %1363 = vmatprep.subr.bf16.mxu0 %v1084_v37  ;;  %v1111_v57 = vsel %vm405_vm3, %v5801_v63, %v1096_v4  ;;  %v1109_v2 = vsel %vm405_vm3, %v1096_v4, %v5805_v7 }
 0x287   :  { %v1116_v6 = vmul.f32 %v5353_v30, %v1111_v57  ;;  %v1117_v39 = vmul.f32 %v5477_v59, %v1109_v2 }
 0x288   :  { %v1083_v43 = vpack.c.bf16 %v1079_v3, %v1075_v1  ;;  %v1098_v47 = vpop.permute.xlu0 %1097  ;;  %v1086_v19 = vpack.c.bf16 %v1082_v55, %v1078_v61 }
 0x289   :  { %v1112_v41 = vsel %vm405_vm3, %v5803_v5, %v1098_v47  ;;  %v1104_v48 = vpop.permute.xlu1 %1103  ;;  %v1110_v40 = vsel %vm405_vm3, %v1098_v47, %v5807_v9 }
 0x28a   :  { %v1120_v13 = vmul.f32 %v5353_v30, %v1112_v41  ;;  %1406 = vmatprep.subr.bf16.mxu1 %v1086_v19  ;;  %v1107_v46 = vsel %vm405_vm3, %v5805_v7, %v1104_v48  ;;  %v1113_v12 = vsel %vm405_vm3, %v1104_v48, %v5801_v63  ;;  %1364 = vmatpush1.bf16.msra.mxu0 %v1083_v43 }
 0x28b   :  { %1407 = vmatpush1.bf16.msra.mxu1 %v1085_v50  ;;  %v1121_v27 = vmul.f32 %v5477_v59, %v1110_v40  ;;  %v1115_v63 = vmul.f32 %v5472_v58, %v1113_v12  ;;  %v1118_v49 = vmul.f32 %v5358_v31, %v1107_v46 }
 0x28c   :  { %v1106_v42 = vpop.permute.xlu0 %1105  ;;  %v1124_v28 = vpack.c.bf16 %v1120_v13, %v1116_v6 }
 0x28d   :  { %v1108_v52 = vsel %vm405_vm3, %v5807_v9, %v1106_v42  ;;  %v1114_v51 = vsel %vm405_vm3, %v1106_v42, %v5803_v5  ;;  %v1140_v37 = vpop.permute.xlu1 %1139  ;;  %v1125_v5 = vpack.c.bf16 %v1121_v27, %v1117_v39 }
 0x28e   :  { %v1119_v38 = vmul.f32 %v5472_v58, %v1114_v51  ;;  %v1122_v7 = vmul.f32 %v5358_v31, %v1108_v52  ;;  %1365 = vmatprep.subr.bf16.mxu0 %v1124_v28  ;;  %v1153_v9 = vsel %vm444_vm2, %v1140_v37, %v5813_v26  ;;  %v1155_v50 = vsel %vm444_vm2, %v5809_v23, %v1140_v37 }
 0x28f   :  { %v1160_v0 = vmul.f32 %v5437_v18, %v1153_v9  ;;  %v1159_v12 = vmul.f32 %v5507_v44, %v1155_v50  ;;  %v8077_v50 = vld [vmem:[#allocation10_spill] sm:$0xff] }
 0x290   :  { %v1123_v4 = vpack.c.bf16 %v1119_v38, %v1115_v63  ;;  %v1142_v1 = vpop.permute.xlu0 %1141  ;;  %v1126_v61 = vpack.c.bf16 %v1122_v7, %v1118_v49 }
 0x291   :  { %v1154_v3 = vsel %vm444_vm2, %v1142_v1, %v5815_v14  ;;  %v1148_v55 = vpop.permute.xlu1 %1147  ;;  %v1156_v57 = vsel %vm444_vm2, %v5811_v11, %v1142_v1 }
 0x292   :  { %v1164_v43 = vmul.f32 %v5437_v18, %v1154_v3  ;;  %1408 = vmatprep.subr.bf16.mxu1 %v1126_v61  ;;  %v1151_v47 = vsel %vm444_vm2, %v5813_v26, %v1148_v55  ;;  %v1157_v19 = vsel %vm444_vm2, %v1148_v55, %v5809_v23  ;;  %1366 = vmatpush1.bf16.msra.mxu0 %v1123_v4 }
 0x293   :  { %1409 = vmatpush1.bf16.msra.mxu1 %v1125_v5  ;;  %1367 = vmatprep.subr.bf16.mxu0 %v5651_v62  ;;  %v1163_v6 = vmul.f32 %v5507_v44, %v1156_v57  ;;  %v1161_v46 = vmul.f32 %v5512_v45, %v1151_v47  ;;  %v1162_v23 = vmul.f32 %v5448_v22, %v1157_v19 }
 0x294   :  { %v1150_v41 = vpop.permute.xlu0 %1149  ;;  %1410 = vmatprep.subr.bf16.mxu1 %v5658_v16  ;;  %v1168_v48 = vpack.c.bf16 %v1164_v43, %v1160_v0 }
 0x295   :  { %v1152_v26 = vsel %vm444_vm2, %v5815_v14, %v1150_v41  ;;  %v1158_v40 = vsel %vm444_vm2, %v1150_v41, %v5811_v11  ;;  %v1180_v13 = vpop.permute.xlu1 %1179  ;;  %v1167_v27 = vpack.c.bf16 %v1163_v6, %v1159_v12  ;;  %v8078_v6 = vld [vmem:[#allocation9_spill] sm:$0xff]  ;;  %v8079_v12 = vld [vmem:[#allocation6_spill] sm:$0xff] }
 0x296   :  { %v1165_v62 = vmul.f32 %v5512_v45, %v1152_v26  ;;  %v1166_v16 = vmul.f32 %v5448_v22, %v1158_v40  ;;  %v1193_v2 = vsel %vm475_vm11, %v1180_v13, %v5821_v34  ;;  %v1195_v14 = vsel %vm475_vm11, %v5817_v25, %v1180_v13  ;;  %1368 = vmatpush1.bf16.msra.mxu0 %v5641_v35 }
 0x297   :  { %1411 = vmatpush1.bf16.msra.mxu1 %v5653_v60  ;;  %1369 = vmatprep.subr.bf16.mxu0 %v1168_v48  ;;  %v1199_v63 = vmul.f32 %v5472_v58, %v1195_v14  ;;  %v1200_v35 = vmul.f32 %v5548_v15, %v1193_v2 }
 0x298   :  { %v1169_v11 = vpack.c.bf16 %v1165_v62, %v1161_v46  ;;  %v1182_v42 = vpop.permute.xlu0 %1181  ;;  %v1170_v28 = vpack.c.bf16 %v1166_v16, %v1162_v23 }
 0x299   :  { %v1194_v52 = vsel %vm475_vm11, %v1182_v42, %v5823_v36  ;;  %v1196_v51 = vsel %vm475_vm11, %v5819_v17, %v1182_v42  ;;  %v1188_v37 = vpop.permute.xlu1 %1187  ;;  %v8080_v42 = vld [vmem:[#allocation13_spill] sm:$0xff] }
 0x29a   :  { %v1203_v60 = vmul.f32 %v5472_v58, %v1196_v51  ;;  %v1204_v49 = vmul.f32 %v5548_v15, %v1194_v52  ;;  %1412 = vmatprep.subr.bf16.mxu1 %v1170_v28  ;;  %v1191_v38 = vsel %vm475_vm11, %v5821_v34, %v1188_v37  ;;  %v1197_v7 = vsel %vm475_vm11, %v1188_v37, %v5817_v25 }
 0x29b   :  { %1370 = vmatpush1.bf16.msra.mxu0 %v1167_v27  ;;  %1413 = vmatpush1.bf16.msra.mxu1 %v1169_v11  ;;  %v1201_v34 = vmul.f32 %v5477_v59, %v1191_v38  ;;  %v1202_v3 = vmul.f32 %v5555_v24, %v1197_v7  ;;  %v8081_v27 = vld [vmem:[#allocation11_spill] sm:$0xff] }
 0x29c   :  { %v1207_v39 = vpack.c.bf16 %v1203_v60, %v1199_v63  ;;  %v1190_v9 = vpop.permute.xlu0 %1189  ;;  %v1208_v4 = vpack.c.bf16 %v1204_v49, %v1200_v35  ;;  %v8083_v49 = vld [vmem:[#allocation12_spill] sm:$0xff] }
 0x29d   :  { %v1192_v1 = vsel %vm475_vm11, %v5823_v36, %v1190_v9  ;;  %v1198_v61 = vsel %vm475_vm11, %v1190_v9, %v5819_v17  ;;  %v1220_v5 = vpop.permute.xlu1 %1219  ;;  %v8084_v9 = vld [vmem:[#allocation7_spill] sm:$0xff] }
 0x29e   :  { %v1205_v25 = vmul.f32 %v5477_v59, %v1192_v1  ;;  %v1206_v55 = vmul.f32 %v5555_v24, %v1198_v61  ;;  %1371 = vmatprep.subr.bf16.mxu0 %v1208_v4  ;;  %v1233_v0 = vsel %vm506_vm6, %v1220_v5, %v5829_v21  ;;  %v1235_v40 = vsel %vm506_vm6, %v8078_v6, %v1220_v5 }
 0x29f   :  { %1372 = vmatpush1.bf16.msra.mxu0 %v1207_v39  ;;  %v1240_v19 = vmul.f32 %v5580_v53, %v1233_v0 }
 0x2a0   :  { %v1209_v36 = vpack.c.bf16 %v1205_v25, %v1201_v34  ;;  %v1222_v57 = vpop.permute.xlu0 %1221  ;;  %v1210_v43 = vpack.c.bf16 %v1206_v55, %v1202_v3 }
 0x2a1   :  { %v1234_v17 = vsel %vm506_vm6, %v1222_v57, %v5831_v8  ;;  %v1228_v47 = vpop.permute.xlu1 %1227  ;;  %v1236_v41 = vsel %vm506_vm6, %v8077_v50, %v1222_v57  ;;  %v8085_v57 = vld [vmem:[#allocation8_spill] sm:$0xff] }
 0x2a2   :  { %v1244_v48 = vmul.f32 %v5580_v53, %v1234_v17  ;;  %1414 = vmatprep.subr.bf16.mxu1 %v1210_v43  ;;  %v1237_v26 = vsel %vm506_vm6, %v1228_v47, %v8078_v6  ;;  %v1247_v23 = vpack.c.bf16 %v1236_v41, %v1235_v40  ;;  %v1231_v51 = vsel %vm506_vm6, %v5829_v21, %v1228_v47 }
 0x2a3   :  { %1415 = vmatpush1.bf16.msra.mxu1 %v1209_v36  ;;  %v1242_v2 = vmul.f32 %v8079_v12, %v1237_v26 }
 0x2a4   :  { %v1230_v13 = vpop.permute.xlu0 %1229  ;;  %v1248_v46 = vpack.c.bf16 %v1244_v48, %v1240_v19  ;;  %v4793_v19 = vld [vmem:[%s7984_s1 + $0x10] ss:$8 sps:$4 sm:$0xff]   ;;  %v8086_v48 = vmov 0  }
 0x2a5   :  { %v1238_v62 = vsel %vm506_vm6, %v1230_v13, %v8077_v50  ;;  %v1260_v16 = vpop.permute.xlu1 %1259  ;;  %v1232_v14 = vsel %vm506_vm6, %v5831_v8, %v1230_v13  ;;  %v8082_v8 = vld [vmem:[#allocation14_spill] sm:$0xff] }
 0x2a6   :  { %v1246_v11 = vmul.f32 %v8079_v12, %v1238_v62  ;;  %1373 = vmatprep.subr.bf16.mxu0 %v1248_v46  ;;  %v1273_v28 = vsel %vm537_vm7, %v1260_v16, %v8080_v42  ;;  %v1275_v52 = vsel %vm537_vm7, %v8081_v27, %v1260_v16  ;;  %v1249_v35 = vpack.c.bf16 %v1232_v14, %v1231_v51 }
 0x2a7   :  { %1374 = vmatpush1.bf16.msra.mxu0 %v1247_v23  ;;  %v1279_v39 = vmul.f32 %v5507_v44, %v1275_v52  ;;  %v1280_v4 = vmul.f32 %v8084_v9, %v1273_v28 }
 0x2a8   :  { %v1262_v37 = vpop.permute.xlu0 %1261  ;;  %v1250_v63 = vpack.c.bf16 %v1246_v11, %v1242_v2 }
 0x2a9   :  { %v1274_v60 = vsel %vm537_vm7, %v1262_v37, %v8082_v8  ;;  %v1276_v38 = vsel %vm537_vm7, %v8083_v49, %v1262_v37  ;;  %v1268_v7 = vpop.permute.xlu1 %1267 }
 0x2aa   :  { %v1283_v1 = vmul.f32 %v5507_v44, %v1276_v38  ;;  %v1284_v21 = vmul.f32 %v8084_v9, %v1274_v60  ;;  %1416 = vmatprep.subr.bf16.mxu1 %v1250_v63  ;;  %v1271_v61 = vsel %vm537_vm7, %v8080_v42, %v1268_v7  ;;  %v1277_v5 = vsel %vm537_vm7, %v1268_v7, %v8081_v27 }
 0x2ab   :  { %1417 = vmatpush1.bf16.msra.mxu1 %v1249_v35  ;;  %v1281_v36 = vmul.f32 %v5512_v45, %v1271_v61  ;;  %v1282_v43 = vmul.f32 %v8085_v57, %v1277_v5 }
 0x2ac   :  { %v1287_v34 = vpack.c.bf16 %v1283_v1, %v1279_v39  ;;  %v1270_v3 = vpop.permute.xlu0 %1269  ;;  %v1288_v25 = vpack.c.bf16 %v1284_v21, %v1280_v4 }
 0x2ad   :  { %v1272_v55 = vsel %vm537_vm7, %v8082_v8, %v1270_v3  ;;  %v1278_v0 = vsel %vm537_vm7, %v1270_v3, %v8083_v49 }
 0x2ae   :  { %v1285_v17 = vmul.f32 %v5512_v45, %v1272_v55  ;;  %v1286_v47 = vmul.f32 %v8085_v57, %v1278_v0  ;;  %1375 = vmatprep.subr.bf16.mxu0 %v1288_v25 }
 0x2af   :  { %1376 = vmatpush1.bf16.msra.mxu0 %v1287_v34 }
 0x2b0   :  { %v1289_v50 = vpack.c.bf16 %v1285_v17, %v1281_v36  ;;  %v1290_v41 = vpack.c.bf16 %v1286_v47, %v1282_v43 }
 0x2b2   :  { %1392 = vmatmul.mubr.bf16.vlgmr.msra.gmra.mrb[8].mxu0 %v4793_v19  ;;  %1418 = vmatprep.subr.bf16.mxu1 %v1290_v41 }
 0x2b3   :  { %1419 = vmatpush1.bf16.msra.mxu1 %v1289_v50  ;;  %1548 = vmatprep.mubr.bf16.mxu0 %v8086_v48 }
 0x2b6   :  { %1435 = vmatmul.mubr.bf16.vlgmr.msra.gmra.mrb[8].mxu1 %v4793_v19 }
 0x2b7   :  { %1591 = vmatprep.mubr.bf16.mxu1 %v8086_v48 }
 0x2ba   :  { %v1340_v6 = vpop.permute.xlu1 %1339 }
 0x2bd   :  { %v1345_v46 = vpop.permute.xlu0 %1344 }
 0x385   :  { %v1393_v26 = vpop.f32.mrb[8].mxu0 }
 0x386   :  { %v1394_v40 = vadd.f32 %v1393_v26, %v1340_v6  ;;  %v1395_v13 = vpop.f32.mrb[9].mxu0 }
 0x387   :  { %v1396_v23 = vadd.f32 %v1395_v13, %v1340_v6  ;;  %v1397_v62 = vpop.f32.mrb[10].mxu0 }
 0x388   :  { %v4596_v16 = vmul.f32 -1.442695, %v1394_v40  ;;  %v1398_v2 = vadd.f32 %v1397_v62, %v1345_v46  ;;  %v1399_v14 = vpop.f32.mrb[11].mxu0 }
 0x389   :  { %v4597_v11 = vmul.f32 -1.442695, %v1396_v23  ;;  %v1400_v42 = vadd.f32 %v1399_v14, %v1345_v46  ;;  %v1436_v28 = vpop.f32.mrb[8].mxu1 }
 0x38a   :  { %4845 = vpow2.f32 %v4596_v16  ;;  %v4600_v27 = vmul.f32 -1.442695, %v1398_v2  ;;  %v1437_v52 = vadd.f32 %v1436_v28, %v1340_v6  ;;  %v1438_v51 = vpop.f32.mrb[9].mxu1 }
 0x38b   :  { %4847 = vpow2.f32 %v4597_v11  ;;  %v4601_v37 = vmul.f32 -1.442695, %v1400_v42  ;;  %v1439_v63 = vadd.f32 %v1438_v51, %v1340_v6  ;;  %v1440_v35 = vpop.f32.mrb[10].mxu1 }
 0x38c   :  { %4849 = vpow2.f32 %v4600_v27  ;;  %v4598_v8 = vmul.f32 -1.442695, %v1437_v52  ;;  %v1441_v60 = vadd.f32 %v1440_v35, %v1345_v46  ;;  %v1442_v49 = vpop.f32.mrb[11].mxu1 }
 0x38d   :  { %4851 = vpow2.f32 %v4601_v37  ;;  %v4599_v38 = vmul.f32 -1.442695, %v1439_v63  ;;  %v1443_v7 = vadd.f32 %v1442_v49, %v1345_v46 }
 0x38e   :  { %4853 = vpow2.f32 %v4598_v8  ;;  %v4602_v39 = vmul.f32 -1.442695, %v1441_v60 }
 0x38f   :  { %4855 = vpow2.f32 %v4599_v38  ;;  %v4603_v4 = vmul.f32 -1.442695, %v1443_v7 }
 0x390   :  { %4857 = vpow2.f32 %v4602_v39 }
 0x391   :  { %4859 = vpow2.f32 %v4603_v4 }
 0x394   :  { %v4846_v1 = vpop.eup %4845 }
 0x395   :  { %v4848_v21 = vpop.eup %4847  ;;  %v1469_v61 = vadd.f32 1.0, %v4846_v1 }
 0x396   :  { %v4850_v5 = vpop.eup %4849  ;;  %v1470_v34 = vadd.f32 1.0, %v4848_v21 }
 0x397   :  { %v4852_v3 = vpop.eup %4851  ;;  %4861 = vrcp.f32 %v1469_v61  ;;  %v1473_v25 = vadd.f32 1.0, %v4850_v5  ;;  %v4611_v61 = vld [vmem:[%s7985_s2 + $0x20] sm:$0xff] }
 0x398   :  { %v4854_v55 = vpop.eup %4853  ;;  %4863 = vrcp.f32 %v1470_v34  ;;  %v1474_v0 = vadd.f32 1.0, %v4852_v3  ;;  %v4612_v34 = vld [vmem:[%s7985_s2 + $0x28] sm:$0xff] }
 0x399   :  { %v4856_v36 = vpop.eup %4855  ;;  %4865 = vrcp.f32 %v1473_v25  ;;  %v1471_v43 = vadd.f32 1.0, %v4854_v55 }
 0x39a   :  { %v4858_v17 = vpop.eup %4857  ;;  %4867 = vrcp.f32 %v1474_v0  ;;  %v1472_v47 = vadd.f32 1.0, %v4856_v36 }
 0x39b   :  { %v4860_v19 = vpop.eup %4859  ;;  %4869 = vrcp.f32 %v1471_v43  ;;  %v1475_v50 = vadd.f32 1.0, %v4858_v17 }
 0x39c   :  { %4871 = vrcp.f32 %v1472_v47  ;;  %v1476_v41 = vadd.f32 1.0, %v4860_v19 }
 0x39d   :  { %4873 = vrcp.f32 %v1475_v50 }
 0x39e   :  { %4875 = vrcp.f32 %v1476_v41 }
 0x3a1   :  { %v4862_v6 = vpop.eup %4861 }
 0x3a2   :  { %v4864_v26 = vpop.eup %4863  ;;  %v1493_v13 = vmul.f32 %v4862_v6, %v1394_v40 }
 0x3a3   :  { %v4866_v46 = vpop.eup %4865  ;;  %v6091_v11 = vmul.f32 %v4864_v26, %v1396_v23 }
 0x3a4   :  { %v4868_v62 = vpop.eup %4867  ;;  %v1497_v16 = vmul.f32 %v4866_v46, %v1398_v2  ;;  %1610 = vrot.lane.b32.xlu1 %v1493_v13, %s5125_s9 }
 0x3a5   :  { %v4870_v14 = vpop.eup %4869  ;;  %v6093_v28 = vmul.f32 %v4868_v62, %v1400_v42 }
 0x3a6   :  { %v4872_v27 = vpop.eup %4871  ;;  %v1495_v51 = vmul.f32 %v4870_v14, %v1437_v52  ;;  %1612 = vrot.lane.b32.xlu0 %v1497_v16, %s5125_s9  ;;  %v6096_v37 = vpack.c.bf16 %v1497_v16, %v1493_v13 }
 0x3a7   :  { %v4874_v35 = vpop.eup %4873  ;;  %v6100_v40 = vpack.c.bf16 %v6093_v28, %v6091_v11  ;;  %v6103_v49 = vmul.f32 %v4872_v27, %v1439_v63  ;;  %v4794_v63 = vld [vmem:[%s7987_s4 + $0x8] sm:$0xff]  }
 0x3a8   :  { %v4876_v8 = vpop.eup %4875  ;;  %v1499_v2 = vmul.f32 %v4874_v35, %v1441_v60  ;;  %1618 = vrot.lane.b32.xlu1 %v1495_v51, %s5125_s9 }
 0x3a9   :  { %v6105_v23 = vmul.f32 %v4876_v8, %v1443_v7  ;;  %1516 = vmatprep.subr.bf16.mxu0 %v6100_v40  ;;  %v4795_v7 = vld [vmem:[%s7984_s1 + $0x24] ss:$8 sps:$4 sm:$0xff]  }
 0x3aa   :  { %1620 = vrot.lane.b32.xlu0 %v1499_v2, %s5125_s9  ;;  %1517 = vmatpush1.bf16.msra.mxu0 %v6096_v37  ;;  %v6110_v42 = vpack.c.bf16 %v1499_v2, %v1495_v51 }
 0x3ab   :  { %v6114_v52 = vpack.c.bf16 %v6105_v23, %v6103_v49 }
 0x3ac   :  { %1650 = vrot.lane.b32.xlu1 %v1493_v13, %s5126_s14 }
 0x3ad   :  { %1559 = vmatprep.subr.bf16.mxu1 %v6114_v52  ;;  %4607 = vmatmul.mubr.msk.bf16.vlgmr.msra.gmra.mrb[4].mxu0 %vm617_vm0, %v4794_v63 }
 0x3ae   :  { %1560 = vmatpush1.bf16.msra.mxu1 %v6110_v42  ;;  %1652 = vrot.lane.b32.xlu0 %v1497_v16, %s5126_s14 }
 0x3af   :  { %4615 = vmatprep.mubr.msk.bf16.mxu0 %vm617_vm0, %v4795_v7 }
 0x3b0   :  { %1658 = vrot.lane.b32.xlu1 %v1495_v51, %s5126_s14 }
 0x3b1   :  { %4608 = vmatmul.mubr.msk.bf16.vlgmr.msra.gmra.mrb[4].mxu1 %vm617_vm0, %v4794_v63 }
 0x3b2   :  { %1660 = vrot.lane.b32.xlu0 %v1499_v2, %s5126_s14  ;;  %4616 = vmatprep.mubr.msk.bf16.mxu1 %vm617_vm0, %v4795_v7 }
 0x3b4   :  { %1690 = vrot.lane.b32.xlu1 %v1493_v13, %s5128_s0 }
 0x3b6   :  { %1692 = vrot.lane.b32.xlu0 %v1497_v16, %s5128_s0 }
 0x3b8   :  { %1698 = vrot.lane.b32.xlu1 %v1495_v51, %s5128_s0 }
 0x3ba   :  { %1700 = vrot.lane.b32.xlu0 %v1499_v2, %s5128_s0 }
 0x3bc   :  { %1730 = vrot.lane.b32.xlu1 %v1493_v13, %s5129_s15 }
 0x3be   :  { %1732 = vrot.lane.b32.xlu0 %v1497_v16, %s5129_s15 }
 0x3c0   :  { %1738 = vrot.lane.b32.xlu1 %v1495_v51, %s5129_s15 }
 0x3c2   :  { %1740 = vrot.lane.b32.xlu0 %v1499_v2, %s5129_s15 }
 0x3c4   :  { %1774 = vrot.lane.b32.xlu1 %v1493_v13, %s5130_s16 }
 0x3c6   :  { %1776 = vrot.lane.b32.xlu0 %v1497_v16, %s5130_s16 }
 0x3c8   :  { %1782 = vrot.lane.b32.xlu1 %v1495_v51, %s5130_s16 }
 0x3ca   :  { %1784 = vrot.lane.b32.xlu0 %v1499_v2, %s5130_s16 }
 0x3cc   :  { %1814 = vrot.lane.b32.xlu1 %v1493_v13, %s5131_s17 }
 0x3ce   :  { %1816 = vrot.lane.b32.xlu0 %v1497_v16, %s5131_s17 }
 0x3d0   :  { %1822 = vrot.lane.b32.xlu1 %v1495_v51, %s5131_s17 }
 0x3d2   :  { %1824 = vrot.lane.b32.xlu0 %v1499_v2, %s5131_s17 }
 0x3d4   :  { %1854 = vrot.lane.b32.xlu1 %v1493_v13, %s5132_s18 }
 0x3d6   :  { %1856 = vrot.lane.b32.xlu0 %v1497_v16, %s5132_s18 }
 0x3d8   :  { %1862 = vrot.lane.b32.xlu1 %v1495_v51, %s5132_s18 }
 0x3da   :  { %1864 = vrot.lane.b32.xlu0 %v1499_v2, %s5132_s18 }
 0x3dc   :  { %1894 = vrot.lane.b32.xlu1 %v1493_v13, %s5133_s19 }
 0x3de   :  { %1896 = vrot.lane.b32.xlu0 %v1497_v16, %s5133_s19 }
 0x3e0   :  { %1902 = vrot.lane.b32.xlu1 %v1495_v51, %s5133_s19 }
 0x3e2   :  { %1904 = vrot.lane.b32.xlu0 %v1499_v2, %s5133_s19 }
 0x3e4   :  { %1614 = vrot.lane.b32.xlu1 %v6091_v11, %s5125_s9 }
 0x3e6   :  { %1616 = vrot.lane.b32.xlu0 %v6093_v28, %s5125_s9 }
 0x3e8   :  { %1622 = vrot.lane.b32.xlu1 %v6103_v49, %s5125_s9 }
 0x3ea   :  { %1624 = vrot.lane.b32.xlu0 %v6105_v23, %s5125_s9 }
 0x3ec   :  { %1654 = vrot.lane.b32.xlu1 %v6091_v11, %s5126_s14 }
 0x3ee   :  { %1656 = vrot.lane.b32.xlu0 %v6093_v28, %s5126_s14 }
 0x3f0   :  { %1662 = vrot.lane.b32.xlu1 %v6103_v49, %s5126_s14 }
 0x3f2   :  { %1664 = vrot.lane.b32.xlu0 %v6105_v23, %s5126_s14 }
 0x3f4   :  { %1694 = vrot.lane.b32.xlu1 %v6091_v11, %s5128_s0 }
 0x3f6   :  { %1696 = vrot.lane.b32.xlu0 %v6093_v28, %s5128_s0 }
 0x3f8   :  { %1702 = vrot.lane.b32.xlu1 %v6103_v49, %s5128_s0 }
 0x3fa   :  { %1704 = vrot.lane.b32.xlu0 %v6105_v23, %s5128_s0 }
 0x3fc   :  { %1734 = vrot.lane.b32.xlu1 %v6091_v11, %s5129_s15 }
 0x3fe   :  { %1736 = vrot.lane.b32.xlu0 %v6093_v28, %s5129_s15 }
 0x400   :  { %1742 = vrot.lane.b32.xlu1 %v6103_v49, %s5129_s15 }
 0x402   :  { %1744 = vrot.lane.b32.xlu0 %v6105_v23, %s5129_s15 }
 0x404   :  { %1778 = vrot.lane.b32.xlu1 %v6091_v11, %s5130_s16 }
 0x406   :  { %1780 = vrot.lane.b32.xlu0 %v6093_v28, %s5130_s16 }
 0x408   :  { %1786 = vrot.lane.b32.xlu1 %v6103_v49, %s5130_s16 }
 0x40a   :  { %1788 = vrot.lane.b32.xlu0 %v6105_v23, %s5130_s16 }
 0x40c   :  { %1818 = vrot.lane.b32.xlu1 %v6091_v11, %s5131_s17 }
 0x40e   :  { %1820 = vrot.lane.b32.xlu0 %v6093_v28, %s5131_s17 }
 0x410   :  { %1826 = vrot.lane.b32.xlu1 %v6103_v49, %s5131_s17 }
 0x412   :  { %1828 = vrot.lane.b32.xlu0 %v6105_v23, %s5131_s17 }
 0x414   :  { %1858 = vrot.lane.b32.xlu1 %v6091_v11, %s5132_s18 }
 0x416   :  { %1860 = vrot.lane.b32.xlu0 %v6093_v28, %s5132_s18  ;;  %v1611_v60 = vpop.permute.xlu1 %1610 }
 0x418   :  { %v1613_v38 = vpop.permute.xlu0 %1612  ;;  %1866 = vrot.lane.b32.xlu1 %v6103_v49, %s5132_s18 }
 0x41a   :  { %1868 = vrot.lane.b32.xlu0 %v6105_v23, %s5132_s18  ;;  %v1619_v39 = vpop.permute.xlu1 %1618 }
 0x41c   :  { %v1621_v4 = vpop.permute.xlu0 %1620  ;;  %1898 = vrot.lane.b32.xlu1 %v6091_v11, %s5133_s19 }
 0x41e   :  { %1900 = vrot.lane.b32.xlu0 %v6093_v28, %s5133_s19  ;;  %v6216_v1 = vpop.permute.xlu1 %1650 }
 0x420   :  { %v6218_v21 = vpop.permute.xlu0 %1652  ;;  %1906 = vrot.lane.b32.xlu1 %v6103_v49, %s5133_s19 }
 0x422   :  { %1908 = vrot.lane.b32.xlu0 %v6105_v23, %s5133_s19  ;;  %v6227_v5 = vpop.permute.xlu1 %1658 }
 0x424   :  { %v6232_v3 = vpop.permute.xlu0 %1660  ;;  %1978 = vperm.xlu1 %4785, %v4611_v61  }
 0x426   :  { %1983 = vperm.xlu0 %4784, %v4612_v34   ;;  %v6234_v25 = vpop.permute.xlu1 %1690 }
 0x428   :  { %v6236_v55 = vpop.permute.xlu0 %1692 }
 0x42a   :  { %v6238_v0 = vpop.permute.xlu1 %1698 }
 0x42c   :  { %v6240_v36 = vpop.permute.xlu0 %1700 }
 0x42e   :  { %v6242_v43 = vpop.permute.xlu1 %1730 }
 0x430   :  { %v6244_v17 = vpop.permute.xlu0 %1732 }
 0x432   :  { %v6246_v47 = vpop.permute.xlu1 %1738 }
 0x434   :  { %v6248_v19 = vpop.permute.xlu0 %1740 }
 0x436   :  { %v6250_v50 = vpop.permute.xlu1 %1774 }
 0x438   :  { %v6252_v41 = vpop.permute.xlu0 %1776 }
 0x43a   :  { %v6254_v6 = vpop.permute.xlu1 %1782 }
 0x43c   :  { %v6256_v26 = vpop.permute.xlu0 %1784 }
 0x43e   :  { %v6258_v13 = vpop.permute.xlu1 %1814 }
 0x440   :  { %v6260_v46 = vpop.permute.xlu0 %1816 }
 0x442   :  { %v6262_v62 = vpop.permute.xlu1 %1822 }
 0x444   :  { %v6264_v16 = vpop.permute.xlu0 %1824 }
 0x446   :  { %v6266_v14 = vpop.permute.xlu1 %1854 }
 0x447   :  { %8087 = vst [vmem:[#allocation10_spill] sm:$0xff] %v6266_v14 }
 0x448   :  { %v6268_v11 = vpop.permute.xlu0 %1856 }
 0x449   :  { %8088 = vst [vmem:[#allocation9_spill] sm:$0xff] %v6268_v11 }
 0x44a   :  { %v6270_v28 = vpop.permute.xlu1 %1862 }
 0x44c   :  { %v6272_v27 = vpop.permute.xlu0 %1864 }
 0x44e   :  { %v6274_v51 = vpop.permute.xlu1 %1894 }
 0x44f   :  { %8089 = vst [vmem:[#allocation13_spill] sm:$0xff] %v6274_v51 }
 0x450   :  { %v6276_v35 = vpop.permute.xlu0 %1896 }
 0x451   :  { %8090 = vst [vmem:[#allocation11_spill] sm:$0xff] %v6276_v35 }
 0x452   :  { %v6278_v8 = vpop.permute.xlu1 %1902 }
 0x453   :  { %8091 = vst [vmem:[#allocation14_spill] sm:$0xff] %v6278_v8 }
 0x454   :  { %v6280_v2 = vpop.permute.xlu0 %1904 }
 0x455   :  { %8092 = vst [vmem:[#allocation12_spill] sm:$0xff] %v6280_v2 }
 0x456   :  { %v1615_v49 = vpop.permute.xlu1 %1614 }
 0x457   :  { %v1630_v23 = vsel %vm312_vm9, %v1611_v60, %v1615_v49  ;;  %v1628_v2 = vsel %vm312_vm9, %v1615_v49, %v1619_v39 }
 0x458   :  { %v1617_v63 = vpop.permute.xlu0 %1616  ;;  %v1635_v61 = vmul.f32 %v5353_v30, %v1630_v23 }
 0x459   :  { %v1631_v7 = vsel %vm312_vm9, %v1613_v38, %v1617_v63  ;;  %v1629_v34 = vsel %vm312_vm9, %v1617_v63, %v1621_v4 }
 0x45a   :  { %v1639_v48 = vmul.f32 %v5353_v30, %v1631_v7  ;;  %v1623_v57 = vpop.permute.xlu1 %1622  ;;  %v1640_v12 = vmul.f32 %v5364_v33, %v1629_v34 }
 0x45b   :  { %v1626_v9 = vsel %vm312_vm9, %v1619_v39, %v1623_v57  ;;  %v1632_v35 = vsel %vm312_vm9, %v1623_v57, %v1611_v60 }
 0x45c   :  { %v1625_v51 = vpop.permute.xlu0 %1624  ;;  %v1643_v8 = vpack.c.bf16 %v1639_v48, %v1635_v61  ;;  %v1634_v7 = vmul.f32 %v5361_v32, %v1632_v35  ;;  %v1637_v14 = vmul.f32 %v5358_v31, %v1626_v9  ;;  %v1636_v48 = vmul.f32 %v5364_v33, %v1628_v2 }
 0x45d   :  { %v1627_v23 = vsel %vm312_vm9, %v1621_v4, %v1625_v51  ;;  %v1633_v63 = vsel %vm312_vm9, %v1625_v51, %v1613_v38 }
 0x45e   :  { %v1638_v11 = vmul.f32 %v5361_v32, %v1633_v63  ;;  %v1641_v57 = vmul.f32 %v5358_v31, %v1627_v23  ;;  %v1655_v60 = vpop.permute.xlu1 %1654  ;;  %1998 = vmatprep.subr.bf16.mxu0 %v1643_v8  ;;  %v1644_v34 = vpack.c.bf16 %v1640_v12, %v1636_v48 }
 0x45f   :  { %v1670_v38 = vsel %vm343_vm10, %v6216_v1, %v1655_v60  ;;  %v1668_v51 = vsel %vm343_vm10, %v1655_v60, %v6227_v5 }
 0x460   :  { %v1642_v39 = vpack.c.bf16 %v1638_v11, %v1634_v7  ;;  %v1657_v49 = vpop.permute.xlu0 %1656  ;;  %v1645_v61 = vpack.c.bf16 %v1641_v57, %v1637_v14  ;;  %v1676_v2 = vmul.f32 %v5386_v54, %v1668_v51 }
 0x461   :  { %v1669_v9 = vsel %vm343_vm10, %v1657_v49, %v6232_v3  ;;  %v1671_v4 = vsel %vm343_vm10, %v6218_v21, %v1657_v49 }
 0x462   :  { %2041 = vmatprep.subr.bf16.mxu1 %v1645_v61  ;;  %v1663_v11 = vpop.permute.xlu1 %1662  ;;  %1999 = vmatpush1.bf16.msra.mxu0 %v1642_v39  ;;  %v1683_v12 = vpack.c.bf16 %v1671_v4, %v1670_v38  ;;  %v1680_v14 = vmul.f32 %v5386_v54, %v1669_v9 }
 0x463   :  { %v1672_v35 = vsel %vm343_vm10, %v1663_v11, %v6216_v1  ;;  %2042 = vmatpush1.bf16.msra.mxu1 %v1644_v34  ;;  %v1666_v23 = vsel %vm343_vm10, %v6227_v5, %v1663_v11 }
 0x464   :  { %v1665_v8 = vpop.permute.xlu0 %1664  ;;  %2000 = vmatprep.subr.bf16.mxu0 %v1683_v12  ;;  %v1674_v57 = vmul.f32 %v5393_v56, %v1672_v35  ;;  %v1684_v39 = vpack.c.bf16 %v1680_v14, %v1676_v2 }
 0x465   :  { %v1667_v63 = vsel %vm343_vm10, %v6232_v3, %v1665_v8  ;;  %v1673_v7 = vsel %vm343_vm10, %v1665_v8, %v6218_v21 }
 0x466   :  { %v1678_v1 = vmul.f32 %v5393_v56, %v1673_v7  ;;  %v1695_v60 = vpop.permute.xlu1 %1694  ;;  %v1685_v48 = vpack.c.bf16 %v1667_v63, %v1666_v23 }
 0x467   :  { %v1710_v49 = vsel %vm374_vm1, %v6234_v25, %v1695_v60  ;;  %v1708_v11 = vsel %vm374_vm1, %v1695_v60, %v6238_v0 }
 0x468   :  { %v1682_v5 = vpack.c.bf16 %v1678_v1, %v1674_v57  ;;  %v1697_v61 = vpop.permute.xlu0 %1696  ;;  %2043 = vmatprep.subr.bf16.mxu1 %v1685_v48  ;;  %v1715_v21 = vmul.f32 %v5437_v18, %v1710_v49  ;;  %v1716_v57 = vmul.f32 %v5443_v29, %v1708_v11 }
 0x469   :  { %v1711_v3 = vsel %vm374_vm1, %v6236_v55, %v1697_v61  ;;  %2044 = vmatpush1.bf16.msra.mxu1 %v1684_v39  ;;  %v1709_v34 = vsel %vm374_vm1, %v1697_v61, %v6240_v36 }
 0x46a   :  { %v1719_v38 = vmul.f32 %v5437_v18, %v1711_v3  ;;  %v1703_v9 = vpop.permute.xlu1 %1702  ;;  %2001 = vmatpush1.bf16.msra.mxu0 %v1682_v5  ;;  %v1720_v35 = vmul.f32 %v5443_v29, %v1709_v34 }
 0x46b   :  { %v1706_v4 = vsel %vm374_vm1, %v6238_v0, %v1703_v9  ;;  %v1712_v51 = vsel %vm374_vm1, %v1703_v9, %v6234_v25 }
 0x46c   :  { %v1705_v12 = vpop.permute.xlu0 %1704  ;;  %v1723_v14 = vpack.c.bf16 %v1719_v38, %v1715_v21  ;;  %v1714_v23 = vmul.f32 %v5440_v20, %v1712_v51  ;;  %v1717_v25 = vmul.f32 %v5448_v22, %v1706_v4 }
 0x46d   :  { %v1707_v8 = vsel %vm374_vm1, %v6240_v36, %v1705_v12  ;;  %v1713_v2 = vsel %vm374_vm1, %v1705_v12, %v6236_v55  ;;  %v1724_v55 = vpack.c.bf16 %v1720_v35, %v1716_v57 }
 0x46e   :  { %v1718_v63 = vmul.f32 %v5440_v20, %v1713_v2  ;;  %v1721_v0 = vmul.f32 %v5448_v22, %v1707_v8  ;;  %v1735_v7 = vpop.permute.xlu1 %1734  ;;  %2002 = vmatprep.subr.bf16.mxu0 %v1723_v14 }
 0x46f   :  { %v1750_v36 = vsel %vm405_vm3, %v6242_v43, %v1735_v7  ;;  %v1748_v38 = vsel %vm405_vm3, %v1735_v7, %v6246_v47 }
 0x470   :  { %v1722_v1 = vpack.c.bf16 %v1718_v63, %v1714_v23  ;;  %v1737_v60 = vpop.permute.xlu0 %1736  ;;  %v1725_v48 = vpack.c.bf16 %v1721_v0, %v1717_v25  ;;  %v1755_v49 = vmul.f32 %v5353_v30, %v1750_v36  ;;  %v1756_v2 = vmul.f32 %v5477_v59, %v1748_v38 }
 0x471   :  { %v1751_v39 = vsel %vm405_vm3, %v6244_v17, %v1737_v60  ;;  %v1749_v5 = vsel %vm405_vm3, %v1737_v60, %v6248_v19 }
 0x472   :  { %v1759_v61 = vmul.f32 %v5353_v30, %v1751_v39  ;;  %2045 = vmatprep.subr.bf16.mxu1 %v1725_v48  ;;  %v1743_v3 = vpop.permute.xlu1 %1742  ;;  %2003 = vmatpush1.bf16.msra.mxu0 %v1722_v1  ;;  %v1760_v51 = vmul.f32 %v5477_v59, %v1749_v5 }
 0x473   :  { %v1746_v21 = vsel %vm405_vm3, %v6246_v47, %v1743_v3  ;;  %v1752_v34 = vsel %vm405_vm3, %v1743_v3, %v6242_v43  ;;  %2046 = vmatpush1.bf16.msra.mxu1 %v1724_v55 }
 0x474   :  { %v1745_v9 = vpop.permute.xlu0 %1744  ;;  %v1763_v4 = vpack.c.bf16 %v1759_v61, %v1755_v49  ;;  %v1754_v14 = vmul.f32 %v5472_v58, %v1752_v34  ;;  %v1757_v43 = vmul.f32 %v5358_v31, %v1746_v21 }
 0x475   :  { %v1747_v11 = vsel %vm405_vm3, %v6248_v19, %v1745_v9  ;;  %v1753_v12 = vsel %vm405_vm3, %v1745_v9, %v6244_v17  ;;  %v1764_v17 = vpack.c.bf16 %v1760_v51, %v1756_v2 }
 0x476   :  { %v1758_v35 = vmul.f32 %v5472_v58, %v1753_v12  ;;  %v1761_v47 = vmul.f32 %v5358_v31, %v1747_v11  ;;  %v1779_v8 = vpop.permute.xlu1 %1778  ;;  %2004 = vmatprep.subr.bf16.mxu0 %v1763_v4 }
 0x477   :  { %v1792_v19 = vsel %vm444_vm2, %v1779_v8, %v6254_v6  ;;  %v1794_v57 = vsel %vm444_vm2, %v6250_v50, %v1779_v8 }
 0x478   :  { %v1762_v23 = vpack.c.bf16 %v1758_v35, %v1754_v14  ;;  %v1781_v25 = vpop.permute.xlu0 %1780  ;;  %v1765_v63 = vpack.c.bf16 %v1761_v47, %v1757_v43  ;;  %v1799_v36 = vmul.f32 %v5437_v18, %v1792_v19  ;;  %v1798_v61 = vmul.f32 %v5507_v44, %v1794_v57 }
 0x479   :  { %v1793_v0 = vsel %vm444_vm2, %v1781_v25, %v6256_v26  ;;  %v1795_v7 = vsel %vm444_vm2, %v6252_v41, %v1781_v25 }
 0x47a   :  { %v1803_v1 = vmul.f32 %v5437_v18, %v1793_v0  ;;  %2047 = vmatprep.subr.bf16.mxu1 %v1765_v63  ;;  %v1787_v60 = vpop.permute.xlu1 %1786  ;;  %2005 = vmatpush1.bf16.msra.mxu0 %v1762_v23  ;;  %v1802_v39 = vmul.f32 %v5507_v44, %v1795_v7 }
 0x47b   :  { %v1790_v48 = vsel %vm444_vm2, %v6254_v6, %v1787_v60  ;;  %v1796_v55 = vsel %vm444_vm2, %v1787_v60, %v6250_v50  ;;  %2006 = vmatprep.subr.bf16.mxu0 %v6100_v40  ;;  %2048 = vmatpush1.bf16.msra.mxu1 %v1764_v17 }
 0x47c   :  { %v1789_v49 = vpop.permute.xlu0 %1788  ;;  %2049 = vmatprep.subr.bf16.mxu1 %v6114_v52  ;;  %v1807_v5 = vpack.c.bf16 %v1803_v1, %v1799_v36  ;;  %v1800_v50 = vmul.f32 %v5512_v45, %v1790_v48  ;;  %v1801_v40 = vmul.f32 %v5448_v22, %v1796_v55  ;;  %v8093_v48 = vld [vmem:[#allocation9_spill] sm:$0xff] }
 0x47d   :  { %v1791_v3 = vsel %vm444_vm2, %v6256_v26, %v1789_v49  ;;  %v1797_v6 = vsel %vm444_vm2, %v1789_v49, %v6252_v41  ;;  %v1806_v41 = vpack.c.bf16 %v1802_v39, %v1798_v61 }
 0x47e   :  { %v1804_v21 = vmul.f32 %v5512_v45, %v1791_v3  ;;  %v1805_v34 = vmul.f32 %v5448_v22, %v1797_v6  ;;  %v1819_v52 = vpop.permute.xlu1 %1818  ;;  %2007 = vmatpush1.bf16.msra.mxu0 %v6096_v37 }
 0x47f   :  { %v1832_v38 = vsel %vm475_vm11, %v1819_v52, %v6262_v62  ;;  %v1834_v26 = vsel %vm475_vm11, %v6258_v13, %v1819_v52  ;;  %2008 = vmatprep.subr.bf16.mxu0 %v1807_v5  ;;  %2050 = vmatpush1.bf16.msra.mxu1 %v6110_v42  ;;  %v8094_v5 = vld [vmem:[#allocation10_spill] sm:$0xff] }
 0x480   :  { %v1808_v9 = vpack.c.bf16 %v1804_v21, %v1800_v50  ;;  %v1821_v4 = vpop.permute.xlu0 %1820  ;;  %v1809_v51 = vpack.c.bf16 %v1805_v34, %v1801_v40  ;;  %v1838_v11 = vmul.f32 %v5472_v58, %v1834_v26  ;;  %v1839_v14 = vmul.f32 %v5548_v15, %v1832_v38  ;;  %v8095_v34 = vld [vmem:[#allocation6_spill] sm:$0xff] }
 0x481   :  { %v1833_v37 = vsel %vm475_vm11, %v1821_v4, %v6264_v16  ;;  %v1835_v12 = vsel %vm475_vm11, %v6260_v46, %v1821_v4 }
 0x482   :  { %v1842_v43 = vmul.f32 %v5472_v58, %v1835_v12  ;;  %v1843_v42 = vmul.f32 %v5548_v15, %v1833_v37  ;;  %2051 = vmatprep.subr.bf16.mxu1 %v1809_v51  ;;  %v1827_v35 = vpop.permute.xlu1 %1826  ;;  %2009 = vmatpush1.bf16.msra.mxu0 %v1806_v41  ;;  %v8097_v51 = vld [vmem:[#allocation13_spill] sm:$0xff] }
 0x483   :  { %v1830_v47 = vsel %vm475_vm11, %v6262_v62, %v1827_v35  ;;  %v1836_v8 = vsel %vm475_vm11, %v1827_v35, %v6258_v13  ;;  %2052 = vmatpush1.bf16.msra.mxu1 %v1808_v9  ;;  %v8096_v9 = vld [vmem:[#allocation14_spill] sm:$0xff]  ;;  %v8099_v35 = vld [vmem:[#allocation11_spill] sm:$0xff] }
 0x484   :  { %v1846_v2 = vpack.c.bf16 %v1842_v43, %v1838_v11  ;;  %v1829_v19 = vpop.permute.xlu0 %1828  ;;  %v1847_v23 = vpack.c.bf16 %v1843_v42, %v1839_v14  ;;  %v1840_v17 = vmul.f32 %v5477_v59, %v1830_v47  ;;  %v1841_v62 = vmul.f32 %v5555_v24, %v1836_v8  ;;  %v8098_v43 = vld [vmem:[#allocation12_spill] sm:$0xff] }
 0x485   :  { %v1831_v25 = vsel %vm475_vm11, %v6264_v16, %v1829_v19  ;;  %v1837_v63 = vsel %vm475_vm11, %v1829_v19, %v6260_v46 }
 0x486   :  { %v1844_v0 = vmul.f32 %v5477_v59, %v1831_v25  ;;  %v1845_v13 = vmul.f32 %v5555_v24, %v1837_v63  ;;  %v1859_v7 = vpop.permute.xlu1 %1858  ;;  %2010 = vmatprep.subr.bf16.mxu0 %v1847_v23 }
 0x487   :  { %v1872_v57 = vsel %vm506_vm6, %v1859_v7, %v6270_v28  ;;  %2011 = vmatpush1.bf16.msra.mxu0 %v1846_v2  ;;  %v1874_v3 = vsel %vm506_vm6, %v8094_v5, %v1859_v7  ;;  %v8100_v2 = vld [vmem:[#allocation7_spill] sm:$0xff] }
 0x488   :  { %v1848_v16 = vpack.c.bf16 %v1844_v0, %v1840_v17  ;;  %v1861_v36 = vpop.permute.xlu0 %1860  ;;  %v1849_v1 = vpack.c.bf16 %v1845_v13, %v1841_v62  ;;  %v1879_v60 = vmul.f32 %v5580_v53, %v1872_v57 }
 0x489   :  { %v1873_v46 = vsel %vm506_vm6, %v1861_v36, %v6272_v27  ;;  %v1875_v55 = vsel %vm506_vm6, %v8093_v48, %v1861_v36  ;;  %v8101_v36 = vld [vmem:[#allocation8_spill] sm:$0xff] }
 0x48a   :  { %v1883_v39 = vmul.f32 %v5580_v53, %v1873_v46  ;;  %2053 = vmatprep.subr.bf16.mxu1 %v1849_v1  ;;  %v1867_v49 = vpop.permute.xlu1 %1866  ;;  %v1886_v40 = vpack.c.bf16 %v1875_v55, %v1874_v3 }
 0x48b   :  { %v1876_v61 = vsel %vm506_vm6, %v1867_v49, %v8094_v5  ;;  %2054 = vmatpush1.bf16.msra.mxu1 %v1848_v16  ;;  %v1870_v37 = vsel %vm506_vm6, %v6270_v28, %v1867_v49  ;;  %v8102_v49 = vmov 0  }
 0x48c   :  { %v1869_v6 = vpop.permute.xlu0 %1868  ;;  %v1887_v50 = vpack.c.bf16 %v1883_v39, %v1879_v60  ;;  %v1881_v52 = vmul.f32 %v8095_v34, %v1876_v61 }
 0x48d   :  { %v1877_v21 = vsel %vm506_vm6, %v1869_v6, %v8093_v48  ;;  %v1871_v38 = vsel %vm506_vm6, %v6272_v27, %v1869_v6  ;;  %v4797_v48 = vld [vmem:[%s7984_s1 + $0x20] ss:$8 sps:$4 sm:$0xff]  }
 0x48e   :  { %v1885_v26 = vmul.f32 %v8095_v34, %v1877_v21  ;;  %v1899_v41 = vpop.permute.xlu1 %1898  ;;  %2012 = vmatprep.subr.bf16.mxu0 %v1887_v50  ;;  %v1888_v27 = vpack.c.bf16 %v1871_v38, %v1870_v37 }
 0x48f   :  { %v1912_v4 = vsel %vm537_vm7, %v1899_v41, %v8096_v9  ;;  %v1914_v11 = vsel %vm537_vm7, %v8097_v51, %v1899_v41  ;;  %2013 = vmatpush1.bf16.msra.mxu0 %v1886_v40 }
 0x490   :  { %v1901_v12 = vpop.permute.xlu0 %1900  ;;  %v1889_v14 = vpack.c.bf16 %v1885_v26, %v1881_v52  ;;  %v1918_v8 = vmul.f32 %v5507_v44, %v1914_v11  ;;  %v1919_v19 = vmul.f32 %v8100_v2, %v1912_v4 }
 0x491   :  { %v1913_v42 = vsel %vm537_vm7, %v1901_v12, %v8098_v43  ;;  %v1915_v47 = vsel %vm537_vm7, %v8099_v35, %v1901_v12 }
 0x492   :  { %v1922_v23 = vmul.f32 %v5507_v44, %v1915_v47  ;;  %v1923_v25 = vmul.f32 %v8100_v2, %v1913_v42  ;;  %2055 = vmatprep.subr.bf16.mxu1 %v1889_v14  ;;  %v1907_v28 = vpop.permute.xlu1 %1906 }
 0x493   :  { %v1910_v63 = vsel %vm537_vm7, %v8096_v9, %v1907_v28  ;;  %v1916_v17 = vsel %vm537_vm7, %v1907_v28, %v8097_v51  ;;  %2056 = vmatpush1.bf16.msra.mxu1 %v1888_v27 }
 0x494   :  { %v1926_v62 = vpack.c.bf16 %v1922_v23, %v1918_v8  ;;  %v1909_v0 = vpop.permute.xlu0 %1908  ;;  %v1927_v13 = vpack.c.bf16 %v1923_v25, %v1919_v19  ;;  %v1920_v16 = vmul.f32 %v5512_v45, %v1910_v63  ;;  %v1921_v1 = vmul.f32 %v8101_v36, %v1916_v17 }
 0x495   :  { %v1911_v7 = vsel %vm537_vm7, %v8098_v43, %v1909_v0  ;;  %v1917_v57 = vsel %vm537_vm7, %v1909_v0, %v8099_v35 }
 0x496   :  { %v1924_v46 = vmul.f32 %v5512_v45, %v1911_v7  ;;  %v1925_v60 = vmul.f32 %v8101_v36, %v1917_v57  ;;  %2014 = vmatprep.subr.bf16.mxu0 %v1927_v13 }
 0x497   :  { %2015 = vmatpush1.bf16.msra.mxu0 %v1926_v62 }
 0x498   :  { %v1928_v55 = vpack.c.bf16 %v1924_v46, %v1920_v16  ;;  %v1929_v39 = vpack.c.bf16 %v1925_v60, %v1921_v1 }
 0x49a   :  { %2031 = vmatmul.mubr.bf16.vlgmr.msra.gmra.mrb[12].mxu0 %v4797_v48  ;;  %2057 = vmatprep.subr.bf16.mxu1 %v1929_v39 }
 0x49b   :  { %2058 = vmatpush1.bf16.msra.mxu1 %v1928_v55  ;;  %2187 = vmatprep.mubr.bf16.mxu0 %v8102_v49 }
 0x49e   :  { %2074 = vmatmul.mubr.bf16.vlgmr.msra.gmra.mrb[12].mxu1 %v4797_v48 }
 0x49f   :  { %2230 = vmatprep.mubr.bf16.mxu1 %v8102_v49 }
 0x4a3   :  { %v1979_v5 = vpop.permute.xlu1 %1978 }
 0x4a5   :  { %v1984_v50 = vpop.permute.xlu0 %1983 }
 0x56d   :  { %v2032_v61 = vpop.f32.mrb[12].mxu0 }
 0x56e   :  { %v2033_v3 = vadd.f32 %v2032_v61, %v1979_v5  ;;  %v2034_v6 = vpop.f32.mrb[13].mxu0 }
 0x56f   :  { %v2035_v40 = vadd.f32 %v2034_v6, %v1979_v5  ;;  %v2036_v21 = vpop.f32.mrb[14].mxu0 }
 0x570   :  { %v4617_v52 = vmul.f32 -1.442695, %v2033_v3  ;;  %v2037_v38 = vadd.f32 %v2036_v21, %v1984_v50  ;;  %v2038_v26 = vpop.f32.mrb[15].mxu0 }
 0x571   :  { %v4618_v41 = vmul.f32 -1.442695, %v2035_v40  ;;  %v2039_v9 = vadd.f32 %v2038_v26, %v1984_v50  ;;  %v2075_v4 = vpop.f32.mrb[12].mxu1 }
 0x572   :  { %4877 = vpow2.f32 %v4617_v52  ;;  %v4621_v51 = vmul.f32 -1.442695, %v2037_v38  ;;  %v2076_v11 = vadd.f32 %v2075_v4, %v1979_v5  ;;  %v2077_v37 = vpop.f32.mrb[13].mxu1 }
 0x573   :  { %4879 = vpow2.f32 %v4618_v41  ;;  %v4622_v12 = vmul.f32 -1.442695, %v2039_v9  ;;  %v2078_v14 = vadd.f32 %v2077_v37, %v1979_v5  ;;  %v2079_v27 = vpop.f32.mrb[14].mxu1 }
 0x574   :  { %4881 = vpow2.f32 %v4621_v51  ;;  %v4619_v43 = vmul.f32 -1.442695, %v2076_v11  ;;  %v2080_v42 = vadd.f32 %v2079_v27, %v1984_v50  ;;  %v2081_v35 = vpop.f32.mrb[15].mxu1 }
 0x575   :  { %4883 = vpow2.f32 %v4622_v12  ;;  %v4620_v47 = vmul.f32 -1.442695, %v2078_v14  ;;  %v2082_v8 = vadd.f32 %v2081_v35, %v1984_v50 }
 0x576   :  { %4885 = vpow2.f32 %v4619_v43  ;;  %v4623_v19 = vmul.f32 -1.442695, %v2080_v42 }
 0x577   :  { %4887 = vpow2.f32 %v4620_v47  ;;  %v4624_v23 = vmul.f32 -1.442695, %v2082_v8 }
 0x578   :  { %4889 = vpow2.f32 %v4623_v19 }
 0x579   :  { %4891 = vpow2.f32 %v4624_v23 }
 0x57c   :  { %v4878_v25 = vpop.eup %4877 }
 0x57d   :  { %v4880_v28 = vpop.eup %4879  ;;  %v2108_v63 = vadd.f32 1.0, %v4878_v25 }
 0x57e   :  { %v4882_v17 = vpop.eup %4881  ;;  %v2109_v62 = vadd.f32 1.0, %v4880_v28 }
 0x57f   :  { %v4884_v0 = vpop.eup %4883  ;;  %4893 = vrcp.f32 %v2108_v63  ;;  %v2112_v13 = vadd.f32 1.0, %v4882_v17  ;;  %v4632_v63 = vld [vmem:[%s7985_s2 + $0x30] sm:$0xff] }
 0x580   :  { %v4886_v7 = vpop.eup %4885  ;;  %4895 = vrcp.f32 %v2109_v62  ;;  %v2113_v57 = vadd.f32 1.0, %v4884_v0  ;;  %v4633_v62 = vld [vmem:[%s7985_s2 + $0x38] sm:$0xff] }
 0x581   :  { %v4888_v16 = vpop.eup %4887  ;;  %4897 = vrcp.f32 %v2112_v13  ;;  %v2110_v1 = vadd.f32 1.0, %v4886_v7 }
 0x582   :  { %v4890_v46 = vpop.eup %4889  ;;  %4899 = vrcp.f32 %v2113_v57  ;;  %v2111_v60 = vadd.f32 1.0, %v4888_v16 }
 0x583   :  { %v4892_v48 = vpop.eup %4891  ;;  %4901 = vrcp.f32 %v2110_v1  ;;  %v2114_v55 = vadd.f32 1.0, %v4890_v46 }
 0x584   :  { %4903 = vrcp.f32 %v2111_v60  ;;  %v2115_v39 = vadd.f32 1.0, %v4892_v48 }
 0x585   :  { %4905 = vrcp.f32 %v2114_v55 }
 0x586   :  { %4907 = vrcp.f32 %v2115_v39 }
 0x589   :  { %v4894_v5 = vpop.eup %4893 }
 0x58a   :  { %v4896_v61 = vpop.eup %4895  ;;  %v2132_v6 = vmul.f32 %v4894_v5, %v2033_v3 }
 0x58b   :  { %v4898_v50 = vpop.eup %4897  ;;  %v6532_v41 = vmul.f32 %v4896_v61, %v2035_v40 }
 0x58c   :  { %v4900_v21 = vpop.eup %4899  ;;  %v2136_v52 = vmul.f32 %v4898_v50, %v2037_v38  ;;  %2249 = vrot.lane.b32.xlu1 %v2132_v6, %s5125_s9 }
 0x58d   :  { %v4902_v26 = vpop.eup %4901  ;;  %v6534_v4 = vmul.f32 %v4900_v21, %v2039_v9 }
 0x58e   :  { %v4904_v51 = vpop.eup %4903  ;;  %v2134_v37 = vmul.f32 %v4902_v26, %v2076_v11  ;;  %2251 = vrot.lane.b32.xlu0 %v2136_v52, %s5125_s9  ;;  %v6537_v12 = vpack.c.bf16 %v2136_v52, %v2132_v6 }
 0x58f   :  { %v4906_v27 = vpop.eup %4905  ;;  %v6541_v3 = vpack.c.bf16 %v6534_v4, %v6532_v41  ;;  %v6544_v35 = vmul.f32 %v4904_v51, %v2078_v14  ;;  %v4798_v14 = vld [vmem:[%s7987_s4 + $0x10] sm:$0xff]  }
 0x590   :  { %v4908_v43 = vpop.eup %4907  ;;  %v2138_v38 = vmul.f32 %v4906_v27, %v2080_v42  ;;  %2257 = vrot.lane.b32.xlu1 %v2134_v37, %s5125_s9 }
 0x591   :  { %v6546_v40 = vmul.f32 %v4908_v43, %v2082_v8  ;;  %2155 = vmatprep.subr.bf16.mxu0 %v6541_v3  ;;  %v4799_v8 = vld [vmem:[%s7984_s1 + $0x34] ss:$8 sps:$4 sm:$0xff]  }
 0x592   :  { %2259 = vrot.lane.b32.xlu0 %v2138_v38, %s5125_s9  ;;  %2156 = vmatpush1.bf16.msra.mxu0 %v6537_v12  ;;  %v6551_v9 = vpack.c.bf16 %v2138_v38, %v2134_v37 }
 0x593   :  { %v6555_v11 = vpack.c.bf16 %v6546_v40, %v6544_v35 }
 0x594   :  { %2289 = vrot.lane.b32.xlu1 %v2132_v6, %s5126_s14 }
 0x595   :  { %2198 = vmatprep.subr.bf16.mxu1 %v6555_v11  ;;  %4628 = vmatmul.mubr.msk.bf16.vlgmr.msra.gmra.mrb[4].mxu0 %vm617_vm0, %v4798_v14 }
 0x596   :  { %2199 = vmatpush1.bf16.msra.mxu1 %v6551_v9  ;;  %2291 = vrot.lane.b32.xlu0 %v2136_v52, %s5126_s14 }
 0x597   :  { %4636 = vmatprep.mubr.msk.bf16.mxu0 %vm617_vm0, %v4799_v8 }
 0x598   :  { %2297 = vrot.lane.b32.xlu1 %v2134_v37, %s5126_s14 }
 0x599   :  { %4629 = vmatmul.mubr.msk.bf16.vlgmr.msra.gmra.mrb[4].mxu1 %vm617_vm0, %v4798_v14 }
 0x59a   :  { %2299 = vrot.lane.b32.xlu0 %v2138_v38, %s5126_s14  ;;  %4637 = vmatprep.mubr.msk.bf16.mxu1 %vm617_vm0, %v4799_v8 }
 0x59c   :  { %2329 = vrot.lane.b32.xlu1 %v2132_v6, %s5128_s0 }
 0x59e   :  { %2331 = vrot.lane.b32.xlu0 %v2136_v52, %s5128_s0 }
 0x5a0   :  { %2337 = vrot.lane.b32.xlu1 %v2134_v37, %s5128_s0 }
 0x5a2   :  { %2339 = vrot.lane.b32.xlu0 %v2138_v38, %s5128_s0 }
 0x5a4   :  { %2369 = vrot.lane.b32.xlu1 %v2132_v6, %s5129_s15 }
 0x5a6   :  { %2371 = vrot.lane.b32.xlu0 %v2136_v52, %s5129_s15 }
 0x5a8   :  { %2377 = vrot.lane.b32.xlu1 %v2134_v37, %s5129_s15 }
 0x5aa   :  { %2379 = vrot.lane.b32.xlu0 %v2138_v38, %s5129_s15 }
 0x5ac   :  { %2413 = vrot.lane.b32.xlu1 %v2132_v6, %s5130_s16 }
 0x5ae   :  { %2415 = vrot.lane.b32.xlu0 %v2136_v52, %s5130_s16 }
 0x5b0   :  { %2421 = vrot.lane.b32.xlu1 %v2134_v37, %s5130_s16 }
 0x5b2   :  { %2423 = vrot.lane.b32.xlu0 %v2138_v38, %s5130_s16 }
 0x5b4   :  { %2453 = vrot.lane.b32.xlu1 %v2132_v6, %s5131_s17 }
 0x5b6   :  { %2455 = vrot.lane.b32.xlu0 %v2136_v52, %s5131_s17 }
 0x5b8   :  { %2461 = vrot.lane.b32.xlu1 %v2134_v37, %s5131_s17 }
 0x5ba   :  { %2463 = vrot.lane.b32.xlu0 %v2138_v38, %s5131_s17 }
 0x5bc   :  { %2493 = vrot.lane.b32.xlu1 %v2132_v6, %s5132_s18 }
 0x5be   :  { %2495 = vrot.lane.b32.xlu0 %v2136_v52, %s5132_s18 }
 0x5c0   :  { %2501 = vrot.lane.b32.xlu1 %v2134_v37, %s5132_s18 }
 0x5c2   :  { %2503 = vrot.lane.b32.xlu0 %v2138_v38, %s5132_s18 }
 0x5c4   :  { %2533 = vrot.lane.b32.xlu1 %v2132_v6, %s5133_s19 }
 0x5c6   :  { %2535 = vrot.lane.b32.xlu0 %v2136_v52, %s5133_s19 }
 0x5c8   :  { %2541 = vrot.lane.b32.xlu1 %v2134_v37, %s5133_s19 }
 0x5ca   :  { %2543 = vrot.lane.b32.xlu0 %v2138_v38, %s5133_s19 }
 0x5cc   :  { %2253 = vrot.lane.b32.xlu1 %v6532_v41, %s5125_s9 }
 0x5ce   :  { %2255 = vrot.lane.b32.xlu0 %v6534_v4, %s5125_s9 }
 0x5d0   :  { %2261 = vrot.lane.b32.xlu1 %v6544_v35, %s5125_s9 }
 0x5d2   :  { %2263 = vrot.lane.b32.xlu0 %v6546_v40, %s5125_s9 }
 0x5d4   :  { %2293 = vrot.lane.b32.xlu1 %v6532_v41, %s5126_s14 }
 0x5d6   :  { %2295 = vrot.lane.b32.xlu0 %v6534_v4, %s5126_s14 }
 0x5d8   :  { %2301 = vrot.lane.b32.xlu1 %v6544_v35, %s5126_s14 }
 0x5da   :  { %2303 = vrot.lane.b32.xlu0 %v6546_v40, %s5126_s14 }
 0x5dc   :  { %2333 = vrot.lane.b32.xlu1 %v6532_v41, %s5128_s0 }
 0x5de   :  { %2335 = vrot.lane.b32.xlu0 %v6534_v4, %s5128_s0 }
 0x5e0   :  { %2341 = vrot.lane.b32.xlu1 %v6544_v35, %s5128_s0 }
 0x5e2   :  { %2343 = vrot.lane.b32.xlu0 %v6546_v40, %s5128_s0 }
 0x5e4   :  { %2373 = vrot.lane.b32.xlu1 %v6532_v41, %s5129_s15 }
 0x5e6   :  { %2375 = vrot.lane.b32.xlu0 %v6534_v4, %s5129_s15 }
 0x5e8   :  { %2381 = vrot.lane.b32.xlu1 %v6544_v35, %s5129_s15 }
 0x5ea   :  { %2383 = vrot.lane.b32.xlu0 %v6546_v40, %s5129_s15 }
 0x5ec   :  { %2417 = vrot.lane.b32.xlu1 %v6532_v41, %s5130_s16 }
 0x5ee   :  { %2419 = vrot.lane.b32.xlu0 %v6534_v4, %s5130_s16 }
 0x5f0   :  { %2425 = vrot.lane.b32.xlu1 %v6544_v35, %s5130_s16 }
 0x5f2   :  { %2427 = vrot.lane.b32.xlu0 %v6546_v40, %s5130_s16 }
 0x5f4   :  { %2457 = vrot.lane.b32.xlu1 %v6532_v41, %s5131_s17 }
 0x5f6   :  { %2459 = vrot.lane.b32.xlu0 %v6534_v4, %s5131_s17 }
 0x5f8   :  { %2465 = vrot.lane.b32.xlu1 %v6544_v35, %s5131_s17 }
 0x5fa   :  { %2467 = vrot.lane.b32.xlu0 %v6546_v40, %s5131_s17 }
 0x5fc   :  { %2497 = vrot.lane.b32.xlu1 %v6532_v41, %s5132_s18 }
 0x5fe   :  { %2499 = vrot.lane.b32.xlu0 %v6534_v4, %s5132_s18  ;;  %v2250_v42 = vpop.permute.xlu1 %2249 }
 0x600   :  { %v2252_v47 = vpop.permute.xlu0 %2251  ;;  %2505 = vrot.lane.b32.xlu1 %v6544_v35, %s5132_s18 }
 0x602   :  { %2507 = vrot.lane.b32.xlu0 %v6546_v40, %s5132_s18  ;;  %v2258_v19 = vpop.permute.xlu1 %2257 }
 0x604   :  { %v2260_v23 = vpop.permute.xlu0 %2259  ;;  %2537 = vrot.lane.b32.xlu1 %v6532_v41, %s5133_s19 }
 0x606   :  { %2539 = vrot.lane.b32.xlu0 %v6534_v4, %s5133_s19  ;;  %v6657_v25 = vpop.permute.xlu1 %2289 }
 0x608   :  { %v6659_v28 = vpop.permute.xlu0 %2291  ;;  %2545 = vrot.lane.b32.xlu1 %v6544_v35, %s5133_s19 }
 0x60a   :  { %2547 = vrot.lane.b32.xlu0 %v6546_v40, %s5133_s19  ;;  %v6668_v17 = vpop.permute.xlu1 %2297 }
 0x60c   :  { %v6673_v0 = vpop.permute.xlu0 %2299  ;;  %2617 = vperm.xlu1 %4785, %v4632_v63  }
 0x60e   :  { %2622 = vperm.xlu0 %4784, %v4633_v62   ;;  %v6675_v13 = vpop.permute.xlu1 %2329 }
 0x610   :  { %v6677_v7 = vpop.permute.xlu0 %2331 }
 0x612   :  { %v6679_v57 = vpop.permute.xlu1 %2337 }
 0x614   :  { %v6681_v16 = vpop.permute.xlu0 %2339 }
 0x616   :  { %v6683_v1 = vpop.permute.xlu1 %2369 }
 0x618   :  { %v6685_v46 = vpop.permute.xlu0 %2371 }
 0x61a   :  { %v6687_v60 = vpop.permute.xlu1 %2377 }
 0x61c   :  { %v6689_v48 = vpop.permute.xlu0 %2379 }
 0x61e   :  { %v6691_v55 = vpop.permute.xlu1 %2413 }
 0x620   :  { %v6693_v39 = vpop.permute.xlu0 %2415 }
 0x622   :  { %v6695_v5 = vpop.permute.xlu1 %2421 }
 0x624   :  { %v6697_v61 = vpop.permute.xlu0 %2423 }
 0x626   :  { %v6699_v6 = vpop.permute.xlu1 %2453 }
 0x628   :  { %v6701_v50 = vpop.permute.xlu0 %2455 }
 0x62a   :  { %v6703_v21 = vpop.permute.xlu1 %2461 }
 0x62c   :  { %v6705_v52 = vpop.permute.xlu0 %2463 }
 0x62e   :  { %v6707_v26 = vpop.permute.xlu1 %2493 }
 0x62f   :  { %8103 = vst [vmem:[#allocation9_spill] sm:$0xff] %v6707_v26 }
 0x630   :  { %v6709_v41 = vpop.permute.xlu0 %2495 }
 0x631   :  { %8104 = vst [vmem:[#allocation10_spill] sm:$0xff] %v6709_v41 }
 0x632   :  { %v6711_v4 = vpop.permute.xlu1 %2501 }
 0x634   :  { %v6713_v51 = vpop.permute.xlu0 %2503 }
 0x636   :  { %v6715_v37 = vpop.permute.xlu1 %2533 }
 0x637   :  { %8105 = vst [vmem:[#allocation14_spill] sm:$0xff] %v6715_v37 }
 0x638   :  { %v6717_v27 = vpop.permute.xlu0 %2535 }
 0x639   :  { %8106 = vst [vmem:[#allocation13_spill] sm:$0xff] %v6717_v27 }
 0x63a   :  { %v6719_v43 = vpop.permute.xlu1 %2541 }
 0x63b   :  { %8107 = vst [vmem:[#allocation12_spill] sm:$0xff] %v6719_v43 }
 0x63c   :  { %v6721_v38 = vpop.permute.xlu0 %2543 }
 0x63d   :  { %8108 = vst [vmem:[#allocation11_spill] sm:$0xff] %v6721_v38 }
 0x63e   :  { %v2254_v35 = vpop.permute.xlu1 %2253 }
 0x63f   :  { %v2269_v40 = vsel %vm312_vm9, %v2250_v42, %v2254_v35  ;;  %v2267_v38 = vsel %vm312_vm9, %v2254_v35, %v2258_v19 }
 0x640   :  { %v2256_v14 = vpop.permute.xlu0 %2255  ;;  %v2274_v63 = vmul.f32 %v5353_v30, %v2269_v40 }
 0x641   :  { %v2270_v8 = vsel %vm312_vm9, %v2252_v47, %v2256_v14  ;;  %v2268_v62 = vsel %vm312_vm9, %v2256_v14, %v2260_v23 }
 0x642   :  { %v2278_v49 = vmul.f32 %v5353_v30, %v2270_v8  ;;  %v2262_v36 = vpop.permute.xlu1 %2261  ;;  %v2279_v34 = vmul.f32 %v5364_v33, %v2268_v62 }
 0x643   :  { %v2265_v2 = vsel %vm312_vm9, %v2258_v19, %v2262_v36  ;;  %v2271_v27 = vsel %vm312_vm9, %v2262_v36, %v2250_v42 }
 0x644   :  { %v2264_v37 = vpop.permute.xlu0 %2263  ;;  %v2282_v43 = vpack.c.bf16 %v2278_v49, %v2274_v63  ;;  %v2273_v8 = vmul.f32 %v5361_v32, %v2271_v27  ;;  %v2276_v26 = vmul.f32 %v5358_v31, %v2265_v2  ;;  %v2275_v49 = vmul.f32 %v5364_v33, %v2267_v38 }
 0x645   :  { %v2266_v40 = vsel %vm312_vm9, %v2260_v23, %v2264_v37  ;;  %v2272_v14 = vsel %vm312_vm9, %v2264_v37, %v2252_v47 }
 0x646   :  { %v2277_v41 = vmul.f32 %v5361_v32, %v2272_v14  ;;  %v2280_v36 = vmul.f32 %v5358_v31, %v2266_v40  ;;  %v2294_v42 = vpop.permute.xlu1 %2293  ;;  %2637 = vmatprep.subr.bf16.mxu0 %v2282_v43  ;;  %v2283_v62 = vpack.c.bf16 %v2279_v34, %v2275_v49 }
 0x647   :  { %v2309_v47 = vsel %vm343_vm10, %v6657_v25, %v2294_v42  ;;  %v2307_v37 = vsel %vm343_vm10, %v2294_v42, %v6668_v17 }
 0x648   :  { %v2281_v19 = vpack.c.bf16 %v2277_v41, %v2273_v8  ;;  %v2296_v35 = vpop.permute.xlu0 %2295  ;;  %v2284_v63 = vpack.c.bf16 %v2280_v36, %v2276_v26  ;;  %v2315_v38 = vmul.f32 %v5386_v54, %v2307_v37 }
 0x649   :  { %v2308_v2 = vsel %vm343_vm10, %v2296_v35, %v6673_v0  ;;  %v2310_v23 = vsel %vm343_vm10, %v6659_v28, %v2296_v35 }
 0x64a   :  { %2680 = vmatprep.subr.bf16.mxu1 %v2284_v63  ;;  %v2302_v41 = vpop.permute.xlu1 %2301  ;;  %2638 = vmatpush1.bf16.msra.mxu0 %v2281_v19  ;;  %v2322_v34 = vpack.c.bf16 %v2310_v23, %v2309_v47  ;;  %v2319_v26 = vmul.f32 %v5386_v54, %v2308_v2 }
 0x64b   :  { %v2311_v27 = vsel %vm343_vm10, %v2302_v41, %v6657_v25  ;;  %2681 = vmatpush1.bf16.msra.mxu1 %v2283_v62  ;;  %v2305_v40 = vsel %vm343_vm10, %v6668_v17, %v2302_v41 }
 0x64c   :  { %v2304_v43 = vpop.permute.xlu0 %2303  ;;  %2639 = vmatprep.subr.bf16.mxu0 %v2322_v34  ;;  %v2313_v36 = vmul.f32 %v5393_v56, %v2311_v27  ;;  %v2323_v19 = vpack.c.bf16 %v2319_v26, %v2315_v38 }
 0x64d   :  { %v2306_v14 = vsel %vm343_vm10, %v6673_v0, %v2304_v43  ;;  %v2312_v8 = vsel %vm343_vm10, %v2304_v43, %v6659_v28 }
 0x64e   :  { %v2317_v25 = vmul.f32 %v5393_v56, %v2312_v8  ;;  %v2334_v42 = vpop.permute.xlu1 %2333  ;;  %v2324_v49 = vpack.c.bf16 %v2306_v14, %v2305_v40 }
 0x64f   :  { %v2349_v35 = vsel %vm374_vm1, %v6675_v13, %v2334_v42  ;;  %v2347_v41 = vsel %vm374_vm1, %v2334_v42, %v6679_v57 }
 0x650   :  { %v2321_v17 = vpack.c.bf16 %v2317_v25, %v2313_v36  ;;  %v2336_v63 = vpop.permute.xlu0 %2335  ;;  %2682 = vmatprep.subr.bf16.mxu1 %v2324_v49  ;;  %v2354_v28 = vmul.f32 %v5437_v18, %v2349_v35  ;;  %v2355_v36 = vmul.f32 %v5443_v29, %v2347_v41 }
 0x651   :  { %v2350_v0 = vsel %vm374_vm1, %v6677_v7, %v2336_v63  ;;  %2683 = vmatpush1.bf16.msra.mxu1 %v2323_v19  ;;  %v2348_v62 = vsel %vm374_vm1, %v2336_v63, %v6681_v16 }
 0x652   :  { %v2358_v47 = vmul.f32 %v5437_v18, %v2350_v0  ;;  %v2342_v2 = vpop.permute.xlu1 %2341  ;;  %2640 = vmatpush1.bf16.msra.mxu0 %v2321_v17  ;;  %v2359_v27 = vmul.f32 %v5443_v29, %v2348_v62 }
 0x653   :  { %v2345_v23 = vsel %vm374_vm1, %v6679_v57, %v2342_v2  ;;  %v2351_v37 = vsel %vm374_vm1, %v2342_v2, %v6675_v13 }
 0x654   :  { %v2344_v34 = vpop.permute.xlu0 %2343  ;;  %v2362_v26 = vpack.c.bf16 %v2358_v47, %v2354_v28  ;;  %v2353_v40 = vmul.f32 %v5440_v20, %v2351_v37  ;;  %v2356_v13 = vmul.f32 %v5448_v22, %v2345_v23 }
 0x655   :  { %v2346_v43 = vsel %vm374_vm1, %v6681_v16, %v2344_v34  ;;  %v2352_v38 = vsel %vm374_vm1, %v2344_v34, %v6677_v7  ;;  %v2363_v7 = vpack.c.bf16 %v2359_v27, %v2355_v36 }
 0x656   :  { %v2357_v14 = vmul.f32 %v5440_v20, %v2352_v38  ;;  %v2360_v57 = vmul.f32 %v5448_v22, %v2346_v43  ;;  %v2374_v8 = vpop.permute.xlu1 %2373  ;;  %2641 = vmatprep.subr.bf16.mxu0 %v2362_v26 }
 0x657   :  { %v2389_v16 = vsel %vm405_vm3, %v6683_v1, %v2374_v8  ;;  %v2387_v47 = vsel %vm405_vm3, %v2374_v8, %v6687_v60 }
 0x658   :  { %v2361_v25 = vpack.c.bf16 %v2357_v14, %v2353_v40  ;;  %v2376_v42 = vpop.permute.xlu0 %2375  ;;  %v2364_v49 = vpack.c.bf16 %v2360_v57, %v2356_v13  ;;  %v2394_v35 = vmul.f32 %v5353_v30, %v2389_v16  ;;  %v2395_v38 = vmul.f32 %v5477_v59, %v2387_v47 }
 0x659   :  { %v2390_v19 = vsel %vm405_vm3, %v6685_v46, %v2376_v42  ;;  %v2388_v17 = vsel %vm405_vm3, %v2376_v42, %v6689_v48 }
 0x65a   :  { %v2398_v63 = vmul.f32 %v5353_v30, %v2390_v19  ;;  %2684 = vmatprep.subr.bf16.mxu1 %v2364_v49  ;;  %v2382_v0 = vpop.permute.xlu1 %2381  ;;  %2642 = vmatpush1.bf16.msra.mxu0 %v2361_v25  ;;  %v2399_v37 = vmul.f32 %v5477_v59, %v2388_v17 }
 0x65b   :  { %v2385_v28 = vsel %vm405_vm3, %v6687_v60, %v2382_v0  ;;  %v2391_v62 = vsel %vm405_vm3, %v2382_v0, %v6683_v1  ;;  %2685 = vmatpush1.bf16.msra.mxu1 %v2363_v7 }
 0x65c   :  { %v2384_v2 = vpop.permute.xlu0 %2383  ;;  %v2402_v23 = vpack.c.bf16 %v2398_v63, %v2394_v35  ;;  %v2393_v26 = vmul.f32 %v5472_v58, %v2391_v62  ;;  %v2396_v1 = vmul.f32 %v5358_v31, %v2385_v28 }
 0x65d   :  { %v2386_v41 = vsel %vm405_vm3, %v6689_v48, %v2384_v2  ;;  %v2392_v34 = vsel %vm405_vm3, %v2384_v2, %v6685_v46  ;;  %v2403_v46 = vpack.c.bf16 %v2399_v37, %v2395_v38 }
 0x65e   :  { %v2397_v27 = vmul.f32 %v5472_v58, %v2392_v34  ;;  %v2400_v60 = vmul.f32 %v5358_v31, %v2386_v41  ;;  %v2418_v43 = vpop.permute.xlu1 %2417  ;;  %2643 = vmatprep.subr.bf16.mxu0 %v2402_v23 }
 0x65f   :  { %v2431_v48 = vsel %vm444_vm2, %v2418_v43, %v6695_v5  ;;  %v2433_v36 = vsel %vm444_vm2, %v6691_v55, %v2418_v43 }
 0x660   :  { %v2401_v40 = vpack.c.bf16 %v2397_v27, %v2393_v26  ;;  %v2420_v13 = vpop.permute.xlu0 %2419  ;;  %v2404_v14 = vpack.c.bf16 %v2400_v60, %v2396_v1  ;;  %v2438_v16 = vmul.f32 %v5437_v18, %v2431_v48  ;;  %v2437_v63 = vmul.f32 %v5507_v44, %v2433_v36 }
 0x661   :  { %v2432_v57 = vsel %vm444_vm2, %v2420_v13, %v6697_v61  ;;  %v2434_v8 = vsel %vm444_vm2, %v6693_v39, %v2420_v13 }
 0x662   :  { %v2442_v25 = vmul.f32 %v5437_v18, %v2432_v57  ;;  %2686 = vmatprep.subr.bf16.mxu1 %v2404_v14  ;;  %v2426_v42 = vpop.permute.xlu1 %2425  ;;  %2644 = vmatpush1.bf16.msra.mxu0 %v2401_v40  ;;  %v2441_v19 = vmul.f32 %v5507_v44, %v2434_v8 }
 0x663   :  { %v2429_v49 = vsel %vm444_vm2, %v6695_v5, %v2426_v42  ;;  %v2435_v7 = vsel %vm444_vm2, %v2426_v42, %v6691_v55  ;;  %2645 = vmatprep.subr.bf16.mxu0 %v6541_v3  ;;  %2687 = vmatpush1.bf16.msra.mxu1 %v2403_v46 }
 0x664   :  { %v2428_v35 = vpop.permute.xlu0 %2427  ;;  %2688 = vmatprep.subr.bf16.mxu1 %v6555_v11  ;;  %v2446_v17 = vpack.c.bf16 %v2442_v25, %v2438_v16  ;;  %v2439_v55 = vmul.f32 %v5512_v45, %v2429_v49  ;;  %v2440_v3 = vmul.f32 %v5448_v22, %v2435_v7  ;;  %v8109_v49 = vld [vmem:[#allocation10_spill] sm:$0xff] }
 0x665   :  { %v2430_v0 = vsel %vm444_vm2, %v6697_v61, %v2428_v35  ;;  %v2436_v5 = vsel %vm444_vm2, %v2428_v35, %v6693_v39  ;;  %v2445_v39 = vpack.c.bf16 %v2441_v19, %v2437_v63 }
 0x666   :  { %v2443_v28 = vmul.f32 %v5512_v45, %v2430_v0  ;;  %v2444_v62 = vmul.f32 %v5448_v22, %v2436_v5  ;;  %v2458_v11 = vpop.permute.xlu1 %2457  ;;  %2646 = vmatpush1.bf16.msra.mxu0 %v6537_v12 }
 0x667   :  { %v2471_v47 = vsel %vm475_vm11, %v2458_v11, %v6703_v21  ;;  %v2473_v61 = vsel %vm475_vm11, %v6699_v6, %v2458_v11  ;;  %2647 = vmatprep.subr.bf16.mxu0 %v2446_v17  ;;  %2689 = vmatpush1.bf16.msra.mxu1 %v6551_v9  ;;  %v8110_v17 = vld [vmem:[#allocation9_spill] sm:$0xff] }
 0x668   :  { %v2447_v2 = vpack.c.bf16 %v2443_v28, %v2439_v55  ;;  %v2460_v23 = vpop.permute.xlu0 %2459  ;;  %v2448_v37 = vpack.c.bf16 %v2444_v62, %v2440_v3  ;;  %v2477_v41 = vmul.f32 %v5472_v58, %v2473_v61  ;;  %v2478_v26 = vmul.f32 %v5548_v15, %v2471_v47  ;;  %v8111_v62 = vld [vmem:[#allocation6_spill] sm:$0xff] }
 0x669   :  { %v2472_v12 = vsel %vm475_vm11, %v2460_v23, %v6705_v52  ;;  %v2474_v34 = vsel %vm475_vm11, %v6701_v50, %v2460_v23 }
 0x66a   :  { %v2481_v1 = vmul.f32 %v5472_v58, %v2474_v34  ;;  %v2482_v9 = vmul.f32 %v5548_v15, %v2472_v12  ;;  %2690 = vmatprep.subr.bf16.mxu1 %v2448_v37  ;;  %v2466_v27 = vpop.permute.xlu1 %2465  ;;  %2648 = vmatpush1.bf16.msra.mxu0 %v2445_v39  ;;  %v8113_v37 = vld [vmem:[#allocation14_spill] sm:$0xff] }
 0x66b   :  { %v2469_v60 = vsel %vm475_vm11, %v6703_v21, %v2466_v27  ;;  %v2475_v43 = vsel %vm475_vm11, %v2466_v27, %v6699_v6  ;;  %2691 = vmatpush1.bf16.msra.mxu1 %v2447_v2  ;;  %v8112_v2 = vld [vmem:[#allocation12_spill] sm:$0xff]  ;;  %v8115_v27 = vld [vmem:[#allocation13_spill] sm:$0xff] }
 0x66c   :  { %v2485_v38 = vpack.c.bf16 %v2481_v1, %v2477_v41  ;;  %v2468_v48 = vpop.permute.xlu0 %2467  ;;  %v2486_v40 = vpack.c.bf16 %v2482_v9, %v2478_v26  ;;  %v2479_v46 = vmul.f32 %v5477_v59, %v2469_v60  ;;  %v2480_v21 = vmul.f32 %v5555_v24, %v2475_v43  ;;  %v8114_v1 = vld [vmem:[#allocation11_spill] sm:$0xff] }
 0x66d   :  { %v2470_v13 = vsel %vm475_vm11, %v6705_v52, %v2468_v48  ;;  %v2476_v14 = vsel %vm475_vm11, %v2468_v48, %v6701_v50 }
 0x66e   :  { %v2483_v57 = vmul.f32 %v5477_v59, %v2470_v13  ;;  %v2484_v6 = vmul.f32 %v5555_v24, %v2476_v14  ;;  %v2498_v8 = vpop.permute.xlu1 %2497  ;;  %2649 = vmatprep.subr.bf16.mxu0 %v2486_v40 }
 0x66f   :  { %v2511_v36 = vsel %vm506_vm6, %v2498_v8, %v6711_v4  ;;  %2650 = vmatpush1.bf16.msra.mxu0 %v2485_v38  ;;  %v2513_v0 = vsel %vm506_vm6, %v8110_v17, %v2498_v8  ;;  %v8116_v38 = vld [vmem:[#allocation7_spill] sm:$0xff] }
 0x670   :  { %v2487_v52 = vpack.c.bf16 %v2483_v57, %v2479_v46  ;;  %v2500_v16 = vpop.permute.xlu0 %2499  ;;  %v2488_v25 = vpack.c.bf16 %v2484_v6, %v2480_v21  ;;  %v2518_v42 = vmul.f32 %v5580_v53, %v2511_v36 }
 0x671   :  { %v2512_v50 = vsel %vm506_vm6, %v2500_v16, %v6713_v51  ;;  %v2514_v7 = vsel %vm506_vm6, %v8109_v49, %v2500_v16  ;;  %v8117_v16 = vld [vmem:[#allocation8_spill] sm:$0xff] }
 0x672   :  { %v2522_v19 = vmul.f32 %v5580_v53, %v2512_v50  ;;  %2692 = vmatprep.subr.bf16.mxu1 %v2488_v25  ;;  %v2506_v35 = vpop.permute.xlu1 %2505  ;;  %v2525_v3 = vpack.c.bf16 %v2514_v7, %v2513_v0 }
 0x673   :  { %v2515_v63 = vsel %vm506_vm6, %v2506_v35, %v8110_v17  ;;  %2693 = vmatpush1.bf16.msra.mxu1 %v2487_v52  ;;  %v2509_v12 = vsel %vm506_vm6, %v6711_v4, %v2506_v35  ;;  %v8118_v35 = vmov 0  }
 0x674   :  { %v2508_v5 = vpop.permute.xlu0 %2507  ;;  %v2526_v55 = vpack.c.bf16 %v2522_v19, %v2518_v42  ;;  %v2520_v11 = vmul.f32 %v8111_v62, %v2515_v63 }
 0x675   :  { %v2516_v28 = vsel %vm506_vm6, %v2508_v5, %v8109_v49  ;;  %v2510_v47 = vsel %vm506_vm6, %v6713_v51, %v2508_v5  ;;  %v4801_v49 = vld [vmem:[%s7984_s1 + $0x30] ss:$8 sps:$4 sm:$0xff]  }
 0x676   :  { %v2524_v61 = vmul.f32 %v8111_v62, %v2516_v28  ;;  %v2538_v39 = vpop.permute.xlu1 %2537  ;;  %2651 = vmatprep.subr.bf16.mxu0 %v2526_v55  ;;  %v2527_v51 = vpack.c.bf16 %v2510_v47, %v2509_v12 }
 0x677   :  { %v2551_v23 = vsel %vm537_vm7, %v2538_v39, %v8112_v2  ;;  %v2553_v41 = vsel %vm537_vm7, %v8113_v37, %v2538_v39  ;;  %2652 = vmatpush1.bf16.msra.mxu0 %v2525_v3 }
 0x678   :  { %v2540_v34 = vpop.permute.xlu0 %2539  ;;  %v2528_v26 = vpack.c.bf16 %v2524_v61, %v2520_v11  ;;  %v2557_v43 = vmul.f32 %v5507_v44, %v2553_v41  ;;  %v2558_v48 = vmul.f32 %v8116_v38, %v2551_v23 }
 0x679   :  { %v2552_v9 = vsel %vm537_vm7, %v2540_v34, %v8114_v1  ;;  %v2554_v60 = vsel %vm537_vm7, %v8115_v27, %v2540_v34 }
 0x67a   :  { %v2561_v40 = vmul.f32 %v5507_v44, %v2554_v60  ;;  %v2562_v13 = vmul.f32 %v8116_v38, %v2552_v9  ;;  %2694 = vmatprep.subr.bf16.mxu1 %v2528_v26  ;;  %v2546_v4 = vpop.permute.xlu1 %2545 }
 0x67b   :  { %v2549_v14 = vsel %vm537_vm7, %v8112_v2, %v2546_v4  ;;  %v2555_v46 = vsel %vm537_vm7, %v2546_v4, %v8113_v37  ;;  %2695 = vmatpush1.bf16.msra.mxu1 %v2527_v51 }
 0x67c   :  { %v2565_v21 = vpack.c.bf16 %v2561_v40, %v2557_v43  ;;  %v2548_v57 = vpop.permute.xlu0 %2547  ;;  %v2566_v6 = vpack.c.bf16 %v2562_v13, %v2558_v48  ;;  %v2559_v52 = vmul.f32 %v5512_v45, %v2549_v14  ;;  %v2560_v25 = vmul.f32 %v8117_v16, %v2555_v46 }
 0x67d   :  { %v2550_v8 = vsel %vm537_vm7, %v8114_v1, %v2548_v57  ;;  %v2556_v36 = vsel %vm537_vm7, %v2548_v57, %v8115_v27 }
 0x67e   :  { %v2563_v50 = vmul.f32 %v5512_v45, %v2550_v8  ;;  %v2564_v42 = vmul.f32 %v8117_v16, %v2556_v36  ;;  %2653 = vmatprep.subr.bf16.mxu0 %v2566_v6 }
 0x67f   :  { %2654 = vmatpush1.bf16.msra.mxu0 %v2565_v21 }
 0x680   :  { %v2567_v7 = vpack.c.bf16 %v2563_v50, %v2559_v52  ;;  %v2568_v19 = vpack.c.bf16 %v2564_v42, %v2560_v25 }
 0x682   :  { %2670 = vmatmul.mubr.bf16.vlgmr.msra.gmra.mrb[16].mxu0 %v4801_v49  ;;  %2696 = vmatprep.subr.bf16.mxu1 %v2568_v19 }
 0x683   :  { %2697 = vmatpush1.bf16.msra.mxu1 %v2567_v7  ;;  %2826 = vmatprep.mubr.bf16.mxu0 %v8118_v35 }
 0x686   :  { %2713 = vmatmul.mubr.bf16.vlgmr.msra.gmra.mrb[16].mxu1 %v4801_v49 }
 0x687   :  { %2869 = vmatprep.mubr.bf16.mxu1 %v8118_v35 }
 0x68b   :  { %v2618_v17 = vpop.permute.xlu1 %2617 }
 0x68d   :  { %v2623_v55 = vpop.permute.xlu0 %2622 }
 0x755   :  { %v2671_v63 = vpop.f32.mrb[16].mxu0 }
 0x756   :  { %v2672_v0 = vadd.f32 %v2671_v63, %v2618_v17  ;;  %v2673_v5 = vpop.f32.mrb[17].mxu0 }
 0x757   :  { %v2674_v3 = vadd.f32 %v2673_v5, %v2618_v17  ;;  %v2675_v28 = vpop.f32.mrb[18].mxu0 }
 0x758   :  { %v4638_v11 = vmul.f32 -1.442695, %v2672_v0  ;;  %v2676_v47 = vadd.f32 %v2675_v28, %v2623_v55  ;;  %v2677_v61 = vpop.f32.mrb[19].mxu0 }
 0x759   :  { %v4639_v39 = vmul.f32 -1.442695, %v2674_v3  ;;  %v2678_v2 = vadd.f32 %v2677_v61, %v2623_v55  ;;  %v2714_v23 = vpop.f32.mrb[16].mxu1 }
 0x75a   :  { %4909 = vpow2.f32 %v4638_v11  ;;  %v4642_v37 = vmul.f32 -1.442695, %v2676_v47  ;;  %v2715_v41 = vadd.f32 %v2714_v23, %v2618_v17  ;;  %v2716_v12 = vpop.f32.mrb[17].mxu1 }
 0x75b   :  { %4911 = vpow2.f32 %v4639_v39  ;;  %v4643_v34 = vmul.f32 -1.442695, %v2678_v2  ;;  %v2717_v26 = vadd.f32 %v2716_v12, %v2618_v17  ;;  %v2718_v51 = vpop.f32.mrb[18].mxu1 }
 0x75c   :  { %4913 = vpow2.f32 %v4642_v37  ;;  %v4640_v1 = vmul.f32 -1.442695, %v2715_v41  ;;  %v2719_v9 = vadd.f32 %v2718_v51, %v2623_v55  ;;  %v2720_v27 = vpop.f32.mrb[19].mxu1 }
 0x75d   :  { %4915 = vpow2.f32 %v4643_v34  ;;  %v4641_v60 = vmul.f32 -1.442695, %v2717_v26  ;;  %v2721_v43 = vadd.f32 %v2720_v27, %v2623_v55 }
 0x75e   :  { %4917 = vpow2.f32 %v4640_v1  ;;  %v4644_v48 = vmul.f32 -1.442695, %v2719_v9 }
 0x75f   :  { %4919 = vpow2.f32 %v4641_v60  ;;  %v4645_v40 = vmul.f32 -1.442695, %v2721_v43 }
 0x760   :  { %4921 = vpow2.f32 %v4644_v48 }
 0x761   :  { %4923 = vpow2.f32 %v4645_v40 }
 0x764   :  { %v4910_v13 = vpop.eup %4909 }
 0x765   :  { %v4912_v4 = vpop.eup %4911  ;;  %v2747_v14 = vadd.f32 1.0, %v4910_v13 }
 0x766   :  { %v4914_v46 = vpop.eup %4913  ;;  %v2748_v21 = vadd.f32 1.0, %v4912_v4 }
 0x767   :  { %v4916_v57 = vpop.eup %4915  ;;  %4925 = vrcp.f32 %v2747_v14  ;;  %v2751_v6 = vadd.f32 1.0, %v4914_v46  ;;  %v4653_v14 = vld [vmem:[%s7985_s2 + $0x40] sm:$0xff] }
 0x768   :  { %v4918_v8 = vpop.eup %4917  ;;  %4927 = vrcp.f32 %v2748_v21  ;;  %v2752_v36 = vadd.f32 1.0, %v4916_v57  ;;  %v4654_v21 = vld [vmem:[%s7985_s2 + $0x48] sm:$0xff] }
 0x769   :  { %v4920_v52 = vpop.eup %4919  ;;  %4929 = vrcp.f32 %v2751_v6  ;;  %v2749_v25 = vadd.f32 1.0, %v4918_v8 }
 0x76a   :  { %v4922_v50 = vpop.eup %4921  ;;  %4931 = vrcp.f32 %v2752_v36  ;;  %v2750_v42 = vadd.f32 1.0, %v4920_v52 }
 0x76b   :  { %v4924_v49 = vpop.eup %4923  ;;  %4933 = vrcp.f32 %v2749_v25  ;;  %v2753_v7 = vadd.f32 1.0, %v4922_v50 }
 0x76c   :  { %4935 = vrcp.f32 %v2750_v42  ;;  %v2754_v19 = vadd.f32 1.0, %v4924_v49 }
 0x76d   :  { %4937 = vrcp.f32 %v2753_v7 }
 0x76e   :  { %4939 = vrcp.f32 %v2754_v19 }
 0x771   :  { %v4926_v17 = vpop.eup %4925 }
 0x772   :  { %v4928_v63 = vpop.eup %4927  ;;  %v2771_v5 = vmul.f32 %v4926_v17, %v2672_v0 }
 0x773   :  { %v4930_v55 = vpop.eup %4929  ;;  %v6973_v39 = vmul.f32 %v4928_v63, %v2674_v3 }
 0x774   :  { %v4932_v28 = vpop.eup %4931  ;;  %v2775_v11 = vmul.f32 %v4930_v55, %v2676_v47  ;;  %2888 = vrot.lane.b32.xlu1 %v2771_v5, %s5125_s9 }
 0x775   :  { %v4934_v61 = vpop.eup %4933  ;;  %v6975_v23 = vmul.f32 %v4932_v28, %v2678_v2 }
 0x776   :  { %v4936_v37 = vpop.eup %4935  ;;  %v2773_v12 = vmul.f32 %v4934_v61, %v2715_v41  ;;  %2890 = vrot.lane.b32.xlu0 %v2775_v11, %s5125_s9  ;;  %v6978_v34 = vpack.c.bf16 %v2775_v11, %v2771_v5 }
 0x777   :  { %v4938_v51 = vpop.eup %4937  ;;  %v6982_v0 = vpack.c.bf16 %v6975_v23, %v6973_v39  ;;  %v6985_v27 = vmul.f32 %v4936_v37, %v2717_v26  ;;  %v4802_v26 = vld [vmem:[%s7987_s4 + $0x18] sm:$0xff]  }
 0x778   :  { %v4940_v1 = vpop.eup %4939  ;;  %v2777_v47 = vmul.f32 %v4938_v51, %v2719_v9  ;;  %2896 = vrot.lane.b32.xlu1 %v2773_v12, %s5125_s9 }
 0x779   :  { %v6987_v3 = vmul.f32 %v4940_v1, %v2721_v43  ;;  %2794 = vmatprep.subr.bf16.mxu0 %v6982_v0  ;;  %v4803_v43 = vld [vmem:[%s7984_s1 + $0x44] ss:$8 sps:$4 sm:$0xff]  }
 0x77a   :  { %2898 = vrot.lane.b32.xlu0 %v2777_v47, %s5125_s9  ;;  %2795 = vmatpush1.bf16.msra.mxu0 %v6978_v34  ;;  %v6992_v2 = vpack.c.bf16 %v2777_v47, %v2773_v12 }
 0x77b   :  { %v6996_v41 = vpack.c.bf16 %v6987_v3, %v6985_v27 }
 0x77c   :  { %2928 = vrot.lane.b32.xlu1 %v2771_v5, %s5126_s14 }
 0x77d   :  { %2837 = vmatprep.subr.bf16.mxu1 %v6996_v41  ;;  %4649 = vmatmul.mubr.msk.bf16.vlgmr.msra.gmra.mrb[4].mxu0 %vm617_vm0, %v4802_v26 }
 0x77e   :  { %2838 = vmatpush1.bf16.msra.mxu1 %v6992_v2  ;;  %2930 = vrot.lane.b32.xlu0 %v2775_v11, %s5126_s14 }
 0x77f   :  { %4657 = vmatprep.mubr.msk.bf16.mxu0 %vm617_vm0, %v4803_v43 }
 0x780   :  { %2936 = vrot.lane.b32.xlu1 %v2773_v12, %s5126_s14 }
 0x781   :  { %4650 = vmatmul.mubr.msk.bf16.vlgmr.msra.gmra.mrb[4].mxu1 %vm617_vm0, %v4802_v26 }
 0x782   :  { %2938 = vrot.lane.b32.xlu0 %v2777_v47, %s5126_s14  ;;  %4658 = vmatprep.mubr.msk.bf16.mxu1 %vm617_vm0, %v4803_v43 }
 0x784   :  { %2968 = vrot.lane.b32.xlu1 %v2771_v5, %s5128_s0 }
 0x786   :  { %2970 = vrot.lane.b32.xlu0 %v2775_v11, %s5128_s0 }
 0x788   :  { %2976 = vrot.lane.b32.xlu1 %v2773_v12, %s5128_s0 }
 0x78a   :  { %2978 = vrot.lane.b32.xlu0 %v2777_v47, %s5128_s0 }
 0x78c   :  { %3008 = vrot.lane.b32.xlu1 %v2771_v5, %s5129_s15 }
 0x78e   :  { %3010 = vrot.lane.b32.xlu0 %v2775_v11, %s5129_s15 }
 0x790   :  { %3016 = vrot.lane.b32.xlu1 %v2773_v12, %s5129_s15 }
 0x792   :  { %3018 = vrot.lane.b32.xlu0 %v2777_v47, %s5129_s15 }
 0x794   :  { %3052 = vrot.lane.b32.xlu1 %v2771_v5, %s5130_s16 }
 0x796   :  { %3054 = vrot.lane.b32.xlu0 %v2775_v11, %s5130_s16 }
 0x798   :  { %3060 = vrot.lane.b32.xlu1 %v2773_v12, %s5130_s16 }
 0x79a   :  { %3062 = vrot.lane.b32.xlu0 %v2777_v47, %s5130_s16 }
 0x79c   :  { %3092 = vrot.lane.b32.xlu1 %v2771_v5, %s5131_s17 }
 0x79e   :  { %3094 = vrot.lane.b32.xlu0 %v2775_v11, %s5131_s17 }
 0x7a0   :  { %3100 = vrot.lane.b32.xlu1 %v2773_v12, %s5131_s17 }
 0x7a2   :  { %3102 = vrot.lane.b32.xlu0 %v2777_v47, %s5131_s17 }
 0x7a4   :  { %3132 = vrot.lane.b32.xlu1 %v2771_v5, %s5132_s18 }
 0x7a6   :  { %3134 = vrot.lane.b32.xlu0 %v2775_v11, %s5132_s18 }
 0x7a8   :  { %3140 = vrot.lane.b32.xlu1 %v2773_v12, %s5132_s18 }
 0x7aa   :  { %3142 = vrot.lane.b32.xlu0 %v2777_v47, %s5132_s18 }
 0x7ac   :  { %3172 = vrot.lane.b32.xlu1 %v2771_v5, %s5133_s19 }
 0x7ae   :  { %3174 = vrot.lane.b32.xlu0 %v2775_v11, %s5133_s19 }
 0x7b0   :  { %3180 = vrot.lane.b32.xlu1 %v2773_v12, %s5133_s19 }
 0x7b2   :  { %3182 = vrot.lane.b32.xlu0 %v2777_v47, %s5133_s19 }
 0x7b4   :  { %2892 = vrot.lane.b32.xlu1 %v6973_v39, %s5125_s9 }
 0x7b6   :  { %2894 = vrot.lane.b32.xlu0 %v6975_v23, %s5125_s9 }
 0x7b8   :  { %2900 = vrot.lane.b32.xlu1 %v6985_v27, %s5125_s9 }
 0x7ba   :  { %2902 = vrot.lane.b32.xlu0 %v6987_v3, %s5125_s9 }
 0x7bc   :  { %2932 = vrot.lane.b32.xlu1 %v6973_v39, %s5126_s14 }
 0x7be   :  { %2934 = vrot.lane.b32.xlu0 %v6975_v23, %s5126_s14 }
 0x7c0   :  { %2940 = vrot.lane.b32.xlu1 %v6985_v27, %s5126_s14 }
 0x7c2   :  { %2942 = vrot.lane.b32.xlu0 %v6987_v3, %s5126_s14 }
 0x7c4   :  { %2972 = vrot.lane.b32.xlu1 %v6973_v39, %s5128_s0 }
 0x7c6   :  { %2974 = vrot.lane.b32.xlu0 %v6975_v23, %s5128_s0 }
 0x7c8   :  { %2980 = vrot.lane.b32.xlu1 %v6985_v27, %s5128_s0 }
 0x7ca   :  { %2982 = vrot.lane.b32.xlu0 %v6987_v3, %s5128_s0 }
 0x7cc   :  { %3012 = vrot.lane.b32.xlu1 %v6973_v39, %s5129_s15 }
 0x7ce   :  { %3014 = vrot.lane.b32.xlu0 %v6975_v23, %s5129_s15 }
 0x7d0   :  { %3020 = vrot.lane.b32.xlu1 %v6985_v27, %s5129_s15 }
 0x7d2   :  { %3022 = vrot.lane.b32.xlu0 %v6987_v3, %s5129_s15 }
 0x7d4   :  { %3056 = vrot.lane.b32.xlu1 %v6973_v39, %s5130_s16 }
 0x7d6   :  { %3058 = vrot.lane.b32.xlu0 %v6975_v23, %s5130_s16 }
 0x7d8   :  { %3064 = vrot.lane.b32.xlu1 %v6985_v27, %s5130_s16 }
 0x7da   :  { %3066 = vrot.lane.b32.xlu0 %v6987_v3, %s5130_s16 }
 0x7dc   :  { %3096 = vrot.lane.b32.xlu1 %v6973_v39, %s5131_s17 }
 0x7de   :  { %3098 = vrot.lane.b32.xlu0 %v6975_v23, %s5131_s17 }
 0x7e0   :  { %3104 = vrot.lane.b32.xlu1 %v6985_v27, %s5131_s17 }
 0x7e2   :  { %3106 = vrot.lane.b32.xlu0 %v6987_v3, %s5131_s17 }
 0x7e4   :  { %3136 = vrot.lane.b32.xlu1 %v6973_v39, %s5132_s18 }
 0x7e6   :  { %3138 = vrot.lane.b32.xlu0 %v6975_v23, %s5132_s18  ;;  %v2889_v9 = vpop.permute.xlu1 %2888 }
 0x7e8   :  { %v2891_v60 = vpop.permute.xlu0 %2890  ;;  %3144 = vrot.lane.b32.xlu1 %v6985_v27, %s5132_s18 }
 0x7ea   :  { %3146 = vrot.lane.b32.xlu0 %v6987_v3, %s5132_s18  ;;  %v2897_v48 = vpop.permute.xlu1 %2896 }
 0x7ec   :  { %v2899_v40 = vpop.permute.xlu0 %2898  ;;  %3176 = vrot.lane.b32.xlu1 %v6973_v39, %s5133_s19 }
 0x7ee   :  { %3178 = vrot.lane.b32.xlu0 %v6975_v23, %s5133_s19  ;;  %v7098_v13 = vpop.permute.xlu1 %2928 }
 0x7f0   :  { %v7100_v4 = vpop.permute.xlu0 %2930  ;;  %3184 = vrot.lane.b32.xlu1 %v6985_v27, %s5133_s19 }
 0x7f2   :  { %3186 = vrot.lane.b32.xlu0 %v6987_v3, %s5133_s19  ;;  %v7109_v46 = vpop.permute.xlu1 %2936 }
 0x7f4   :  { %v7114_v57 = vpop.permute.xlu0 %2938  ;;  %3256 = vperm.xlu1 %4785, %v4653_v14  }
 0x7f6   :  { %3261 = vperm.xlu0 %4784, %v4654_v21   ;;  %v7116_v6 = vpop.permute.xlu1 %2968 }
 0x7f8   :  { %v7118_v8 = vpop.permute.xlu0 %2970 }
 0x7fa   :  { %v7120_v36 = vpop.permute.xlu1 %2976 }
 0x7fc   :  { %v7122_v52 = vpop.permute.xlu0 %2978 }
 0x7fe   :  { %v7124_v25 = vpop.permute.xlu1 %3008 }
 0x800   :  { %v7126_v50 = vpop.permute.xlu0 %3010 }
 0x802   :  { %v7128_v42 = vpop.permute.xlu1 %3016 }
 0x804   :  { %v7130_v49 = vpop.permute.xlu0 %3018 }
 0x806   :  { %v7132_v7 = vpop.permute.xlu1 %3052 }
 0x808   :  { %v7134_v19 = vpop.permute.xlu0 %3054 }
 0x80a   :  { %v7136_v17 = vpop.permute.xlu1 %3060 }
 0x80c   :  { %v7138_v63 = vpop.permute.xlu0 %3062 }
 0x80e   :  { %v7140_v5 = vpop.permute.xlu1 %3092 }
 0x810   :  { %v7142_v55 = vpop.permute.xlu0 %3094 }
 0x812   :  { %v7144_v28 = vpop.permute.xlu1 %3100 }
 0x814   :  { %v7146_v11 = vpop.permute.xlu0 %3102 }
 0x816   :  { %v7148_v61 = vpop.permute.xlu1 %3132 }
 0x817   :  { %8119 = vst [vmem:[#allocation10_spill] sm:$0xff] %v7148_v61 }
 0x818   :  { %v7150_v39 = vpop.permute.xlu0 %3134 }
 0x819   :  { %8120 = vst [vmem:[#allocation9_spill] sm:$0xff] %v7150_v39 }
 0x81a   :  { %v7152_v23 = vpop.permute.xlu1 %3140 }
 0x81c   :  { %v7154_v37 = vpop.permute.xlu0 %3142 }
 0x81e   :  { %v7156_v12 = vpop.permute.xlu1 %3172 }
 0x81f   :  { %8121 = vst [vmem:[#allocation12_spill] sm:$0xff] %v7156_v12 }
 0x820   :  { %v7158_v51 = vpop.permute.xlu0 %3174 }
 0x821   :  { %8122 = vst [vmem:[#allocation14_spill] sm:$0xff] %v7158_v51 }
 0x822   :  { %v7160_v1 = vpop.permute.xlu1 %3180 }
 0x823   :  { %8123 = vst [vmem:[#allocation11_spill] sm:$0xff] %v7160_v1 }
 0x824   :  { %v7162_v47 = vpop.permute.xlu0 %3182 }
 0x825   :  { %8124 = vst [vmem:[#allocation13_spill] sm:$0xff] %v7162_v47 }
 0x826   :  { %v2893_v27 = vpop.permute.xlu1 %2892 }
 0x827   :  { %v2908_v3 = vsel %vm312_vm9, %v2889_v9, %v2893_v27  ;;  %v2906_v47 = vsel %vm312_vm9, %v2893_v27, %v2897_v48 }
 0x828   :  { %v2895_v26 = vpop.permute.xlu0 %2894  ;;  %v2913_v14 = vmul.f32 %v5353_v30, %v2908_v3 }
 0x829   :  { %v2909_v43 = vsel %vm312_vm9, %v2891_v60, %v2895_v26  ;;  %v2907_v21 = vsel %vm312_vm9, %v2895_v26, %v2899_v40 }
 0x82a   :  { %v2917_v35 = vmul.f32 %v5353_v30, %v2909_v43  ;;  %v2901_v16 = vpop.permute.xlu1 %2900  ;;  %v2918_v62 = vmul.f32 %v5364_v33, %v2907_v21 }
 0x82b   :  { %v2904_v38 = vsel %vm312_vm9, %v2897_v48, %v2901_v16  ;;  %v2910_v51 = vsel %vm312_vm9, %v2901_v16, %v2889_v9 }
 0x82c   :  { %v2903_v12 = vpop.permute.xlu0 %2902  ;;  %v2921_v1 = vpack.c.bf16 %v2917_v35, %v2913_v14  ;;  %v2912_v43 = vmul.f32 %v5361_v32, %v2910_v51  ;;  %v2915_v61 = vmul.f32 %v5358_v31, %v2904_v38  ;;  %v2914_v35 = vmul.f32 %v5364_v33, %v2906_v47 }
 0x82d   :  { %v2905_v3 = vsel %vm312_vm9, %v2899_v40, %v2903_v12  ;;  %v2911_v26 = vsel %vm312_vm9, %v2903_v12, %v2891_v60 }
 0x82e   :  { %v2916_v39 = vmul.f32 %v5361_v32, %v2911_v26  ;;  %v2919_v16 = vmul.f32 %v5358_v31, %v2905_v3  ;;  %v2933_v9 = vpop.permute.xlu1 %2932  ;;  %3276 = vmatprep.subr.bf16.mxu0 %v2921_v1  ;;  %v2922_v21 = vpack.c.bf16 %v2918_v62, %v2914_v35 }
 0x82f   :  { %v2948_v60 = vsel %vm343_vm10, %v7098_v13, %v2933_v9  ;;  %v2946_v12 = vsel %vm343_vm10, %v2933_v9, %v7109_v46 }
 0x830   :  { %v2920_v48 = vpack.c.bf16 %v2916_v39, %v2912_v43  ;;  %v2935_v27 = vpop.permute.xlu0 %2934  ;;  %v2923_v14 = vpack.c.bf16 %v2919_v16, %v2915_v61  ;;  %v2954_v47 = vmul.f32 %v5386_v54, %v2946_v12 }
 0x831   :  { %v2947_v38 = vsel %vm343_vm10, %v2935_v27, %v7114_v57  ;;  %v2949_v40 = vsel %vm343_vm10, %v7100_v4, %v2935_v27 }
 0x832   :  { %3319 = vmatprep.subr.bf16.mxu1 %v2923_v14  ;;  %v2941_v39 = vpop.permute.xlu1 %2940  ;;  %3277 = vmatpush1.bf16.msra.mxu0 %v2920_v48  ;;  %v2961_v62 = vpack.c.bf16 %v2949_v40, %v2948_v60  ;;  %v2958_v61 = vmul.f32 %v5386_v54, %v2947_v38 }
 0x833   :  { %v2950_v51 = vsel %vm343_vm10, %v2941_v39, %v7098_v13  ;;  %3320 = vmatpush1.bf16.msra.mxu1 %v2922_v21  ;;  %v2944_v3 = vsel %vm343_vm10, %v7109_v46, %v2941_v39 }
 0x834   :  { %v2943_v1 = vpop.permute.xlu0 %2942  ;;  %3278 = vmatprep.subr.bf16.mxu0 %v2961_v62  ;;  %v2952_v16 = vmul.f32 %v5393_v56, %v2950_v51  ;;  %v2962_v48 = vpack.c.bf16 %v2958_v61, %v2954_v47 }
 0x835   :  { %v2945_v26 = vsel %vm343_vm10, %v7114_v57, %v2943_v1  ;;  %v2951_v43 = vsel %vm343_vm10, %v2943_v1, %v7100_v4 }
 0x836   :  { %v2956_v13 = vmul.f32 %v5393_v56, %v2951_v43  ;;  %v2973_v9 = vpop.permute.xlu1 %2972  ;;  %v2963_v35 = vpack.c.bf16 %v2945_v26, %v2944_v3 }
 0x837   :  { %v2988_v27 = vsel %vm374_vm1, %v7116_v6, %v2973_v9  ;;  %v2986_v39 = vsel %vm374_vm1, %v2973_v9, %v7120_v36 }
 0x838   :  { %v2960_v46 = vpack.c.bf16 %v2956_v13, %v2952_v16  ;;  %v2975_v14 = vpop.permute.xlu0 %2974  ;;  %3321 = vmatprep.subr.bf16.mxu1 %v2963_v35  ;;  %v2993_v4 = vmul.f32 %v5437_v18, %v2988_v27  ;;  %v2994_v16 = vmul.f32 %v5443_v29, %v2986_v39 }
 0x839   :  { %v2989_v57 = vsel %vm374_vm1, %v7118_v8, %v2975_v14  ;;  %3322 = vmatpush1.bf16.msra.mxu1 %v2962_v48  ;;  %v2987_v21 = vsel %vm374_vm1, %v2975_v14, %v7122_v52 }
 0x83a   :  { %v2997_v60 = vmul.f32 %v5437_v18, %v2989_v57  ;;  %v2981_v38 = vpop.permute.xlu1 %2980  ;;  %3279 = vmatpush1.bf16.msra.mxu0 %v2960_v46  ;;  %v2998_v51 = vmul.f32 %v5443_v29, %v2987_v21 }
 0x83b   :  { %v2984_v40 = vsel %vm374_vm1, %v7120_v36, %v2981_v38  ;;  %v2990_v12 = vsel %vm374_vm1, %v2981_v38, %v7116_v6 }
 0x83c   :  { %v2983_v62 = vpop.permute.xlu0 %2982  ;;  %v3001_v61 = vpack.c.bf16 %v2997_v60, %v2993_v4  ;;  %v2992_v3 = vmul.f32 %v5440_v20, %v2990_v12  ;;  %v2995_v6 = vmul.f32 %v5448_v22, %v2984_v40 }
 0x83d   :  { %v2985_v1 = vsel %vm374_vm1, %v7122_v52, %v2983_v62  ;;  %v2991_v47 = vsel %vm374_vm1, %v2983_v62, %v7118_v8  ;;  %v3002_v8 = vpack.c.bf16 %v2998_v51, %v2994_v16 }
 0x83e   :  { %v2996_v26 = vmul.f32 %v5440_v20, %v2991_v47  ;;  %v2999_v36 = vmul.f32 %v5448_v22, %v2985_v1  ;;  %v3013_v43 = vpop.permute.xlu1 %3012  ;;  %3280 = vmatprep.subr.bf16.mxu0 %v3001_v61 }
 0x83f   :  { %v3028_v52 = vsel %vm405_vm3, %v7124_v25, %v3013_v43  ;;  %v3026_v60 = vsel %vm405_vm3, %v3013_v43, %v7128_v42 }
 0x840   :  { %v3000_v13 = vpack.c.bf16 %v2996_v26, %v2992_v3  ;;  %v3015_v9 = vpop.permute.xlu0 %3014  ;;  %v3003_v35 = vpack.c.bf16 %v2999_v36, %v2995_v6  ;;  %v3033_v27 = vmul.f32 %v5353_v30, %v3028_v52  ;;  %v3034_v47 = vmul.f32 %v5477_v59, %v3026_v60 }
 0x841   :  { %v3029_v48 = vsel %vm405_vm3, %v7126_v50, %v3015_v9  ;;  %v3027_v46 = vsel %vm405_vm3, %v3015_v9, %v7130_v49 }
 0x842   :  { %v3037_v14 = vmul.f32 %v5353_v30, %v3029_v48  ;;  %3323 = vmatprep.subr.bf16.mxu1 %v3003_v35  ;;  %v3021_v57 = vpop.permute.xlu1 %3020  ;;  %3281 = vmatpush1.bf16.msra.mxu0 %v3000_v13  ;;  %v3038_v12 = vmul.f32 %v5477_v59, %v3027_v46 }
 0x843   :  { %v3024_v4 = vsel %vm405_vm3, %v7128_v42, %v3021_v57  ;;  %v3030_v21 = vsel %vm405_vm3, %v3021_v57, %v7124_v25  ;;  %3324 = vmatpush1.bf16.msra.mxu1 %v3002_v8 }
 0x844   :  { %v3023_v38 = vpop.permute.xlu0 %3022  ;;  %v3041_v40 = vpack.c.bf16 %v3037_v14, %v3033_v27  ;;  %v3032_v61 = vmul.f32 %v5472_v58, %v3030_v21  ;;  %v3035_v25 = vmul.f32 %v5358_v31, %v3024_v4 }
 0x845   :  { %v3025_v39 = vsel %vm405_vm3, %v7130_v49, %v3023_v38  ;;  %v3031_v62 = vsel %vm405_vm3, %v3023_v38, %v7126_v50  ;;  %v3042_v50 = vpack.c.bf16 %v3038_v12, %v3034_v47 }
 0x846   :  { %v3036_v51 = vmul.f32 %v5472_v58, %v3031_v62  ;;  %v3039_v42 = vmul.f32 %v5358_v31, %v3025_v39  ;;  %v3057_v1 = vpop.permute.xlu1 %3056  ;;  %3282 = vmatprep.subr.bf16.mxu0 %v3041_v40 }
 0x847   :  { %v3070_v49 = vsel %vm444_vm2, %v3057_v1, %v7136_v17  ;;  %v3072_v16 = vsel %vm444_vm2, %v7132_v7, %v3057_v1 }
 0x848   :  { %v3040_v3 = vpack.c.bf16 %v3036_v51, %v3032_v61  ;;  %v3059_v6 = vpop.permute.xlu0 %3058  ;;  %v3043_v26 = vpack.c.bf16 %v3039_v42, %v3035_v25  ;;  %v3077_v52 = vmul.f32 %v5437_v18, %v3070_v49  ;;  %v3076_v14 = vmul.f32 %v5507_v44, %v3072_v16 }
 0x849   :  { %v3071_v36 = vsel %vm444_vm2, %v3059_v6, %v7138_v63  ;;  %v3073_v43 = vsel %vm444_vm2, %v7134_v19, %v3059_v6 }
 0x84a   :  { %v3081_v13 = vmul.f32 %v5437_v18, %v3071_v36  ;;  %3325 = vmatprep.subr.bf16.mxu1 %v3043_v26  ;;  %v3065_v9 = vpop.permute.xlu1 %3064  ;;  %3283 = vmatpush1.bf16.msra.mxu0 %v3040_v3  ;;  %v3080_v48 = vmul.f32 %v5507_v44, %v3073_v43 }
 0x84b   :  { %v3068_v35 = vsel %vm444_vm2, %v7136_v17, %v3065_v9  ;;  %v3074_v8 = vsel %vm444_vm2, %v3065_v9, %v7132_v7  ;;  %3284 = vmatprep.subr.bf16.mxu0 %v6982_v0  ;;  %3326 = vmatpush1.bf16.msra.mxu1 %v3042_v50 }
 0x84c   :  { %v3067_v27 = vpop.permute.xlu0 %3066  ;;  %3327 = vmatprep.subr.bf16.mxu1 %v6996_v41  ;;  %v3085_v46 = vpack.c.bf16 %v3081_v13, %v3077_v52  ;;  %v3078_v7 = vmul.f32 %v5512_v45, %v3068_v35  ;;  %v3079_v0 = vmul.f32 %v5448_v22, %v3074_v8  ;;  %v8125_v35 = vld [vmem:[#allocation9_spill] sm:$0xff] }
 0x84d   :  { %v3069_v57 = vsel %vm444_vm2, %v7138_v63, %v3067_v27  ;;  %v3075_v17 = vsel %vm444_vm2, %v3067_v27, %v7134_v19  ;;  %v3084_v19 = vpack.c.bf16 %v3080_v48, %v3076_v14 }
 0x84e   :  { %v3082_v4 = vmul.f32 %v5512_v45, %v3069_v57  ;;  %v3083_v21 = vmul.f32 %v5448_v22, %v3075_v17  ;;  %v3097_v41 = vpop.permute.xlu1 %3096  ;;  %3285 = vmatpush1.bf16.msra.mxu0 %v6978_v34 }
 0x84f   :  { %v3110_v60 = vsel %vm475_vm11, %v3097_v41, %v7144_v28  ;;  %v3112_v63 = vsel %vm475_vm11, %v7140_v5, %v3097_v41  ;;  %3286 = vmatprep.subr.bf16.mxu0 %v3085_v46  ;;  %3328 = vmatpush1.bf16.msra.mxu1 %v6992_v2  ;;  %v8126_v46 = vld [vmem:[#allocation10_spill] sm:$0xff] }
 0x850   :  { %v3086_v38 = vpack.c.bf16 %v3082_v4, %v3078_v7  ;;  %v3099_v40 = vpop.permute.xlu0 %3098  ;;  %v3087_v12 = vpack.c.bf16 %v3083_v21, %v3079_v0  ;;  %v3116_v39 = vmul.f32 %v5472_v58, %v3112_v63  ;;  %v3117_v61 = vmul.f32 %v5548_v15, %v3110_v60  ;;  %v8127_v21 = vld [vmem:[#allocation6_spill] sm:$0xff] }
 0x851   :  { %v3111_v34 = vsel %vm475_vm11, %v3099_v40, %v7146_v11  ;;  %v3113_v62 = vsel %vm475_vm11, %v7142_v55, %v3099_v40 }
 0x852   :  { %v3120_v25 = vmul.f32 %v5472_v58, %v3113_v62  ;;  %v3121_v2 = vmul.f32 %v5548_v15, %v3111_v34  ;;  %3329 = vmatprep.subr.bf16.mxu1 %v3087_v12  ;;  %v3105_v51 = vpop.permute.xlu1 %3104  ;;  %3287 = vmatpush1.bf16.msra.mxu0 %v3084_v19  ;;  %v8129_v12 = vld [vmem:[#allocation12_spill] sm:$0xff] }
 0x853   :  { %v3108_v42 = vsel %vm475_vm11, %v7144_v28, %v3105_v51  ;;  %v3114_v1 = vsel %vm475_vm11, %v3105_v51, %v7140_v5  ;;  %3330 = vmatpush1.bf16.msra.mxu1 %v3086_v38  ;;  %v8128_v38 = vld [vmem:[#allocation11_spill] sm:$0xff]  ;;  %v8131_v51 = vld [vmem:[#allocation14_spill] sm:$0xff] }
 0x854   :  { %v3124_v47 = vpack.c.bf16 %v3120_v25, %v3116_v39  ;;  %v3107_v49 = vpop.permute.xlu0 %3106  ;;  %v3125_v3 = vpack.c.bf16 %v3121_v2, %v3117_v61  ;;  %v3118_v50 = vmul.f32 %v5477_v59, %v3108_v42  ;;  %v3119_v28 = vmul.f32 %v5555_v24, %v3114_v1  ;;  %v8130_v25 = vld [vmem:[#allocation13_spill] sm:$0xff] }
 0x855   :  { %v3109_v6 = vsel %vm475_vm11, %v7146_v11, %v3107_v49  ;;  %v3115_v26 = vsel %vm475_vm11, %v3107_v49, %v7142_v55 }
 0x856   :  { %v3122_v36 = vmul.f32 %v5477_v59, %v3109_v6  ;;  %v3123_v5 = vmul.f32 %v5555_v24, %v3115_v26  ;;  %v3137_v43 = vpop.permute.xlu1 %3136  ;;  %3288 = vmatprep.subr.bf16.mxu0 %v3125_v3 }
 0x857   :  { %v3150_v16 = vsel %vm506_vm6, %v3137_v43, %v7152_v23  ;;  %3289 = vmatpush1.bf16.msra.mxu0 %v3124_v47  ;;  %v3152_v57 = vsel %vm506_vm6, %v8126_v46, %v3137_v43  ;;  %v8132_v47 = vld [vmem:[#allocation7_spill] sm:$0xff] }
 0x858   :  { %v3126_v11 = vpack.c.bf16 %v3122_v36, %v3118_v50  ;;  %v3139_v52 = vpop.permute.xlu0 %3138  ;;  %v3127_v13 = vpack.c.bf16 %v3123_v5, %v3119_v28  ;;  %v3157_v9 = vmul.f32 %v5580_v53, %v3150_v16 }
 0x859   :  { %v3151_v55 = vsel %vm506_vm6, %v3139_v52, %v7154_v37  ;;  %v3153_v8 = vsel %vm506_vm6, %v8125_v35, %v3139_v52  ;;  %v8133_v52 = vld [vmem:[#allocation8_spill] sm:$0xff] }
 0x85a   :  { %v3161_v48 = vmul.f32 %v5580_v53, %v3151_v55  ;;  %3331 = vmatprep.subr.bf16.mxu1 %v3127_v13  ;;  %v3145_v27 = vpop.permute.xlu1 %3144  ;;  %v3164_v0 = vpack.c.bf16 %v3153_v8, %v3152_v57 }
 0x85b   :  { %v3154_v14 = vsel %vm506_vm6, %v3145_v27, %v8126_v46  ;;  %3332 = vmatpush1.bf16.msra.mxu1 %v3126_v11  ;;  %v3148_v34 = vsel %vm506_vm6, %v7152_v23, %v3145_v27  ;;  %v8134_v27 = vmov 0  }
 0x85c   :  { %v3147_v17 = vpop.permute.xlu0 %3146  ;;  %v3165_v7 = vpack.c.bf16 %v3161_v48, %v3157_v9  ;;  %v3159_v41 = vmul.f32 %v8127_v21, %v3154_v14 }
 0x85d   :  { %v3155_v4 = vsel %vm506_vm6, %v3147_v17, %v8125_v35  ;;  %v3149_v60 = vsel %vm506_vm6, %v7154_v37, %v3147_v17  ;;  %v4805_v35 = vld [vmem:[%s7984_s1 + $0x40] ss:$8 sps:$4 sm:$0xff]  }
 0x85e   :  { %v3163_v63 = vmul.f32 %v8127_v21, %v3155_v4  ;;  %v3177_v19 = vpop.permute.xlu1 %3176  ;;  %3290 = vmatprep.subr.bf16.mxu0 %v3165_v7  ;;  %v3166_v37 = vpack.c.bf16 %v3149_v60, %v3148_v34 }
 0x85f   :  { %v3190_v40 = vsel %vm537_vm7, %v3177_v19, %v8128_v38  ;;  %v3192_v39 = vsel %vm537_vm7, %v8129_v12, %v3177_v19  ;;  %3291 = vmatpush1.bf16.msra.mxu0 %v3164_v0 }
 0x860   :  { %v3179_v62 = vpop.permute.xlu0 %3178  ;;  %v3167_v61 = vpack.c.bf16 %v3163_v63, %v3159_v41  ;;  %v3196_v1 = vmul.f32 %v5507_v44, %v3192_v39  ;;  %v3197_v49 = vmul.f32 %v8132_v47, %v3190_v40 }
 0x861   :  { %v3191_v2 = vsel %vm537_vm7, %v3179_v62, %v8130_v25  ;;  %v3193_v42 = vsel %vm537_vm7, %v8131_v51, %v3179_v62 }
 0x862   :  { %v3200_v3 = vmul.f32 %v5507_v44, %v3193_v42  ;;  %v3201_v6 = vmul.f32 %v8132_v47, %v3191_v2  ;;  %3333 = vmatprep.subr.bf16.mxu1 %v3167_v61  ;;  %v3185_v23 = vpop.permute.xlu1 %3184 }
 0x863   :  { %v3188_v26 = vsel %vm537_vm7, %v8128_v38, %v3185_v23  ;;  %v3194_v50 = vsel %vm537_vm7, %v3185_v23, %v8129_v12  ;;  %3334 = vmatpush1.bf16.msra.mxu1 %v3166_v37 }
 0x864   :  { %v3204_v28 = vpack.c.bf16 %v3200_v3, %v3196_v1  ;;  %v3187_v36 = vpop.permute.xlu0 %3186  ;;  %v3205_v5 = vpack.c.bf16 %v3201_v6, %v3197_v49  ;;  %v3198_v11 = vmul.f32 %v5512_v45, %v3188_v26  ;;  %v3199_v13 = vmul.f32 %v8133_v52, %v3194_v50 }
 0x865   :  { %v3189_v43 = vsel %vm537_vm7, %v8130_v25, %v3187_v36  ;;  %v3195_v16 = vsel %vm537_vm7, %v3187_v36, %v8131_v51 }
 0x866   :  { %v3202_v55 = vmul.f32 %v5512_v45, %v3189_v43  ;;  %v3203_v9 = vmul.f32 %v8133_v52, %v3195_v16  ;;  %3292 = vmatprep.subr.bf16.mxu0 %v3205_v5 }
 0x867   :  { %3293 = vmatpush1.bf16.msra.mxu0 %v3204_v28 }
 0x868   :  { %v3206_v8 = vpack.c.bf16 %v3202_v55, %v3198_v11  ;;  %v3207_v48 = vpack.c.bf16 %v3203_v9, %v3199_v13 }
 0x86a   :  { %3309 = vmatmul.mubr.bf16.vlgmr.msra.gmra.mrb[20].mxu0 %v4805_v35  ;;  %3335 = vmatprep.subr.bf16.mxu1 %v3207_v48 }
 0x86b   :  { %3336 = vmatpush1.bf16.msra.mxu1 %v3206_v8  ;;  %3465 = vmatprep.mubr.bf16.mxu0 %v8134_v27 }
 0x86e   :  { %3352 = vmatmul.mubr.bf16.vlgmr.msra.gmra.mrb[20].mxu1 %v4805_v35 }
 0x86f   :  { %3508 = vmatprep.mubr.bf16.mxu1 %v8134_v27 }
 0x873   :  { %v3257_v46 = vpop.permute.xlu1 %3256 }
 0x875   :  { %v3262_v7 = vpop.permute.xlu0 %3261 }
 0x93d   :  { %v3310_v14 = vpop.f32.mrb[20].mxu0 }
 0x93e   :  { %v3311_v57 = vadd.f32 %v3310_v14, %v3257_v46  ;;  %v3312_v17 = vpop.f32.mrb[21].mxu0 }
 0x93f   :  { %v3313_v0 = vadd.f32 %v3312_v17, %v3257_v46  ;;  %v3314_v4 = vpop.f32.mrb[22].mxu0 }
 0x940   :  { %v4659_v41 = vmul.f32 -1.442695, %v3311_v57  ;;  %v3315_v60 = vadd.f32 %v3314_v4, %v3262_v7  ;;  %v3316_v63 = vpop.f32.mrb[23].mxu0 }
 0x941   :  { %v4660_v19 = vmul.f32 -1.442695, %v3313_v0  ;;  %v3317_v38 = vadd.f32 %v3316_v63, %v3262_v7  ;;  %v3353_v40 = vpop.f32.mrb[20].mxu1 }
 0x942   :  { %4941 = vpow2.f32 %v4659_v41  ;;  %v4663_v12 = vmul.f32 -1.442695, %v3315_v60  ;;  %v3354_v39 = vadd.f32 %v3353_v40, %v3257_v46  ;;  %v3355_v34 = vpop.f32.mrb[21].mxu1 }
 0x943   :  { %4943 = vpow2.f32 %v4660_v19  ;;  %v4664_v62 = vmul.f32 -1.442695, %v3317_v38  ;;  %v3356_v61 = vadd.f32 %v3355_v34, %v3257_v46  ;;  %v3357_v37 = vpop.f32.mrb[22].mxu1 }
 0x944   :  { %4945 = vpow2.f32 %v4663_v12  ;;  %v4661_v25 = vmul.f32 -1.442695, %v3354_v39  ;;  %v3358_v2 = vadd.f32 %v3357_v37, %v3262_v7  ;;  %v3359_v51 = vpop.f32.mrb[23].mxu1 }
 0x945   :  { %4947 = vpow2.f32 %v4664_v62  ;;  %v4662_v42 = vmul.f32 -1.442695, %v3356_v61  ;;  %v3360_v1 = vadd.f32 %v3359_v51, %v3262_v7 }
 0x946   :  { %4949 = vpow2.f32 %v4661_v25  ;;  %v4665_v49 = vmul.f32 -1.442695, %v3358_v2 }
 0x947   :  { %4951 = vpow2.f32 %v4662_v42  ;;  %v4666_v3 = vmul.f32 -1.442695, %v3360_v1 }
 0x948   :  { %4953 = vpow2.f32 %v4665_v49 }
 0x949   :  { %4955 = vpow2.f32 %v4666_v3 }
 0x94c   :  { %v4942_v6 = vpop.eup %4941 }
 0x94d   :  { %v4944_v23 = vpop.eup %4943  ;;  %v3386_v26 = vadd.f32 1.0, %v4942_v6 }
 0x94e   :  { %v4946_v50 = vpop.eup %4945  ;;  %v3387_v28 = vadd.f32 1.0, %v4944_v23 }
 0x94f   :  { %v4948_v36 = vpop.eup %4947  ;;  %4957 = vrcp.f32 %v3386_v26  ;;  %v3390_v5 = vadd.f32 1.0, %v4946_v50  ;;  %v4674_v26 = vld [vmem:[%s7985_s2 + $0x50] sm:$0xff] }
 0x950   :  { %v4950_v43 = vpop.eup %4949  ;;  %4959 = vrcp.f32 %v3387_v28  ;;  %v3391_v16 = vadd.f32 1.0, %v4948_v36  ;;  %v4675_v28 = vld [vmem:[%s7985_s2 + $0x58] sm:$0xff] }
 0x951   :  { %v4952_v11 = vpop.eup %4951  ;;  %4961 = vrcp.f32 %v3390_v5  ;;  %v3388_v13 = vadd.f32 1.0, %v4950_v43  ;;  %v4166_v5 = vld [vmem:[%s7988_s5] sm:$0xff] }
 0x952   :  { %v4954_v55 = vpop.eup %4953  ;;  %4963 = vrcp.f32 %v3391_v16  ;;  %v3389_v9 = vadd.f32 1.0, %v4952_v11  ;;  %v4167_v16 = vld [vmem:[%s7988_s5 + $0x8] sm:$0xff] }
 0x953   :  { %v4956_v35 = vpop.eup %4955  ;;  %4965 = vrcp.f32 %v3388_v13  ;;  %v3392_v8 = vadd.f32 1.0, %v4954_v55  ;;  %v4250_v13 = vld [vmem:[%s7990_s7] sm:$0xff] }
 0x954   :  { %4967 = vrcp.f32 %v3389_v9  ;;  %v3393_v48 = vadd.f32 1.0, %v4956_v35  ;;  %v4251_v9 = vld [vmem:[%s7990_s7 + $0x8] sm:$0xff] }
 0x955   :  { %4969 = vrcp.f32 %v3392_v8  ;;  %v4252_v8 = vld [vmem:[%s7990_s7 + $0x10] sm:$0xff] }
 0x956   :  { %4971 = vrcp.f32 %v3393_v48 }
 0x959   :  { %v4958_v46 = vpop.eup %4957 }
 0x95a   :  { %v4960_v14 = vpop.eup %4959  ;;  %v3410_v17 = vmul.f32 %v4958_v46, %v3311_v57  ;;  %v4253_v46 = vld [vmem:[%s7990_s7 + $0x18] sm:$0xff] }
 0x95b   :  { %v4962_v7 = vpop.eup %4961  ;;  %v7414_v19 = vmul.f32 %v4960_v14, %v3313_v0 }
 0x95c   :  { %v4964_v4 = vpop.eup %4963  ;;  %v3414_v41 = vmul.f32 %v4962_v7, %v3315_v60  ;;  %3527 = vrot.lane.b32.xlu1 %v3410_v17, %s5125_s9 }
 0x95d   :  { %v4966_v63 = vpop.eup %4965  ;;  %v7416_v40 = vmul.f32 %v4964_v4, %v3317_v38 }
 0x95e   :  { %v4968_v12 = vpop.eup %4967  ;;  %v3412_v34 = vmul.f32 %v4966_v63, %v3354_v39  ;;  %3529 = vrot.lane.b32.xlu0 %v3414_v41, %s5125_s9  ;;  %v7419_v62 = vpack.c.bf16 %v3414_v41, %v3410_v17 }
 0x95f   :  { %v4970_v37 = vpop.eup %4969  ;;  %v7423_v57 = vpack.c.bf16 %v7416_v40, %v7414_v19  ;;  %v7426_v51 = vmul.f32 %v4968_v12, %v3356_v61  ;;  %v4806_v61 = vld [vmem:[%s7987_s4 + $0x20] sm:$0xff]  }
 0x960   :  { %v4972_v25 = vpop.eup %4971  ;;  %v3416_v60 = vmul.f32 %v4970_v37, %v3358_v2  ;;  %3535 = vrot.lane.b32.xlu1 %v3412_v34, %s5125_s9 }
 0x961   :  { %v7428_v0 = vmul.f32 %v4972_v25, %v3360_v1  ;;  %3433 = vmatprep.subr.bf16.mxu0 %v7423_v57  ;;  %v4807_v1 = vld [vmem:[%s7984_s1 + $0x54] ss:$8 sps:$4 sm:$0xff]  }
 0x962   :  { %3537 = vrot.lane.b32.xlu0 %v3416_v60, %s5125_s9  ;;  %3434 = vmatpush1.bf16.msra.mxu0 %v7419_v62  ;;  %v7433_v38 = vpack.c.bf16 %v3416_v60, %v3412_v34 }
 0x963   :  { %v7437_v39 = vpack.c.bf16 %v7428_v0, %v7426_v51 }
 0x964   :  { %3567 = vrot.lane.b32.xlu1 %v3410_v17, %s5126_s14 }
 0x965   :  { %3476 = vmatprep.subr.bf16.mxu1 %v7437_v39  ;;  %4670 = vmatmul.mubr.msk.bf16.vlgmr.msra.gmra.mrb[4].mxu0 %vm617_vm0, %v4806_v61 }
 0x966   :  { %3477 = vmatpush1.bf16.msra.mxu1 %v7433_v38  ;;  %3569 = vrot.lane.b32.xlu0 %v3414_v41, %s5126_s14 }
 0x967   :  { %4678 = vmatprep.mubr.msk.bf16.mxu0 %vm617_vm0, %v4807_v1 }
 0x968   :  { %3575 = vrot.lane.b32.xlu1 %v3412_v34, %s5126_s14 }
 0x969   :  { %4671 = vmatmul.mubr.msk.bf16.vlgmr.msra.gmra.mrb[4].mxu1 %vm617_vm0, %v4806_v61 }
 0x96a   :  { %3577 = vrot.lane.b32.xlu0 %v3416_v60, %s5126_s14  ;;  %4679 = vmatprep.mubr.msk.bf16.mxu1 %vm617_vm0, %v4807_v1 }
 0x96c   :  { %3607 = vrot.lane.b32.xlu1 %v3410_v17, %s5128_s0 }
 0x96e   :  { %3609 = vrot.lane.b32.xlu0 %v3414_v41, %s5128_s0 }
 0x970   :  { %3615 = vrot.lane.b32.xlu1 %v3412_v34, %s5128_s0 }
 0x972   :  { %3617 = vrot.lane.b32.xlu0 %v3416_v60, %s5128_s0 }
 0x974   :  { %3647 = vrot.lane.b32.xlu1 %v3410_v17, %s5129_s15 }
 0x976   :  { %3649 = vrot.lane.b32.xlu0 %v3414_v41, %s5129_s15 }
 0x978   :  { %3655 = vrot.lane.b32.xlu1 %v3412_v34, %s5129_s15 }
 0x97a   :  { %3657 = vrot.lane.b32.xlu0 %v3416_v60, %s5129_s15 }
 0x97c   :  { %3691 = vrot.lane.b32.xlu1 %v3410_v17, %s5130_s16 }
 0x97e   :  { %3693 = vrot.lane.b32.xlu0 %v3414_v41, %s5130_s16 }
 0x980   :  { %3699 = vrot.lane.b32.xlu1 %v3412_v34, %s5130_s16 }
 0x982   :  { %3701 = vrot.lane.b32.xlu0 %v3416_v60, %s5130_s16 }
 0x984   :  { %3731 = vrot.lane.b32.xlu1 %v3410_v17, %s5131_s17 }
 0x986   :  { %3733 = vrot.lane.b32.xlu0 %v3414_v41, %s5131_s17 }
 0x988   :  { %3739 = vrot.lane.b32.xlu1 %v3412_v34, %s5131_s17 }
 0x98a   :  { %3741 = vrot.lane.b32.xlu0 %v3416_v60, %s5131_s17 }
 0x98c   :  { %3771 = vrot.lane.b32.xlu1 %v3410_v17, %s5132_s18 }
 0x98e   :  { %3773 = vrot.lane.b32.xlu0 %v3414_v41, %s5132_s18 }
 0x990   :  { %3779 = vrot.lane.b32.xlu1 %v3412_v34, %s5132_s18 }
 0x992   :  { %3781 = vrot.lane.b32.xlu0 %v3416_v60, %s5132_s18 }
 0x994   :  { %3811 = vrot.lane.b32.xlu1 %v3410_v17, %s5133_s19 }
 0x996   :  { %3813 = vrot.lane.b32.xlu0 %v3414_v41, %s5133_s19 }
 0x998   :  { %3819 = vrot.lane.b32.xlu1 %v3412_v34, %s5133_s19 }
 0x99a   :  { %3821 = vrot.lane.b32.xlu0 %v3416_v60, %s5133_s19 }
 0x99c   :  { %3531 = vrot.lane.b32.xlu1 %v7414_v19, %s5125_s9 }
 0x99e   :  { %3533 = vrot.lane.b32.xlu0 %v7416_v40, %s5125_s9 }
 0x9a0   :  { %3539 = vrot.lane.b32.xlu1 %v7426_v51, %s5125_s9 }
 0x9a2   :  { %3541 = vrot.lane.b32.xlu0 %v7428_v0, %s5125_s9 }
 0x9a4   :  { %3571 = vrot.lane.b32.xlu1 %v7414_v19, %s5126_s14 }
 0x9a6   :  { %3573 = vrot.lane.b32.xlu0 %v7416_v40, %s5126_s14 }
 0x9a8   :  { %3579 = vrot.lane.b32.xlu1 %v7426_v51, %s5126_s14 }
 0x9aa   :  { %3581 = vrot.lane.b32.xlu0 %v7428_v0, %s5126_s14 }
 0x9ac   :  { %3611 = vrot.lane.b32.xlu1 %v7414_v19, %s5128_s0 }
 0x9ae   :  { %3613 = vrot.lane.b32.xlu0 %v7416_v40, %s5128_s0 }
 0x9b0   :  { %3619 = vrot.lane.b32.xlu1 %v7426_v51, %s5128_s0 }
 0x9b2   :  { %3621 = vrot.lane.b32.xlu0 %v7428_v0, %s5128_s0 }
 0x9b4   :  { %3651 = vrot.lane.b32.xlu1 %v7414_v19, %s5129_s15 }
 0x9b6   :  { %3653 = vrot.lane.b32.xlu0 %v7416_v40, %s5129_s15 }
 0x9b8   :  { %3659 = vrot.lane.b32.xlu1 %v7426_v51, %s5129_s15 }
 0x9ba   :  { %3661 = vrot.lane.b32.xlu0 %v7428_v0, %s5129_s15 }
 0x9bc   :  { %3695 = vrot.lane.b32.xlu1 %v7414_v19, %s5130_s16 }
 0x9be   :  { %3697 = vrot.lane.b32.xlu0 %v7416_v40, %s5130_s16 }
 0x9c0   :  { %3703 = vrot.lane.b32.xlu1 %v7426_v51, %s5130_s16 }
 0x9c2   :  { %3705 = vrot.lane.b32.xlu0 %v7428_v0, %s5130_s16 }
 0x9c4   :  { %3735 = vrot.lane.b32.xlu1 %v7414_v19, %s5131_s17 }
 0x9c6   :  { %3737 = vrot.lane.b32.xlu0 %v7416_v40, %s5131_s17 }
 0x9c8   :  { %3743 = vrot.lane.b32.xlu1 %v7426_v51, %s5131_s17 }
 0x9ca   :  { %3745 = vrot.lane.b32.xlu0 %v7428_v0, %s5131_s17 }
 0x9cc   :  { %3775 = vrot.lane.b32.xlu1 %v7414_v19, %s5132_s18 }
 0x9ce   :  { %3777 = vrot.lane.b32.xlu0 %v7416_v40, %s5132_s18  ;;  %v7526_v2 = vpop.permute.xlu1 %3527 }
 0x9d0   :  { %v7528_v42 = vpop.permute.xlu0 %3529  ;;  %3783 = vrot.lane.b32.xlu1 %v7426_v51, %s5132_s18 }
 0x9d2   :  { %3785 = vrot.lane.b32.xlu0 %v7428_v0, %s5132_s18  ;;  %v7537_v49 = vpop.permute.xlu1 %3535 }
 0x9d4   :  { %v7541_v3 = vpop.permute.xlu0 %3537  ;;  %3815 = vrot.lane.b32.xlu1 %v7414_v19, %s5133_s19 }
 0x9d6   :  { %3817 = vrot.lane.b32.xlu0 %v7416_v40, %s5133_s19  ;;  %v7547_v6 = vpop.permute.xlu1 %3567 }
 0x9d8   :  { %v7549_v23 = vpop.permute.xlu0 %3569  ;;  %3823 = vrot.lane.b32.xlu1 %v7426_v51, %s5133_s19 }
 0x9da   :  { %3825 = vrot.lane.b32.xlu0 %v7428_v0, %s5133_s19  ;;  %v7558_v50 = vpop.permute.xlu1 %3575 }
 0x9dc   :  { %v7563_v36 = vpop.permute.xlu0 %3577  ;;  %3895 = vperm.xlu1 %4785, %v4674_v26  }
 0x9de   :  { %3900 = vperm.xlu0 %4784, %v4675_v28   ;;  %v7568_v43 = vpop.permute.xlu1 %3607 }
 0x9e0   :  { %v7573_v11 = vpop.permute.xlu0 %3609  ;;  %4170 = vperm.xlu1 %4785, %v4166_v5  }
 0x9e2   :  { %4175 = vperm.xlu0 %4784, %v4167_v16   ;;  %v7578_v55 = vpop.permute.xlu1 %3615 }
 0x9e4   :  { %v7583_v35 = vpop.permute.xlu0 %3617  ;;  %4256 = vperm.xlu1 %4785, %v4250_v13  }
 0x9e6   :  { %4261 = vperm.xlu0 %4784, %v4251_v9   ;;  %v7588_v48 = vpop.permute.xlu1 %3647 }
 0x9e8   :  { %v7593_v14 = vpop.permute.xlu0 %3649  ;;  %4266 = vperm.xlu1 %4785, %v4252_v8  }
 0x9ea   :  { %4271 = vperm.xlu0 %4784, %v4253_v46   ;;  %v7595_v17 = vpop.permute.xlu1 %3655 }
 0x9ec   :  { %v7597_v7 = vpop.permute.xlu0 %3657 }
 0x9ee   :  { %v7599_v4 = vpop.permute.xlu1 %3691 }
 0x9f0   :  { %v7601_v41 = vpop.permute.xlu0 %3693 }
 0x9f2   :  { %v7603_v63 = vpop.permute.xlu1 %3699 }
 0x9f4   :  { %v7605_v19 = vpop.permute.xlu0 %3701 }
 0x9f6   :  { %v7607_v40 = vpop.permute.xlu1 %3731 }
 0x9f8   :  { %v7609_v12 = vpop.permute.xlu0 %3733 }
 0x9fa   :  { %v7611_v34 = vpop.permute.xlu1 %3739 }
 0x9fc   :  { %v7613_v37 = vpop.permute.xlu0 %3741 }
 0x9fe   :  { %v7615_v25 = vpop.permute.xlu1 %3771 }
 0xa00   :  { %v7617_v60 = vpop.permute.xlu0 %3773 }
 0xa02   :  { %v7619_v51 = vpop.permute.xlu1 %3779 }
 0xa04   :  { %v7621_v0 = vpop.permute.xlu0 %3781 }
 0xa06   :  { %v7623_v61 = vpop.permute.xlu1 %3811 }
 0xa07   :  { %8135 = vst [vmem:[#allocation9_spill] sm:$0xff] %v7623_v61 }
 0xa08   :  { %v7625_v1 = vpop.permute.xlu0 %3813 }
 0xa09   :  { %8136 = vst [vmem:[#allocation10_spill] sm:$0xff] %v7625_v1 }
 0xa0a   :  { %v7627_v26 = vpop.permute.xlu1 %3819 }
 0xa0b   :  { %8137 = vst [vmem:[#allocation11_spill] sm:$0xff] %v7627_v26 }
 0xa0c   :  { %v7629_v28 = vpop.permute.xlu0 %3821 }
 0xa0d   :  { %8138 = vst [vmem:[#allocation12_spill] sm:$0xff] %v7629_v28 }
 0xa0e   :  { %v3532_v5 = vpop.permute.xlu1 %3531 }
 0xa0f   :  { %v3545_v16 = vsel %vm312_vm9, %v3532_v5, %v7537_v49  ;;  %v3547_v13 = vsel %vm312_vm9, %v7526_v2, %v3532_v5 }
 0xa10   :  { %v3534_v9 = vpop.permute.xlu0 %3533  ;;  %v3552_v27 = vmul.f32 %v5353_v30, %v3547_v13  ;;  %v3553_v52 = vmul.f32 %v5364_v33, %v3545_v16 }
 0xa11   :  { %v3546_v8 = vsel %vm312_vm9, %v3534_v9, %v7541_v3  ;;  %v3548_v46 = vsel %vm312_vm9, %v7528_v42, %v3534_v9 }
 0xa12   :  { %v3556_v47 = vmul.f32 %v5353_v30, %v3548_v46  ;;  %v3557_v1 = vmul.f32 %v5364_v33, %v3546_v8  ;;  %v3540_v28 = vpop.permute.xlu1 %3539 }
 0xa13   :  { %v3543_v5 = vsel %vm312_vm9, %v7537_v49, %v3540_v28  ;;  %v3549_v61 = vsel %vm312_vm9, %v3540_v28, %v7526_v2 }
 0xa14   :  { %v3561_v26 = vpack.c.bf16 %v3557_v1, %v3553_v52  ;;  %v3542_v21 = vpop.permute.xlu0 %3541  ;;  %v3560_v9 = vpack.c.bf16 %v3556_v47, %v3552_v27  ;;  %v3551_v13 = vmul.f32 %v5361_v32, %v3549_v61  ;;  %v3554_v8 = vmul.f32 %v5358_v31, %v3543_v5 }
 0xa15   :  { %v3544_v16 = vsel %vm312_vm9, %v7541_v3, %v3542_v21  ;;  %v3550_v33 = vsel %vm312_vm9, %v3542_v21, %v7528_v42 }
 0xa16   :  { %v3555_v49 = vmul.f32 %v5361_v32, %v3550_v33  ;;  %v3558_v46 = vmul.f32 %v5358_v31, %v3544_v16  ;;  %v3572_v2 = vpop.permute.xlu1 %3571  ;;  %3915 = vmatprep.subr.bf16.mxu0 %v3560_v9 }
 0xa17   :  { %v3587_v3 = vsel %vm343_vm10, %v7547_v6, %v3572_v2  ;;  %v3585_v32 = vsel %vm343_vm10, %v3572_v2, %v7558_v50 }
 0xa18   :  { %v3559_v52 = vpack.c.bf16 %v3555_v49, %v3551_v13  ;;  %v3574_v47 = vpop.permute.xlu0 %3573  ;;  %v3562_v27 = vpack.c.bf16 %v3558_v46, %v3554_v8  ;;  %v3593_v16 = vmul.f32 %v5386_v54, %v3585_v32 }
 0xa19   :  { %v3586_v21 = vsel %vm343_vm10, %v3574_v47, %v7563_v36  ;;  %v3588_v42 = vsel %vm343_vm10, %v7549_v23, %v3574_v47 }
 0xa1a   :  { %v3600_v61 = vpack.c.bf16 %v3588_v42, %v3587_v3  ;;  %3958 = vmatprep.subr.bf16.mxu1 %v3562_v27  ;;  %v3580_v1 = vpop.permute.xlu1 %3579  ;;  %3916 = vmatpush1.bf16.msra.mxu0 %v3559_v52  ;;  %v3597_v28 = vmul.f32 %v5386_v54, %v3586_v21 }
 0xa1b   :  { %v3589_v5 = vsel %vm343_vm10, %v3580_v1, %v7547_v6  ;;  %3959 = vmatpush1.bf16.msra.mxu1 %v3561_v26  ;;  %v3583_v33 = vsel %vm343_vm10, %v7558_v50, %v3580_v1 }
 0xa1c   :  { %v3582_v9 = vpop.permute.xlu0 %3581  ;;  %3917 = vmatprep.subr.bf16.mxu0 %v3600_v61  ;;  %v3591_v49 = vmul.f32 %v5393_v56, %v3589_v5  ;;  %v3601_v2 = vpack.c.bf16 %v3597_v28, %v3593_v16 }
 0xa1d   :  { %v3584_v13 = vsel %vm343_vm10, %v7563_v36, %v3582_v9  ;;  %v3590_v8 = vsel %vm343_vm10, %v3582_v9, %v7549_v23 }
 0xa1e   :  { %v3595_v6 = vmul.f32 %v5393_v56, %v3590_v8  ;;  %v3602_v26 = vpack.c.bf16 %v3584_v13, %v3583_v33  ;;  %v3612_v46 = vpop.permute.xlu1 %3611 }
 0xa1f   :  { %v3625_v54 = vsel %vm374_vm1, %v3612_v46, %v7578_v55  ;;  %v3627_v50 = vsel %vm374_vm1, %v7568_v43, %v3612_v46 }
 0xa20   :  { %v3599_v36 = vpack.c.bf16 %v3595_v6, %v3591_v49  ;;  %v3614_v52 = vpop.permute.xlu0 %3613  ;;  %3960 = vmatprep.subr.bf16.mxu1 %v3602_v26  ;;  %v3632_v47 = vmul.f32 %v5437_v18, %v3627_v50  ;;  %v3633_v27 = vmul.f32 %v5443_v29, %v3625_v54 }
 0xa21   :  { %v3626_v23 = vsel %vm374_vm1, %v3614_v52, %v7583_v35  ;;  %v3628_v56 = vsel %vm374_vm1, %v7573_v11, %v3614_v52  ;;  %3961 = vmatpush1.bf16.msra.mxu1 %v3601_v2 }
 0xa22   :  { %v3636_v3 = vmul.f32 %v5437_v18, %v3628_v56  ;;  %v3637_v21 = vmul.f32 %v5443_v29, %v3626_v23  ;;  %v3620_v42 = vpop.permute.xlu1 %3619  ;;  %3918 = vmatpush1.bf16.msra.mxu0 %v3599_v36 }
 0xa23   :  { %v3623_v32 = vsel %vm374_vm1, %v7578_v55, %v3620_v42  ;;  %v3629_v61 = vsel %vm374_vm1, %v3620_v42, %v7568_v43 }
 0xa24   :  { %v3641_v1 = vpack.c.bf16 %v3637_v21, %v3633_v27  ;;  %v3622_v28 = vpop.permute.xlu0 %3621  ;;  %v3640_v5 = vpack.c.bf16 %v3636_v3, %v3632_v47  ;;  %v3631_v16 = vmul.f32 %v5440_v20, %v3629_v61  ;;  %v3634_v33 = vmul.f32 %v5448_v22, %v3623_v32 }
 0xa25   :  { %v3624_v9 = vsel %vm374_vm1, %v7583_v35, %v3622_v28  ;;  %v3630_v29 = vsel %vm374_vm1, %v3622_v28, %v7573_v11 }
 0xa26   :  { %v3635_v55 = vmul.f32 %v5440_v20, %v3630_v29  ;;  %v3638_v13 = vmul.f32 %v5448_v22, %v3624_v9  ;;  %v3652_v43 = vpop.permute.xlu1 %3651  ;;  %3919 = vmatprep.subr.bf16.mxu0 %v3640_v5 }
 0xa27   :  { %v3665_v8 = vsel %vm405_vm3, %v3652_v43, %v7595_v17  ;;  %v3667_v35 = vsel %vm405_vm3, %v7588_v48, %v3652_v43 }
 0xa28   :  { %v3639_v49 = vpack.c.bf16 %v3635_v55, %v3631_v16  ;;  %v3654_v11 = vpop.permute.xlu0 %3653  ;;  %v3642_v6 = vpack.c.bf16 %v3638_v13, %v3634_v33  ;;  %v3672_v26 = vmul.f32 %v5353_v30, %v3667_v35  ;;  %v3673_v2 = vmul.f32 %v5477_v59, %v3665_v8 }
 0xa29   :  { %v3666_v20 = vsel %vm405_vm3, %v3654_v11, %v7597_v7  ;;  %v3668_v46 = vsel %vm405_vm3, %v7593_v14, %v3654_v11 }
 0xa2a   :  { %v3676_v54 = vmul.f32 %v5353_v30, %v3668_v46  ;;  %v3677_v50 = vmul.f32 %v5477_v59, %v3666_v20  ;;  %3962 = vmatprep.subr.bf16.mxu1 %v3642_v6  ;;  %v3660_v36 = vpop.permute.xlu1 %3659  ;;  %3920 = vmatpush1.bf16.msra.mxu0 %v3639_v49 }
 0xa2b   :  { %v3663_v52 = vsel %vm405_vm3, %v7595_v17, %v3660_v36  ;;  %v3669_v23 = vsel %vm405_vm3, %v3660_v36, %v7588_v48  ;;  %3963 = vmatpush1.bf16.msra.mxu1 %v3641_v1 }
 0xa2c   :  { %v3681_v56 = vpack.c.bf16 %v3677_v50, %v3673_v2  ;;  %v3662_v47 = vpop.permute.xlu0 %3661  ;;  %v3680_v27 = vpack.c.bf16 %v3676_v54, %v3672_v26  ;;  %v3671_v21 = vmul.f32 %v5472_v58, %v3669_v23  ;;  %v3674_v17 = vmul.f32 %v5358_v31, %v3663_v52 }
 0xa2d   :  { %v3664_v30 = vsel %vm405_vm3, %v7597_v7, %v3662_v47  ;;  %v3670_v3 = vsel %vm405_vm3, %v3662_v47, %v7593_v14 }
 0xa2e   :  { %v3675_v42 = vmul.f32 %v5472_v58, %v3670_v3  ;;  %v3678_v48 = vmul.f32 %v5358_v31, %v3664_v30  ;;  %v3696_v32 = vpop.permute.xlu1 %3695  ;;  %3921 = vmatprep.subr.bf16.mxu0 %v3680_v27 }
 0xa2f   :  { %v3709_v61 = vsel %vm444_vm2, %v3696_v32, %v7603_v63  ;;  %v3711_v31 = vsel %vm444_vm2, %v7599_v4, %v3696_v32 }
 0xa30   :  { %v3679_v1 = vpack.c.bf16 %v3675_v42, %v3671_v21  ;;  %v3698_v7 = vpop.permute.xlu0 %3697  ;;  %v3682_v28 = vpack.c.bf16 %v3678_v48, %v3674_v17  ;;  %v3716_v9 = vmul.f32 %v5437_v18, %v3709_v61  ;;  %v3715_v8 = vmul.f32 %v5507_v44, %v3711_v31 }
 0xa31   :  { %v3710_v14 = vsel %vm444_vm2, %v3698_v7, %v7605_v19  ;;  %v3712_v5 = vsel %vm444_vm2, %v7601_v41, %v3698_v7 }
 0xa32   :  { %v3720_v29 = vmul.f32 %v5437_v18, %v3710_v14  ;;  %3964 = vmatprep.subr.bf16.mxu1 %v3682_v28  ;;  %v3704_v16 = vpop.permute.xlu1 %3703  ;;  %3922 = vmatpush1.bf16.msra.mxu0 %v3679_v1  ;;  %v3719_v13 = vmul.f32 %v5507_v44, %v3712_v5 }
 0xa33   :  { %v3707_v33 = vsel %vm444_vm2, %v7603_v63, %v3704_v16  ;;  %v3713_v55 = vsel %vm444_vm2, %v3704_v16, %v7599_v4  ;;  %3923 = vmatprep.subr.bf16.mxu0 %v7423_v57  ;;  %3965 = vmatpush1.bf16.msra.mxu1 %v3681_v56 }
 0xa34   :  { %v3706_v43 = vpop.permute.xlu0 %3705  ;;  %3966 = vmatprep.subr.bf16.mxu1 %v7437_v39  ;;  %v3724_v18 = vpack.c.bf16 %v3720_v29, %v3716_v9  ;;  %v3717_v4 = vmul.f32 %v5512_v45, %v3707_v33  ;;  %v3718_v57 = vmul.f32 %v5448_v22, %v3713_v55  ;;  %v8139_v29 = vld [vmem:[#allocation6_spill] sm:$0xff] }
 0xa35   :  { %v3708_v35 = vsel %vm444_vm2, %v7605_v19, %v3706_v43  ;;  %v3714_v63 = vsel %vm444_vm2, %v3706_v43, %v7601_v41  ;;  %v3723_v41 = vpack.c.bf16 %v3719_v13, %v3715_v8  ;;  %v8140_v13 = vld [vmem:[#allocation11_spill] sm:$0xff] }
 0xa36   :  { %v3721_v49 = vmul.f32 %v5512_v45, %v3708_v35  ;;  %v3722_v11 = vmul.f32 %v5448_v22, %v3714_v63  ;;  %v3736_v39 = vpop.permute.xlu1 %3735  ;;  %3924 = vmatpush1.bf16.msra.mxu0 %v7419_v62  ;;  %v8142_v35 = vld [vmem:[#allocation12_spill] sm:$0xff]  ;;  %v8143_v63 = vld [vmem:[#allocation10_spill] sm:$0xff] }
 0xa37   :  { %v3749_v6 = vsel %vm475_vm11, %v3736_v39, %v7611_v34  ;;  %v3751_v19 = vsel %vm475_vm11, %v7607_v40, %v3736_v39  ;;  %3925 = vmatprep.subr.bf16.mxu0 %v3724_v18  ;;  %3967 = vmatpush1.bf16.msra.mxu1 %v7433_v38 }
 0xa38   :  { %v3725_v26 = vpack.c.bf16 %v3721_v49, %v3717_v4  ;;  %v3738_v20 = vpop.permute.xlu0 %3737  ;;  %v3726_v46 = vpack.c.bf16 %v3722_v11, %v3718_v57  ;;  %v3755_v22 = vmul.f32 %v5472_v58, %v3751_v19  ;;  %v3756_v54 = vmul.f32 %v5548_v15, %v3749_v6  ;;  %v8144_v49 = vld [vmem:[#allocation7_spill] sm:$0xff] }
 0xa39   :  { %v3750_v62 = vsel %vm475_vm11, %v3738_v20, %v7613_v37  ;;  %v3752_v2 = vsel %vm475_vm11, %v7609_v12, %v3738_v20 }
 0xa3a   :  { %v3759_v50 = vmul.f32 %v5472_v58, %v3752_v2  ;;  %v3760_v38 = vmul.f32 %v5548_v15, %v3750_v62  ;;  %3968 = vmatprep.subr.bf16.mxu1 %v3726_v46  ;;  %v3744_v36 = vpop.permute.xlu1 %3743  ;;  %3926 = vmatpush1.bf16.msra.mxu0 %v3723_v41 }
 0xa3b   :  { %v3747_v52 = vsel %vm475_vm11, %v7611_v34, %v3744_v36  ;;  %v3753_v23 = vsel %vm475_vm11, %v3744_v36, %v7607_v40  ;;  %3969 = vmatpush1.bf16.msra.mxu1 %v3725_v26 }
 0xa3c   :  { %v3763_v56 = vpack.c.bf16 %v3759_v50, %v3755_v22  ;;  %v3746_v47 = vpop.permute.xlu0 %3745  ;;  %v3764_v27 = vpack.c.bf16 %v3760_v38, %v3756_v54  ;;  %v3757_v30 = vmul.f32 %v5477_v59, %v3747_v52  ;;  %v3758_v34 = vmul.f32 %v5555_v24, %v3753_v23  ;;  %v8145_v54 = vld [vmem:[#allocation8_spill] sm:$0xff] }
 0xa3d   :  { %v3748_v58 = vsel %vm475_vm11, %v7613_v37, %v3746_v47  ;;  %v3754_v15 = vsel %vm475_vm11, %v3746_v47, %v7609_v12  ;;  %v4809_v52 = vld [vmem:[%s7984_s1 + $0x50] ss:$8 sps:$4 sm:$0xff]  }
 0xa3e   :  { %v3761_v3 = vmul.f32 %v5477_v59, %v3748_v58  ;;  %v3762_v40 = vmul.f32 %v5555_v24, %v3754_v15  ;;  %v3776_v21 = vpop.permute.xlu1 %3775  ;;  %3927 = vmatprep.subr.bf16.mxu0 %v3764_v27 }
 0xa3f   :  { %v3789_v17 = vsel %vm506_vm6, %v3776_v21, %v7619_v51  ;;  %3928 = vmatpush1.bf16.msra.mxu0 %v3763_v56  ;;  %v3791_v7 = vsel %vm506_vm6, %v7615_v25, %v3776_v21 }
 0xa40   :  { %v3765_v37 = vpack.c.bf16 %v3761_v3, %v3757_v30  ;;  %v3778_v42 = vpop.permute.xlu0 %3777  ;;  %v3766_v48 = vpack.c.bf16 %v3762_v40, %v3758_v34  ;;  %v3796_v32 = vmul.f32 %v5580_v53, %v3789_v17 }
 0xa41   :  { %v3790_v12 = vsel %vm506_vm6, %v3778_v42, %v7621_v0  ;;  %v3792_v59 = vsel %vm506_vm6, %v7617_v60, %v3778_v42 }
 0xa42   :  { %v3800_v24 = vmul.f32 %v5580_v53, %v3790_v12  ;;  %3970 = vmatprep.subr.bf16.mxu1 %v3766_v48  ;;  %v3784_v61 = vpop.permute.xlu1 %3783  ;;  %v3803_v5 = vpack.c.bf16 %v3792_v59, %v3791_v7 }
 0xa43   :  { %v3793_v1 = vsel %vm506_vm6, %v3784_v61, %v7615_v25  ;;  %3971 = vmatpush1.bf16.msra.mxu1 %v3765_v37  ;;  %v3787_v31 = vsel %vm506_vm6, %v7619_v51, %v3784_v61  ;;  %v8141_v51 = vld [vmem:[#allocation9_spill] sm:$0xff] }
 0xa44   :  { %v3786_v28 = vpop.permute.xlu0 %3785  ;;  %v3804_v14 = vpack.c.bf16 %v3800_v24, %v3796_v32  ;;  %v3798_v16 = vmul.f32 %v8139_v29, %v3793_v1 }
 0xa45   :  { %v3788_v53 = vsel %vm506_vm6, %v7621_v0, %v3786_v28  ;;  %v3794_v9 = vsel %vm506_vm6, %v3786_v28, %v7617_v60 }
 0xa46   :  { %v3802_v33 = vmul.f32 %v8139_v29, %v3794_v9  ;;  %v3805_v25 = vpack.c.bf16 %v3788_v53, %v3787_v31  ;;  %v3816_v55 = vpop.permute.xlu1 %3815  ;;  %3929 = vmatprep.subr.bf16.mxu0 %v3804_v14 }
 0xa47   :  { %v3829_v43 = vsel %vm537_vm7, %v3816_v55, %v8140_v13  ;;  %v3831_v18 = vsel %vm537_vm7, %v8141_v51, %v3816_v55  ;;  %3930 = vmatpush1.bf16.msra.mxu0 %v3803_v5 }
 0xa48   :  { %v3818_v0 = vpop.permute.xlu0 %3817  ;;  %v3806_v8 = vpack.c.bf16 %v3802_v33, %v3798_v16  ;;  %v3835_v57 = vmul.f32 %v5507_v44, %v3831_v18  ;;  %v3836_v11 = vmul.f32 %v8144_v49, %v3829_v43 }
 0xa49   :  { %v3830_v60 = vsel %vm537_vm7, %v3818_v0, %v8142_v35  ;;  %v3832_v4 = vsel %vm537_vm7, %v8143_v63, %v3818_v0 }
 0xa4a   :  { %v3839_v39 = vmul.f32 %v5507_v44, %v3832_v4  ;;  %v3840_v6 = vmul.f32 %v8144_v49, %v3830_v60  ;;  %3972 = vmatprep.subr.bf16.mxu1 %v3806_v8  ;;  %v3824_v19 = vpop.permute.xlu1 %3823 }
 0xa4b   :  { %v3827_v41 = vsel %vm537_vm7, %v8140_v13, %v3824_v19  ;;  %v3833_v26 = vsel %vm537_vm7, %v3824_v19, %v8141_v51  ;;  %3973 = vmatpush1.bf16.msra.mxu1 %v3805_v25 }
 0xa4c   :  { %v3843_v20 = vpack.c.bf16 %v3839_v39, %v3835_v57  ;;  %v3826_v46 = vpop.permute.xlu0 %3825  ;;  %v3844_v22 = vpack.c.bf16 %v3840_v6, %v3836_v11  ;;  %v3837_v2 = vmul.f32 %v5512_v45, %v3827_v41  ;;  %v3838_v50 = vmul.f32 %v8145_v54, %v3833_v26 }
 0xa4d   :  { %v3828_v44 = vsel %vm537_vm7, %v8142_v35, %v3826_v46  ;;  %v3834_v62 = vsel %vm537_vm7, %v3826_v46, %v8143_v63 }
 0xa4e   :  { %v3841_v38 = vmul.f32 %v5512_v45, %v3828_v44  ;;  %v3842_v36 = vmul.f32 %v8145_v54, %v3834_v62  ;;  %3931 = vmatprep.subr.bf16.mxu0 %v3844_v22 }
 0xa4f   :  { %3932 = vmatpush1.bf16.msra.mxu0 %v3843_v20 }
 0xa50   :  { %v3845_v23 = vpack.c.bf16 %v3841_v38, %v3837_v2  ;;  %v3846_v56 = vpack.c.bf16 %v3842_v36, %v3838_v50 }
 0xa52   :  { %3948 = vmatmul.mubr.bf16.vlgmr.msra.gmra.mrb[24].mxu0 %v4809_v52  ;;  %3974 = vmatprep.subr.bf16.mxu1 %v3846_v56 }
 0xa53   :  { %3975 = vmatpush1.bf16.msra.mxu1 %v3845_v23  ;;  %4104 = vmatprep.mubr.bf16.mxu0 %v8146_v10 }
 0xa56   :  { %3991 = vmatmul.mubr.bf16.vlgmr.msra.gmra.mrb[24].mxu1 %v4809_v52  ;;  %v4810_v52 = vld [vmem:[%s7987_s4 + $0x28] sm:$0xff]  }
 0xa57   :  { %4147 = vmatprep.mubr.bf16.mxu1 %v8146_v10 }
 0xa5b   :  { %v3896_v47 = vpop.permute.xlu1 %3895 }
 0xa5d   :  { %v3901_v15 = vpop.permute.xlu0 %3900 }
 0xb25   :  { %v3949_v45 = vpop.f32.mrb[24].mxu0 }
 0xb26   :  { %v3950_v27 = vadd.f32 %v3949_v45, %v3896_v47  ;;  %v3951_v58 = vpop.f32.mrb[25].mxu0 }
 0xb27   :  { %v3952_v30 = vadd.f32 %v3951_v58, %v3896_v47  ;;  %v3953_v34 = vpop.f32.mrb[26].mxu0 }
 0xb28   :  { %v4680_v3 = vmul.f32 -1.442695, %v3950_v27  ;;  %v3954_v40 = vadd.f32 %v3953_v34, %v3901_v15  ;;  %v3955_v21 = vpop.f32.mrb[27].mxu0 }
 0xb29   :  { %v4681_v17 = vmul.f32 -1.442695, %v3952_v30  ;;  %v3956_v37 = vadd.f32 %v3955_v21, %v3901_v15  ;;  %v3992_v42 = vpop.f32.mrb[24].mxu1 }
 0xb2a   :  { %4973 = vpow2.f32 %v4680_v3  ;;  %v4684_v48 = vmul.f32 -1.442695, %v3954_v40  ;;  %v3993_v12 = vadd.f32 %v3992_v42, %v3896_v47  ;;  %v3994_v32 = vpop.f32.mrb[25].mxu1 }
 0xb2b   :  { %4975 = vpow2.f32 %v4681_v17  ;;  %v4685_v59 = vmul.f32 -1.442695, %v3956_v37  ;;  %v3995_v24 = vadd.f32 %v3994_v32, %v3896_v47  ;;  %v3996_v61 = vpop.f32.mrb[26].mxu1  ;;  %v4171_v47 = vpop.permute.xlu1 %4170 }
 0xb2c   :  { %4977 = vpow2.f32 %v4684_v48  ;;  %v4682_v1 = vmul.f32 -1.442695, %v3993_v12  ;;  %v3997_v7 = vadd.f32 %v3996_v61, %v3901_v15  ;;  %v3998_v28 = vpop.f32.mrb[27].mxu1 }
 0xb2d   :  { %4979 = vpow2.f32 %v4685_v59  ;;  %v4683_v14 = vmul.f32 -1.442695, %v3995_v24  ;;  %v3999_v5 = vadd.f32 %v3998_v28, %v3901_v15  ;;  %v4176_v15 = vpop.permute.xlu0 %4175 }
 0xb2e   :  { %4981 = vpow2.f32 %v4682_v1  ;;  %v4686_v31 = vmul.f32 -1.442695, %v3997_v7 }
 0xb2f   :  { %4983 = vpow2.f32 %v4683_v14  ;;  %v4687_v53 = vmul.f32 -1.442695, %v3999_v5 }
 0xb30   :  { %4985 = vpow2.f32 %v4686_v31 }
 0xb31   :  { %4987 = vpow2.f32 %v4687_v53 }
 0xb34   :  { %v4974_v9 = vpop.eup %4973 }
 0xb35   :  { %v4976_v29 = vpop.eup %4975  ;;  %v4025_v16 = vadd.f32 1.0, %v4974_v9 }
 0xb36   :  { %v4978_v33 = vpop.eup %4977  ;;  %v4026_v25 = vadd.f32 1.0, %v4976_v29 }
 0xb37   :  { %v4980_v55 = vpop.eup %4979  ;;  %4989 = vrcp.f32 %v4025_v16  ;;  %v4029_v13 = vadd.f32 1.0, %v4978_v33 }
 0xb38   :  { %v4982_v43 = vpop.eup %4981  ;;  %4991 = vrcp.f32 %v4026_v25  ;;  %v4030_v51 = vadd.f32 1.0, %v4980_v55 }
 0xb39   :  { %v4984_v18 = vpop.eup %4983  ;;  %4993 = vrcp.f32 %v4029_v13  ;;  %v4027_v0 = vadd.f32 1.0, %v4982_v43 }
 0xb3a   :  { %v4986_v8 = vpop.eup %4985  ;;  %4995 = vrcp.f32 %v4030_v51  ;;  %v4028_v35 = vadd.f32 1.0, %v4984_v18 }
 0xb3b   :  { %v4988_v60 = vpop.eup %4987  ;;  %4997 = vrcp.f32 %v4027_v0  ;;  %v4031_v63 = vadd.f32 1.0, %v4986_v8 }
 0xb3c   :  { %4999 = vrcp.f32 %v4028_v35  ;;  %v4032_v4 = vadd.f32 1.0, %v4988_v60 }
 0xb3d   :  { %5001 = vrcp.f32 %v4031_v63 }
 0xb3e   :  { %5003 = vrcp.f32 %v4032_v4 }
 0xb41   :  { %v4990_v57 = vpop.eup %4989 }
 0xb42   :  { %v4992_v49 = vpop.eup %4991  ;;  %v4049_v6 = vmul.f32 %v4990_v57, %v3950_v27 }
 0xb43   :  { %v4994_v11 = vpop.eup %4993  ;;  %v4050_v26 = vmul.f32 %v4992_v49, %v3952_v30 }
 0xb44   :  { %v4996_v39 = vpop.eup %4995  ;;  %v4053_v19 = vmul.f32 %v4994_v11, %v3954_v40 }
 0xb45   :  { %v4998_v41 = vpop.eup %4997  ;;  %v4054_v20 = vmul.f32 %v4996_v39, %v3956_v37 }
 0xb46   :  { %v5000_v46 = vpop.eup %4999  ;;  %v4060_v22 = vpack.c.bf16 %v4053_v19, %v4049_v6  ;;  %v4051_v54 = vmul.f32 %v4998_v41, %v3993_v12 }
 0xb47   :  { %v5002_v44 = vpop.eup %5001  ;;  %v4061_v62 = vpack.c.bf16 %v4054_v20, %v4050_v26  ;;  %v4052_v38 = vmul.f32 %v5000_v46, %v3995_v24 }
 0xb48   :  { %v5004_v2 = vpop.eup %5003  ;;  %v4055_v50 = vmul.f32 %v5002_v44, %v3997_v7 }
 0xb49   :  { %v4056_v36 = vmul.f32 %v5004_v2, %v3999_v5  ;;  %4072 = vmatprep.subr.bf16.mxu0 %v4061_v62 }
 0xb4a   :  { %v4062_v23 = vpack.c.bf16 %v4055_v50, %v4051_v54  ;;  %4073 = vmatpush1.bf16.msra.mxu0 %v4060_v22 }
 0xb4b   :  { %v4063_v56 = vpack.c.bf16 %v4056_v36, %v4052_v38 }
 0xb4d   :  { %4691 = vmatmul.mubr.msk.bf16.vlgmr.msra.gmra.mrb[4].mxu0 %vm617_vm0, %v4810_v52  ;;  %4115 = vmatprep.subr.bf16.mxu1 %v4063_v56 }
 0xb4e   :  { %4116 = vmatpush1.bf16.msra.mxu1 %v4062_v23  ;;  %4322 = vmatprep.mubr.bf16.mxu0 %v8146_v10 }
 0xb51   :  { %4692 = vmatmul.mubr.msk.bf16.vlgmr.msra.gmra.mrb[4].mxu1 %vm617_vm0, %v4810_v52  ;;  %v4811_v52 = vld [vmem:[%s7989_s6] sm:$0xff]  }
 0xb52   :  { %4375 = vmatprep.mubr.bf16.mxu1 %v8146_v10 }
 0xc20   :  { %v4106_v45 = vpop.f32.mrb[4].mxu0 }
 0xc21   :  { %v4178_v27 = vadd.f32 %v4171_v47, %v4106_v45  ;;  %v4108_v58 = vpop.f32.mrb[5].mxu0  ;;  %v4257_v45 = vpop.permute.xlu1 %4256 }
 0xc22   :  { %v4179_v30 = vadd.f32 %v4171_v47, %v4108_v58  ;;  %v4110_v34 = vpop.f32.mrb[6].mxu0 }
 0xc23   :  { %v4693_v3 = vmul.f32 -1.442695, %v4178_v27  ;;  %v4182_v40 = vadd.f32 %v4176_v15, %v4110_v34  ;;  %v4112_v21 = vpop.f32.mrb[7].mxu0 }
 0xc24   :  { %v4694_v17 = vmul.f32 -1.442695, %v4179_v30  ;;  %v4183_v37 = vadd.f32 %v4176_v15, %v4112_v21  ;;  %v4149_v42 = vpop.f32.mrb[4].mxu1 }
 0xc25   :  { %5005 = vpow2.f32 %v4693_v3  ;;  %v4697_v48 = vmul.f32 -1.442695, %v4182_v40  ;;  %v4180_v12 = vadd.f32 %v4171_v47, %v4149_v42  ;;  %v4151_v32 = vpop.f32.mrb[5].mxu1 }
 0xc26   :  { %5007 = vpow2.f32 %v4694_v17  ;;  %v4698_v59 = vmul.f32 -1.442695, %v4183_v37  ;;  %v4181_v24 = vadd.f32 %v4171_v47, %v4151_v32  ;;  %v4153_v61 = vpop.f32.mrb[6].mxu1  ;;  %v4812_v47 = vld [vmem:[%s7989_s6 + $0x8] sm:$0xff]   ;;  %s5135_s6 = smov [#allocation3]  }
 0xc27   :  { %5009 = vpow2.f32 %v4697_v48  ;;  %v4695_v1 = vmul.f32 -1.442695, %v4180_v12  ;;  %v4184_v7 = vadd.f32 %v4176_v15, %v4153_v61  ;;  %v4155_v28 = vpop.f32.mrb[7].mxu1  ;;  %s4529_s21 = sshll.u32 %s5135_s6, 4  ;;  %s4530_s21 = int_to_ptr.vmem [resolvable:$true] %s4529_s21 }
 0xc28   :  { %5011 = vpow2.f32 %v4698_v59  ;;  %v4696_v14 = vmul.f32 -1.442695, %v4181_v24  ;;  %v4185_v5 = vadd.f32 %v4176_v15, %v4155_v28  ;;  %s5101_s22 = scalar_lea.vmem %s4530_s21, 2048  ;;  %p5106_p1 = scmp.lt.s32.totalorder %s4530_s21, %s4530_s21 }
 0xc29   :  { %5013 = vpow2.f32 %v4695_v1  ;;  %v4699_v31 = vmul.f32 -1.442695, %v4184_v7  ;;  %p5102_p0 = scmp.ne.s32.totalorder %s4530_s21, %s5101_s22  ;;  %p5107_p2 = scmp.lt.s32.totalorder %s5101_s22, %s5101_s22 }
 0xc2a   :  { %5015 = vpow2.f32 %v4696_v14  ;;  %v4700_v53 = vmul.f32 -1.442695, %v4185_v5  ;;  %v4267_v14 = vpop.permute.xlu1 %4266 }
 0xc2b   :  { %5017 = vpow2.f32 %v4699_v31  ;;  %p5108_p3 = por %p5107_p2, %p5106_p1 }
 0xc2c   :  { %5019 = vpow2.f32 %v4700_v53 }
 0xc2d   :  { %p5109_p4 = pnand %p5108_p3, %p5102_p0 }
 0xc2f   :  { %v5006_v9 = vpop.eup %5005 }
 0xc30   :  { %v5008_v29 = vpop.eup %5007  ;;  %v4210_v16 = vadd.f32 1.0, %v5006_v9 }
 0xc31   :  { %v5010_v33 = vpop.eup %5009  ;;  %v4211_v25 = vadd.f32 1.0, %v5008_v29 }
 0xc32   :  { %v5012_v55 = vpop.eup %5011  ;;  %5021 = vrcp.f32 %v4210_v16  ;;  %v4214_v13 = vadd.f32 1.0, %v5010_v33 }
 0xc33   :  { %v5014_v43 = vpop.eup %5013  ;;  %5023 = vrcp.f32 %v4211_v25  ;;  %v4215_v51 = vadd.f32 1.0, %v5012_v55 }
 0xc34   :  { %v5016_v18 = vpop.eup %5015  ;;  %5025 = vrcp.f32 %v4214_v13  ;;  %v4212_v0 = vadd.f32 1.0, %v5014_v43 }
 0xc35   :  { %v5018_v8 = vpop.eup %5017  ;;  %5027 = vrcp.f32 %v4215_v51  ;;  %v4213_v35 = vadd.f32 1.0, %v5016_v18 }
 0xc36   :  { %v5020_v60 = vpop.eup %5019  ;;  %5029 = vrcp.f32 %v4212_v0  ;;  %v4216_v63 = vadd.f32 1.0, %v5018_v8 }
 0xc37   :  { %5031 = vrcp.f32 %v4213_v35  ;;  %v4217_v4 = vadd.f32 1.0, %v5020_v60 }
 0xc38   :  { %5033 = vrcp.f32 %v4216_v63 }
 0xc39   :  { %5035 = vrcp.f32 %v4217_v4 }
 0xc3c   :  { %v5022_v57 = vpop.eup %5021 }
 0xc3d   :  { %v5024_v49 = vpop.eup %5023  ;;  %v4234_v6 = vmul.f32 %v5022_v57, %v4178_v27 }
 0xc3e   :  { %v5026_v11 = vpop.eup %5025  ;;  %v4235_v26 = vmul.f32 %v5024_v49, %v4179_v30  ;;  %v4262_v30 = vpop.permute.xlu0 %4261 }
 0xc3f   :  { %v5028_v39 = vpop.eup %5027  ;;  %v4238_v19 = vmul.f32 %v5026_v11, %v4182_v40 }
 0xc40   :  { %v5030_v41 = vpop.eup %5029  ;;  %v4239_v20 = vmul.f32 %v5028_v39, %v4183_v37 }
 0xc41   :  { %v5032_v46 = vpop.eup %5031  ;;  %v4246_v22 = vpack.c.bf16 %v4238_v19, %v4234_v6  ;;  %v4236_v54 = vmul.f32 %v5030_v41, %v4180_v12 }
 0xc42   :  { %v5034_v44 = vpop.eup %5033  ;;  %v4247_v62 = vpack.c.bf16 %v4239_v20, %v4235_v26  ;;  %v4237_v38 = vmul.f32 %v5032_v46, %v4181_v24  ;;  %v4272_v33 = vpop.permute.xlu0 %4271 }
 0xc43   :  { %v5036_v2 = vpop.eup %5035  ;;  %v4240_v50 = vmul.f32 %v5034_v44, %v4184_v7 }
 0xc44   :  { %v4241_v36 = vmul.f32 %v5036_v2, %v4185_v5  ;;  %4290 = vmatprep.subr.bf16.mxu0 %v4247_v62 }
 0xc45   :  { %v4248_v23 = vpack.c.bf16 %v4240_v50, %v4236_v54  ;;  %4291 = vmatpush1.bf16.msra.mxu0 %v4246_v22 }
 0xc46   :  { %v4249_v56 = vpack.c.bf16 %v4241_v36, %v4237_v38 }
 0xc48   :  { %4703 = vmatmul.mubr.msk.bf16.vlgmr.msra.gmra.mrb[28].mxu0 %vm617_vm0, %v4811_v52  ;;  %4343 = vmatprep.subr.bf16.mxu1 %v4249_v56 }
 0xc49   :  { %4344 = vmatpush1.bf16.msra.mxu1 %v4248_v23  ;;  %4332 = vmatprep.mubr.bf16.mxu0 %v8146_v10 }
 0xc4c   :  { %4705 = vmatmul.mubr.msk.bf16.vlgmr.msra.gmra.mrb[28].mxu1 %vm617_vm0, %v4811_v52 }
 0xc4d   :  { %4385 = vmatprep.mubr.bf16.mxu1 %v8146_v10 }
 0xc50   :  { %4704 = vmatmul.mubr.msk.bf16.gmra.mrb[32].mxu0 %vm617_vm0, %v4812_v47 }
 0xc54   :  { %4706 = vmatmul.mubr.msk.bf16.gmra.mrb[32].mxu1 %vm617_vm0, %v4812_v47 }
 0xd1b   :  { %v4324_v27 = vpop.f32.mrb[28].mxu0 }
 0xd1c   :  { %v7907_v58 = vadd.f32 %v4324_v27, %v4257_v45  ;;  %v4326_v15 = vpop.f32.mrb[29].mxu0 }
 0xd1d   :  { %v7909_v34 = vadd.f32 %v4326_v15, %v4257_v45  ;;  %v4328_v3 = vpop.f32.mrb[30].mxu0 }
 0xd1e   :  { %v4707_v40 = vmul.f32 -1.442695, %v7907_v58  ;;  %v7912_v21 = vadd.f32 %v4328_v3, %v4262_v30  ;;  %v4330_v17 = vpop.f32.mrb[31].mxu0 }
 0xd1f   :  { %v4708_v10 = vmul.f32 -1.442695, %v7909_v34  ;;  %v7915_v37 = vadd.f32 %v4330_v17, %v4262_v30  ;;  %v4377_v42 = vpop.f32.mrb[28].mxu1 }
 0xd20   :  { %5037 = vpow2.f32 %v4707_v40  ;;  %v4711_v48 = vmul.f32 -1.442695, %v7912_v21  ;;  %v7918_v12 = vadd.f32 %v4377_v42, %v4257_v45  ;;  %v4379_v32 = vpop.f32.mrb[29].mxu1 }
 0xd21   :  { %5039 = vpow2.f32 %v4708_v10  ;;  %v4712_v59 = vmul.f32 -1.442695, %v7915_v37  ;;  %v7921_v24 = vadd.f32 %v4379_v32, %v4257_v45  ;;  %v4381_v61 = vpop.f32.mrb[30].mxu1 }
 0xd22   :  { %5041 = vpow2.f32 %v4711_v48  ;;  %v4709_v1 = vmul.f32 -1.442695, %v7918_v12  ;;  %v7924_v7 = vadd.f32 %v4381_v61, %v4262_v30  ;;  %v4383_v28 = vpop.f32.mrb[31].mxu1 }
 0xd23   :  { %5043 = vpow2.f32 %v4712_v59  ;;  %v4710_v5 = vmul.f32 -1.442695, %v7921_v24  ;;  %v7927_v31 = vadd.f32 %v4383_v28, %v4262_v30  ;;  %v4334_v53 = vpop.f32.mrb[32].mxu0 }
 0xd24   :  { %5045 = vpow2.f32 %v4709_v1  ;;  %v4713_v9 = vmul.f32 -1.442695, %v7924_v7  ;;  %v7930_v29 = vadd.f32 %v4334_v53, %v4267_v14  ;;  %v4336_v16 = vpop.f32.mrb[33].mxu0 }
 0xd25   :  { %5047 = vpow2.f32 %v4710_v5  ;;  %v4714_v25 = vmul.f32 -1.442695, %v7927_v31  ;;  %v7933_v55 = vadd.f32 %v4336_v16, %v4267_v14  ;;  %v4338_v13 = vpop.f32.mrb[34].mxu0 }
 0xd26   :  { %5049 = vpow2.f32 %v4713_v9  ;;  %v4715_v43 = vmul.f32 -1.442695, %v7930_v29  ;;  %v7936_v51 = vadd.f32 %v4338_v13, %v4272_v33  ;;  %v4340_v18 = vpop.f32.mrb[35].mxu0 }
 0xd27   :  { %5051 = vpow2.f32 %v4714_v25  ;;  %v4716_v0 = vmul.f32 -1.442695, %v7933_v55  ;;  %v7939_v8 = vadd.f32 %v4340_v18, %v4272_v33  ;;  %v4387_v35 = vpop.f32.mrb[32].mxu1 }
 0xd28   :  { %5053 = vpow2.f32 %v4715_v43  ;;  %v4719_v60 = vmul.f32 -1.442695, %v7936_v51  ;;  %v7942_v63 = vadd.f32 %v4387_v35, %v4267_v14  ;;  %v4389_v4 = vpop.f32.mrb[33].mxu1 }
 0xd29   :  { %5055 = vpow2.f32 %v4716_v0  ;;  %v4720_v57 = vmul.f32 -1.442695, %v7939_v8  ;;  %v4391_v49 = vpop.f32.mrb[34].mxu1  ;;  %v7946_v47 = vadd.f32 %v4389_v4, %v4267_v14 }
 0xd2a   :  { %v5038_v11 = vpop.eup %5037  ;;  %5057 = vpow2.f32 %v4719_v60  ;;  %v4717_v39 = vmul.f32 -1.442695, %v7942_v63  ;;  %v4393_v6 = vpop.f32.mrb[35].mxu1  ;;  %v7948_v15 = vadd.f32 %v4391_v49, %v4272_v33 }
 0xd2b   :  { %v5040_v19 = vpop.eup %5039  ;;  %v4444_v41 = vadd.f32 1.0, %v5038_v11  ;;  %5059 = vpow2.f32 %v4720_v57  ;;  %v7950_v40 = vadd.f32 %v4393_v6, %v4272_v33  ;;  %v4718_v32 = vmul.f32 -1.442695, %v7946_v47 }
 0xd2c   :  { %v5042_v26 = vpop.eup %5041  ;;  %v4445_v20 = vadd.f32 1.0, %v5040_v19  ;;  %5061 = vpow2.f32 %v4717_v39  ;;  %v4721_v1 = vmul.f32 -1.442695, %v7948_v15 }
 0xd2d   :  { %v5044_v46 = vpop.eup %5043  ;;  %5063 = vrcp.f32 %v4444_v41  ;;  %v4448_v22 = vadd.f32 1.0, %v5042_v26  ;;  %v4722_v5 = vmul.f32 -1.442695, %v7950_v40 }
 0xd2e   :  { %v5046_v44 = vpop.eup %5045  ;;  %5065 = vrcp.f32 %v4445_v20  ;;  %v4449_v62 = vadd.f32 1.0, %v5044_v46 }
 0xd2f   :  { %v5048_v2 = vpop.eup %5047  ;;  %5067 = vrcp.f32 %v4448_v22  ;;  %v4446_v54 = vadd.f32 1.0, %v5046_v44 }
 0xd30   :  { %v5050_v50 = vpop.eup %5049  ;;  %5069 = vrcp.f32 %v4449_v62  ;;  %v4447_v38 = vadd.f32 1.0, %v5048_v2 }
 0xd31   :  { %v5052_v36 = vpop.eup %5051  ;;  %5071 = vrcp.f32 %v4446_v54  ;;  %v4450_v52 = vadd.f32 1.0, %v5050_v50 }
 0xd32   :  { %v5054_v23 = vpop.eup %5053  ;;  %5073 = vrcp.f32 %v4447_v38  ;;  %v4451_v56 = vadd.f32 1.0, %v5052_v36 }
 0xd33   :  { %v5056_v45 = vpop.eup %5055  ;;  %5075 = vrcp.f32 %v4450_v52  ;;  %v4452_v27 = vadd.f32 1.0, %v5054_v23 }
 0xd34   :  { %v5058_v30 = vpop.eup %5057  ;;  %5077 = vrcp.f32 %v4451_v56  ;;  %v4453_v3 = vadd.f32 1.0, %v5056_v45 }
 0xd35   :  { %v5060_v17 = vpop.eup %5059  ;;  %5079 = vrcp.f32 %v4452_v27  ;;  %v4456_v10 = vadd.f32 1.0, %v5058_v30 }
 0xd36   :  { %v5062_v42 = vpop.eup %5061  ;;  %5081 = vrcp.f32 %v4453_v3  ;;  %v4457_v48 = vadd.f32 1.0, %v5060_v17 }
 0xd37   :  { %v5064_v59 = vpop.eup %5063  ;;  %5083 = vrcp.f32 %v4456_v10  ;;  %v4454_v61 = vadd.f32 1.0, %v5062_v42 }
 0xd38   :  { %v5066_v28 = vpop.eup %5065  ;;  %v4492_v14 = vmul.f32 %v5064_v59, %v7907_v58  ;;  %5085 = vrcp.f32 %v4457_v48 }
 0xd39   :  { %v5068_v53 = vpop.eup %5067  ;;  %v4493_v9 = vmul.f32 %v5066_v28, %v7909_v34  ;;  %5087 = vrcp.f32 %v4454_v61 }
 0xd3a   :  { %v5070_v16 = vpop.eup %5069  ;;  %4508 = vst [vmem:[#allocation3] sm:$0xff] %v4492_v14  ;;  %v4496_v33 = vmul.f32 %v5068_v53, %v7912_v21  ;;  %5089 = vpow2.f32 %v4718_v32 }
 0xd3b   :  { %v5072_v25 = vpop.eup %5071  ;;  %4509 = vst [vmem:[#allocation3 + $0x8] sm:$0xff] %v4493_v9  ;;  %v4497_v13 = vmul.f32 %v5070_v16, %v7915_v37  ;;  %5091 = vpow2.f32 %v4721_v1 }
 0xd3c   :  { %v5074_v43 = vpop.eup %5073  ;;  %4512 = vst [vmem:[#allocation3 + $0x20] sm:$0xff] %v4496_v33  ;;  %v4494_v58 = vmul.f32 %v5072_v25, %v7918_v12  ;;  %5093 = vpow2.f32 %v4722_v5 }
 0xd3d   :  { %v5076_v18 = vpop.eup %5075  ;;  %4513 = vst [vmem:[#allocation3 + $0x28] sm:$0xff] %v4497_v13  ;;  %v4495_v34 = vmul.f32 %v5074_v43, %v7921_v24 }
 0xd3e   :  { %v5078_v0 = vpop.eup %5077  ;;  %4510 = vst [vmem:[#allocation3 + $0x10] sm:$0xff] %v4494_v58  ;;  %v4498_v35 = vmul.f32 %v5076_v18, %v7924_v7 }
 0xd3f   :  { %v5080_v21 = vpop.eup %5079  ;;  %4511 = vst [vmem:[#allocation3 + $0x18] sm:$0xff] %v4495_v34  ;;  %v4499_v60 = vmul.f32 %v5078_v0, %v7927_v31 }
 0xd40   :  { %v5082_v4 = vpop.eup %5081  ;;  %4514 = vst [vmem:[#allocation3 + $0x30] sm:$0xff] %v4498_v35  ;;  %v4500_v37 = vmul.f32 %v5080_v21, %v7930_v29 }
 0xd41   :  { %v5084_v57 = vpop.eup %5083  ;;  %4515 = vst [vmem:[#allocation3 + $0x38] sm:$0xff] %v4499_v60  ;;  %v4501_v12 = vmul.f32 %v5082_v4, %v7933_v55 }
 0xd42   :  { %v5086_v49 = vpop.eup %5085  ;;  %4516 = vst [vmem:[#allocation3 + $0x40] sm:$0xff] %v4500_v37  ;;  %v4504_v24 = vmul.f32 %v5084_v57, %v7936_v51 }
 0xd43   :  { %v5088_v11 = vpop.eup %5087  ;;  %4517 = vst [vmem:[#allocation3 + $0x48] sm:$0xff] %v4501_v12  ;;  %v4505_v7 = vmul.f32 %v5086_v49, %v7939_v8 }
 0xd44   :  { %v5090_v39 = vpop.eup %5089  ;;  %4520 = vst [vmem:[#allocation3 + $0x60] sm:$0xff] %v4504_v24  ;;  %v4502_v31 = vmul.f32 %v5088_v11, %v7942_v63 }
 0xd45   :  { %v5092_v6 = vpop.eup %5091  ;;  %4521 = vst [vmem:[#allocation3 + $0x68] sm:$0xff] %v4505_v7  ;;  %v4455_v19 = vadd.f32 1.0, %v5090_v39 }
 0xd46   :  { %v5094_v29 = vpop.eup %5093  ;;  %4518 = vst [vmem:[#allocation3 + $0x50] sm:$0xff] %v4502_v31  ;;  %v4458_v41 = vadd.f32 1.0, %v5092_v6 }
 0xd47   :  { %5095 = vrcp.f32 %v4455_v19  ;;  %v4459_v55 = vadd.f32 1.0, %v5094_v29 }
 0xd48   :  { %5097 = vrcp.f32 %v4458_v41 }
 0xd49   :  { %5099 = vrcp.f32 %v4459_v55 }
 0xd51   :  { %v5096_v51 = vpop.eup %5095 }
 0xd52   :  { %v5098_v26 = vpop.eup %5097  ;;  %v4503_v8 = vmul.f32 %v5096_v51, %v7946_v47 }
 0xd53   :  { %v5100_v20 = vpop.eup %5099  ;;  %v4506_v46 = vmul.f32 %v5098_v26, %v7948_v15 }
 0xd54   :  { %4519 = vst [vmem:[#allocation3 + $0x58] sm:$0xff] %v4503_v8  ;;  %v4507_v63 = vmul.f32 %v5100_v20, %v7950_v40 }
 0xd55   :  { %4522 = vst [vmem:[#allocation3 + $0x70] sm:$0xff] %v4506_v46 }
 0xd56   :  { %4523 = vst [vmem:[#allocation3 + $0x78] sm:$0xff] %v4507_v63 }
 0xd57   :  { %5112 = shalt.err (!%p5109_p4)
}
 0xd58   :  { %s5113_s14 = scalar_lea.hbm %s7991_s8, 2048 }
 0xd59   :  { %p5114_p5 = scmp.ne.s32.totalorder %s7991_s8, %s5113_s14  ;;  %p5117_p6 = scmp.lt.u32.totalorder %s5113_s14, %s7991_s8 }
 0xd5b   :  { %p5119_p7 = pnand %p5117_p6, %p5114_p5 }
 0xd5d   :  { %5122 = shalt.err (!%p5119_p7)
}
 0xd5e   :  { %s5136_s18 = smov 512   ;;  %s5137_s24 = smov 32  }
 0xd5f   :  { %4535 = dma.vmem_to_hbm [thread:$0]  %s4530_s21, 2048, %s7991_s8, [#allocation4], %s5136_s18, %s5136_s18, %s5137_s24  }
 0xd60   :  { %5123 = dma.done.wait [#allocation4], 2048  }
 0xd61   :  { %5124 = vsyncadd [#allocation4], 4294965248 }
 0xd62   :  { %4539 = vsyncpa [#allocation4], 1 }

</bundles_post_ra>
